<compile_context>
chip_gen: v6e
topology: v6e:2x2x1
jax: 0.10.0
libtpu: 0.0.40
codegen_flags: <defaults>
</compile_context>

<pallas_src>
import math

import jax
import jax.numpy as jnp
from jax.experimental import pallas as pl
from jax.experimental.pallas import tpu as pltpu

NUM_NODE_TYPES = 4   # len(NODE_TYPES)  (synthetic)
NUM_EDGE_TYPES = 3   # len(EDGE_TYPES)  (synthetic)


# ----------------------------- Pallas kernels ------------------------------ #

def _node_kernel(xt_ref, wnl_ref, bnl_ref, wnn_ref, bnn_ref,
                 embp_ref, wp0_ref, wp1_ref, bp_ref, out_ref):
    # xt_ref: [3, TR] (rows on lanes). All params are tiny, full-array blocks.
    xt = xt_ref[...]
    # node_layer_encoder / neuron_num_encoder : sin(Linear(1->H)), transposed
    x0 = jnp.sin(wnl_ref[...] * xt[0:1, :] + bnl_ref[...])          # [H, TR]
    x1 = jnp.sin(wnn_ref[...] * xt[1:2, :] + bnn_ref[...])          # [H, TR]
    # x_proj decomposed into accumulated dots (no concat, K stays 32-aligned)
    y = (jnp.dot(wp0_ref[...], x0, preferred_element_type=jnp.float32)
         + jnp.dot(wp1_ref[...], x1, preferred_element_type=jnp.float32)
         + bp_ref[...])                                             # [H, TR]
    # node_type embedding folded through x_proj -> masked sum of projected rows
    tid = xt[2:3, :].astype(jnp.int32)                              # [1, TR]
    embp = embp_ref[...]                                            # [H, V]
    for t in range(embp_ref.shape[1]):
        y = y + embp[:, t:t + 1] * (tid == t).astype(jnp.float32)
    out_ref[...] = jnp.maximum(y, 0.0)                              # ReLU


def _edge_kernel(et_ref, ww_ref, bw_ref, wel_ref, bel_ref,
                 wcp_ref, bcp_ref, embp_ref, wp0_ref, wp1_ref, wp3_ref,
                 bp_ref, out_ref):
    # et_ref: [6, TE] (edges on lanes).
    et = et_ref[...]
    e0 = jnp.sin(ww_ref[...] * et[0:1, :] + bw_ref[...])            # [H, TE]
    e1 = jnp.sin(wel_ref[...] * et[1:2, :] + bel_ref[...])          # [H, TE]
    wcp = wcp_ref[...]                                              # [H, 3]
    e3 = jnp.sin(wcp[:, 0:1] * et[3:4, :]
                 + wcp[:, 1:2] * et[4:5, :]
                 + wcp[:, 2:3] * et[5:6, :]
                 + bcp_ref[...])                                    # [H, TE]
    y = (jnp.dot(wp0_ref[...], e0, preferred_element_type=jnp.float32)
         + jnp.dot(wp1_ref[...], e1, preferred_element_type=jnp.float32)
         + jnp.dot(wp3_ref[...], e3, preferred_element_type=jnp.float32)
         + bp_ref[...])                                             # [H, TE]
    tid = et[2:3, :].astype(jnp.int32)                              # [1, TE]
    embp = embp_ref[...]                                            # [H, V]
    for t in range(embp_ref.shape[1]):
        y = y + embp[:, t:t + 1] * (tid == t).astype(jnp.float32)
    out_ref[...] = jnp.maximum(y, 0.0)                              # ReLU


# ------------------------------- wrappers ---------------------------------- #

def _round_up(n, m):
    return ((n + m - 1) // m) * m


def _choose_tile(n_rows, row_tile):
    # rows live on the lane axis -> tile must be a multiple of 128
    if n_rows >= row_tile:
        return row_tile
    return _round_up(max(n_rows, 1), 128)


def _rep(arr):
    # tiny parameter block replicated to every grid step (full-array block)
    return pl.BlockSpec(arr.shape, lambda i, _nd=arr.ndim: (0,) * _nd)


def _pad_t(mat, n_pad):
    # [rows, feat] -> [feat, n_pad] (transpose + zero-pad rows on lane axis)
    t = mat.T.astype(jnp.float32)
    return jnp.pad(t, ((0, 0), (0, n_pad - mat.shape[0])))


def node_forward(x, p, *, row_tile=512):
    N = x.shape[0]
    H = p["x_proj_w"].shape[1]
    tile = _choose_tile(N, row_tile)
    n_pad = _round_up(N, tile)

    xt = _pad_t(x, n_pad)                                # [3, n_pad]

    wnl = p["node_layer_w"].T                            # [H, 1]
    bnl = p["node_layer_b"].T                            # [H, 1]
    wnn = p["neuron_num_w"].T
    bnn = p["neuron_num_b"].T
    wp = p["x_proj_w"]                                   # [3H, H]
    wp0 = wp[0:H, :].T                                   # [H, H]
    wp1 = wp[H:2 * H, :].T                               # [H, H]
    embp = (p["node_type_emb"] @ wp[2 * H:3 * H, :]).T   # [H, V] (fold emb thru proj)
    bp = p["x_proj_b"].T                                 # [H, 1]

    out_t = pl.pallas_call(
        _node_kernel,
        out_shape=jax.ShapeDtypeStruct((H, n_pad), jnp.float32),
        grid=(n_pad // tile,),
        in_specs=[
            pl.BlockSpec((3, tile), lambda i: (0, i)),
            _rep(wnl), _rep(bnl), _rep(wnn), _rep(bnn),
            _rep(embp), _rep(wp0), _rep(wp1), _rep(bp),
        ],
        out_specs=pl.BlockSpec((H, tile), lambda i: (0, i)),
        compiler_params=pltpu.CompilerParams(dimension_semantics=("parallel",)),
    )(xt, wnl, bnl, wnn, bnn, embp, wp0, wp1, bp)
    return out_t.T[:N]


def edge_forward(edge_attr, p, *, row_tile=512):
    E = edge_attr.shape[0]
    H = p["edge_proj_w"].shape[1]
    tile = _choose_tile(E, row_tile)
    e_pad = _round_up(E, tile)

    et = _pad_t(edge_attr, e_pad)                        # [6, e_pad]

    ww = p["weight_w"].T                                 # [H, 1]
    bw = p["weight_b"].T
    wel = p["edge_layer_w"].T
    bel = p["edge_layer_b"].T
    wcp = p["conv_pos_w"].T                              # [H, 3]
    bcp = p["conv_pos_b"].T                              # [H, 1]
    wp = p["edge_proj_w"]                                # [4H, H]
    wp0 = wp[0:H, :].T
    wp1 = wp[H:2 * H, :].T
    wp3 = wp[3 * H:4 * H, :].T
    embp = (p["edge_type_emb"] @ wp[2 * H:3 * H, :]).T   # [H, V]
    bp = p["edge_proj_b"].T                              # [H, 1]

    out_t = pl.pallas_call(
        _edge_kernel,
        out_shape=jax.ShapeDtypeStruct((H, e_pad), jnp.float32),
        grid=(e_pad // tile,),
        in_specs=[
            pl.BlockSpec((6, tile), lambda i: (0, i)),
            _rep(ww), _rep(bw), _rep(wel), _rep(bel),
            _rep(wcp), _rep(bcp), _rep(embp),
            _rep(wp0), _rep(wp1), _rep(wp3), _rep(bp),
        ],
        out_specs=pl.BlockSpec((H, tile), lambda i: (0, i)),
        compiler_params=pltpu.CompilerParams(dimension_semantics=("parallel",)),
    )(et, ww, bw, wel, bel, wcp, bcp, embp, wp0, wp1, wp3, bp)
    return out_t.T[:E]


def node_edge_feat_encoder(x, edge_attr, params, *, row_tile=512):
    return (node_forward(x, params, row_tile=row_tile),
            edge_forward(edge_attr, params, row_tile=row_tile))


# --------------------------- parameter creation ----------------------------- #

def make_params(key, hidden_dim):
    ks = iter(jax.random.split(key, 20))

    def linear(fan_in, fan_out):
        bound = 1.0 / math.sqrt(fan_in)
        w = jax.random.uniform(next(ks), (fan_in, fan_out), jnp.float32, -bound, bound)
        b = jax.random.uniform(next(ks), (1, fan_out), jnp.float32, -bound, bound)
        return w, b

    p = {}
    p["node_layer_w"], p["node_layer_b"] = linear(1, hidden_dim)
    p["neuron_num_w"], p["neuron_num_b"] = linear(1, hidden_dim)
    p["node_type_emb"] = jax.random.normal(next(ks), (NUM_NODE_TYPES, hidden_dim), jnp.float32)
    p["x_proj_w"], p["x_proj_b"] = linear(3 * hidden_dim, hidden_dim)
    p["weight_w"], p["weight_b"] = linear(1, hidden_dim)
    p["edge_layer_w"], p["edge_layer_b"] = linear(1, hidden_dim)
    p["conv_pos_w"], p["conv_pos_b"] = linear(3, hidden_dim)
    p["edge_type_emb"] = jax.random.normal(next(ks), (NUM_EDGE_TYPES, hidden_dim), jnp.float32)
    p["edge_proj_w"], p["edge_proj_b"] = linear(4 * hidden_dim, hidden_dim)
    return p


# ------------------------------ pure-JAX ref -------------------------------- #

def ref_forward(x, ea, p):
    x0 = jnp.sin(x[:, 0:1] @ p["node_layer_w"] + p["node_layer_b"])
    x1 = jnp.sin(x[:, 1:2] @ p["neuron_num_w"] + p["neuron_num_b"])
    x2 = p["node_type_emb"][x[:, 2].astype(jnp.int32)]
    xh = jnp.concatenate([x0, x1, x2], axis=1) @ p["x_proj_w"] + p["x_proj_b"]
    e0 = jnp.sin(ea[:, 0:1] @ p["weight_w"] + p["weight_b"])
    e1 = jnp.sin(ea[:, 1:2] @ p["edge_layer_w"] + p["edge_layer_b"])
    e2 = p["edge_type_emb"][ea[:, 2].astype(jnp.int32)]
    e3 = jnp.sin(ea[:, 3:6] @ p["conv_pos_w"] + p["conv_pos_b"])
    eh = jnp.concatenate([e0, e1, e2, e3], axis=1) @ p["edge_proj_w"] + p["edge_proj_b"]
    return jnp.maximum(xh, 0.0), jnp.maximum(eh, 0.0)


# ---------------------------------- main ------------------------------------ #

if __name__ == "__main__":
    HIDDEN = 32
    N_NODES = 300      # not a multiple of the tile -> exercises padding/tail
    N_EDGES = 500

    key = jax.random.PRNGKey(0)
    kp, kx, ke, knt, ket = jax.random.split(key, 5)

    params = make_params(kp, HIDDEN)

    # x: [N, 3] — (layer, neuron_num, node_type_id stored as float)
    x_cont = jax.random.normal(kx, (N_NODES, 2), jnp.float32)
    node_types = jax.random.randint(knt, (N_NODES, 1), 0, NUM_NODE_TYPES).astype(jnp.float32)
    x = jnp.concatenate([x_cont, node_types], axis=1)

    # edge_attr: [E, 6] — (weight, edge_layer, edge_type_id, conv_pos[3])
    e_cont = jax.random.normal(ke, (N_EDGES, 2), jnp.float32)
    edge_types = jax.random.randint(ket, (N_EDGES, 1), 0, NUM_EDGE_TYPES).astype(jnp.float32)
    conv_pos = jax.random.normal(jax.random.fold_in(ke, 1), (N_EDGES, 3), jnp.float32)
    edge_attr = jnp.concatenate([e_cont, edge_types, conv_pos], axis=1)

    # row_tile=128 keeps the demo small while exercising a multi-step grid.
    fwd = jax.jit(lambda a, b, c: node_edge_feat_encoder(a, b, c, row_tile=128))
    x_out, e_out = fwd(x, edge_attr, params)
    jax.block_until_ready((x_out, e_out))

    x_ref, e_ref = ref_forward(x, edge_attr, params)
    assert x_out.shape == (N_NODES, HIDDEN) and e_out.shape == (N_EDGES, HIDDEN)
    assert jnp.allclose(x_out, x_ref, atol=1e-4, rtol=1e-4), float(jnp.abs(x_out - x_ref).max())
    assert jnp.allclose(e_out, e_ref, atol=1e-4, rtol=1e-4), float(jnp.abs(e_out - e_ref).max())
    print("KERNEL_OK")
</pallas_src>

<mosaic_0001>
module attributes {stable_mosaic.version = 11 : i64} {
  func.func @_node_kernel(%arg0: i32, %arg1: memref<3x128xf32, #tpu.memory_space<vmem>>, %arg2: memref<32x1xf32, #tpu.memory_space<vmem>>, %arg3: memref<32x1xf32, #tpu.memory_space<vmem>>, %arg4: memref<32x1xf32, #tpu.memory_space<vmem>>, %arg5: memref<32x1xf32, #tpu.memory_space<vmem>>, %arg6: memref<32x4xf32, #tpu.memory_space<vmem>>, %arg7: memref<32x32xf32, #tpu.memory_space<vmem>>, %arg8: memref<32x32xf32, #tpu.memory_space<vmem>>, %arg9: memref<32x1xf32, #tpu.memory_space<vmem>>, %arg10: memref<32x128xf32, #tpu.memory_space<vmem>>) attributes {dimension_semantics = [#tpu.dimension_semantics<parallel>], iteration_bounds = array<i64: 3>, scalar_prefetch = 0 : i64, scratch_operands = 0 : i64, tpu.core_type = #tpu.core_type<tc>, window_params = [{transform_indices = @transform_0, window_bounds = array<i64: 3, 128>}, {pipeline_mode = #tpu.pipeline_mode<synchronous>, transform_indices = @transform_1, window_bounds = array<i64: 32, 1>}, {pipeline_mode = #tpu.pipeline_mode<synchronous>, transform_indices = @transform_2, window_bounds = array<i64: 32, 1>}, {pipeline_mode = #tpu.pipeline_mode<synchronous>, transform_indices = @transform_3, window_bounds = array<i64: 32, 1>}, {pipeline_mode = #tpu.pipeline_mode<synchronous>, transform_indices = @transform_4, window_bounds = array<i64: 32, 1>}, {pipeline_mode = #tpu.pipeline_mode<synchronous>, transform_indices = @transform_5, window_bounds = array<i64: 32, 4>}, {pipeline_mode = #tpu.pipeline_mode<synchronous>, transform_indices = @transform_6, window_bounds = array<i64: 32, 32>}, {pipeline_mode = #tpu.pipeline_mode<synchronous>, transform_indices = @transform_7, window_bounds = array<i64: 32, 32>}, {pipeline_mode = #tpu.pipeline_mode<synchronous>, transform_indices = @transform_8, window_bounds = array<i64: 32, 1>}, {transform_indices = @transform_9, window_bounds = array<i64: 32, 128>}]} {
    %c0 = arith.constant 0 : index
    %c0_0 = arith.constant 0 : index
    %0 = vector.load %arg1[%c0, %c0_0] : memref<3x128xf32, #tpu.memory_space<vmem>>, vector<3x128xf32>
    %c0_1 = arith.constant 0 : index
    %c0_2 = arith.constant 0 : index
    %1 = vector.load %arg2[%c0_1, %c0_2] : memref<32x1xf32, #tpu.memory_space<vmem>>, vector<32x1xf32>
    %2 = vector.extract_strided_slice %0 {offsets = [0, 0], sizes = [1, 128], strides = [1, 1]} : vector<3x128xf32> to vector<1x128xf32>
    %3 = vector.broadcast %1 : vector<32x1xf32> to vector<32x128xf32>
    %4 = vector.broadcast %2 : vector<1x128xf32> to vector<32x128xf32>
    %5 = arith.mulf %3, %4 : vector<32x128xf32>
    %c0_3 = arith.constant 0 : index
    %c0_4 = arith.constant 0 : index
    %6 = vector.load %arg3[%c0_3, %c0_4] : memref<32x1xf32, #tpu.memory_space<vmem>>, vector<32x1xf32>
    %7 = vector.broadcast %6 : vector<32x1xf32> to vector<32x128xf32>
    %8 = arith.addf %5, %7 : vector<32x128xf32>
    %9 = math.sin %8 : vector<32x128xf32>
    %c0_5 = arith.constant 0 : index
    %c0_6 = arith.constant 0 : index
    %10 = vector.load %arg4[%c0_5, %c0_6] : memref<32x1xf32, #tpu.memory_space<vmem>>, vector<32x1xf32>
    %11 = vector.extract_strided_slice %0 {offsets = [1, 0], sizes = [1, 128], strides = [1, 1]} : vector<3x128xf32> to vector<1x128xf32>
    %12 = vector.broadcast %10 : vector<32x1xf32> to vector<32x128xf32>
    %13 = vector.broadcast %11 : vector<1x128xf32> to vector<32x128xf32>
    %14 = arith.mulf %12, %13 : vector<32x128xf32>
    %c0_7 = arith.constant 0 : index
    %c0_8 = arith.constant 0 : index
    %15 = vector.load %arg5[%c0_7, %c0_8] : memref<32x1xf32, #tpu.memory_space<vmem>>, vector<32x1xf32>
    %16 = vector.broadcast %15 : vector<32x1xf32> to vector<32x128xf32>
    %17 = arith.addf %14, %16 : vector<32x128xf32>
    %18 = math.sin %17 : vector<32x128xf32>
    %c0_9 = arith.constant 0 : index
    %c0_10 = arith.constant 0 : index
    %19 = vector.load %arg7[%c0_9, %c0_10] : memref<32x32xf32, #tpu.memory_space<vmem>>, vector<32x32xf32>
    %cst = arith.constant dense<0.000000e+00> : vector<32x128xf32>
    %20 = tpu.matmul %19, %9, %cst {dimension_numbers = #tpu.dot_dimension_numbers<[1], [0], [0], [1], [0, 0, 1, 1], [], []>} : vector<32x32xf32>, vector<32x128xf32>, vector<32x128xf32> -> vector<32x128xf32>
    %c0_11 = arith.constant 0 : index
    %c0_12 = arith.constant 0 : index
    %21 = vector.load %arg8[%c0_11, %c0_12] : memref<32x32xf32, #tpu.memory_space<vmem>>, vector<32x32xf32>
    %cst_13 = arith.constant dense<0.000000e+00> : vector<32x128xf32>
    %22 = tpu.matmul %21, %18, %cst_13 {dimension_numbers = #tpu.dot_dimension_numbers<[1], [0], [0], [1], [0, 0, 1, 1], [], []>} : vector<32x32xf32>, vector<32x128xf32>, vector<32x128xf32> -> vector<32x128xf32>
    %23 = arith.addf %20, %22 : vector<32x128xf32>
    %c0_14 = arith.constant 0 : index
    %c0_15 = arith.constant 0 : index
    %24 = vector.load %arg9[%c0_14, %c0_15] : memref<32x1xf32, #tpu.memory_space<vmem>>, vector<32x1xf32>
    %25 = vector.broadcast %24 : vector<32x1xf32> to vector<32x128xf32>
    %26 = arith.addf %23, %25 : vector<32x128xf32>
    %27 = vector.extract_strided_slice %0 {offsets = [2, 0], sizes = [1, 128], strides = [1, 1]} : vector<3x128xf32> to vector<1x128xf32>
    %28 = arith.fptosi %27 : vector<1x128xf32> to vector<1x128xi32>
    %c0_16 = arith.constant 0 : index
    %c0_17 = arith.constant 0 : index
    %29 = vector.load %arg6[%c0_16, %c0_17] : memref<32x4xf32, #tpu.memory_space<vmem>>, vector<32x4xf32>
    %30 = vector.extract_strided_slice %29 {offsets = [0, 0], sizes = [32, 1], strides = [1, 1]} : vector<32x4xf32> to vector<32x1xf32>
    %c0_i32 = arith.constant 0 : i32
    %31 = vector.broadcast %c0_i32 : i32 to vector<1x128xi32>
    %32 = arith.cmpi eq, %28, %31 : vector<1x128xi32>
    %33 = arith.extui %32 : vector<1x128xi1> to vector<1x128xi32>
    %34 = arith.sitofp %33 : vector<1x128xi32> to vector<1x128xf32>
    %35 = vector.broadcast %30 : vector<32x1xf32> to vector<32x128xf32>
    %36 = vector.broadcast %34 : vector<1x128xf32> to vector<32x128xf32>
    %37 = arith.mulf %35, %36 : vector<32x128xf32>
    %38 = arith.addf %26, %37 : vector<32x128xf32>
    %39 = vector.extract_strided_slice %29 {offsets = [0, 1], sizes = [32, 1], strides = [1, 1]} : vector<32x4xf32> to vector<32x1xf32>
    %c1_i32 = arith.constant 1 : i32
    %40 = vector.broadcast %c1_i32 : i32 to vector<1x128xi32>
    %41 = arith.cmpi eq, %28, %40 : vector<1x128xi32>
    %42 = arith.extui %41 : vector<1x128xi1> to vector<1x128xi32>
    %43 = arith.sitofp %42 : vector<1x128xi32> to vector<1x128xf32>
    %44 = vector.broadcast %39 : vector<32x1xf32> to vector<32x128xf32>
    %45 = vector.broadcast %43 : vector<1x128xf32> to vector<32x128xf32>
    %46 = arith.mulf %44, %45 : vector<32x128xf32>
    %47 = arith.addf %38, %46 : vector<32x128xf32>
    %48 = vector.extract_strided_slice %29 {offsets = [0, 2], sizes = [32, 1], strides = [1, 1]} : vector<32x4xf32> to vector<32x1xf32>
    %c2_i32 = arith.constant 2 : i32
    %49 = vector.broadcast %c2_i32 : i32 to vector<1x128xi32>
    %50 = arith.cmpi eq, %28, %49 : vector<1x128xi32>
    %51 = arith.extui %50 : vector<1x128xi1> to vector<1x128xi32>
    %52 = arith.sitofp %51 : vector<1x128xi32> to vector<1x128xf32>
    %53 = vector.broadcast %48 : vector<32x1xf32> to vector<32x128xf32>
    %54 = vector.broadcast %52 : vector<1x128xf32> to vector<32x128xf32>
    %55 = arith.mulf %53, %54 : vector<32x128xf32>
    %56 = arith.addf %47, %55 : vector<32x128xf32>
    %57 = vector.extract_strided_slice %29 {offsets = [0, 3], sizes = [32, 1], strides = [1, 1]} : vector<32x4xf32> to vector<32x1xf32>
    %c3_i32 = arith.constant 3 : i32
    %58 = vector.broadcast %c3_i32 : i32 to vector<1x128xi32>
    %59 = arith.cmpi eq, %28, %58 : vector<1x128xi32>
    %60 = arith.extui %59 : vector<1x128xi1> to vector<1x128xi32>
    %61 = arith.sitofp %60 : vector<1x128xi32> to vector<1x128xf32>
    %62 = vector.broadcast %57 : vector<32x1xf32> to vector<32x128xf32>
    %63 = vector.broadcast %61 : vector<1x128xf32> to vector<32x128xf32>
    %64 = arith.mulf %62, %63 : vector<32x128xf32>
    %65 = arith.addf %56, %64 : vector<32x128xf32>
    %cst_18 = arith.constant 0.000000e+00 : f32
    %66 = vector.broadcast %cst_18 : f32 to vector<32x128xf32>
    %67 = arith.maximumf %65, %66 : vector<32x128xf32>
    %c0_19 = arith.constant 0 : index
    %c0_20 = arith.constant 0 : index
    %68 = vector.load %arg10[%c0_19, %c0_20] : memref<32x128xf32, #tpu.memory_space<vmem>>, vector<32x128xf32>
    tpu.vector_store %arg10[%c0_19, %c0_20], %67 {strides = array<i32>} : memref<32x128xf32, #tpu.memory_space<vmem>>, vector<32x128xf32>,
    return
  }
  func.func @transform_0(%arg0: i32) -> (i32, i32) {
    %c0_i32 = arith.constant 0 : i32
    %c0_i32_0 = arith.constant 0 : i32
    return %c0_i32, %arg0 : i32, i32
  }
  func.func @transform_1(%arg0: i32) -> (i32, i32) {
    %c0_i32 = arith.constant 0 : i32
    %c0_i32_0 = arith.constant 0 : i32
    %c0_i32_1 = arith.constant 0 : i32
    return %c0_i32, %c0_i32_0 : i32, i32
  }
  func.func @transform_2(%arg0: i32) -> (i32, i32) {
    %c0_i32 = arith.constant 0 : i32
    %c0_i32_0 = arith.constant 0 : i32
    %c0_i32_1 = arith.constant 0 : i32
    return %c0_i32, %c0_i32_0 : i32, i32
  }
  func.func @transform_3(%arg0: i32) -> (i32, i32) {
    %c0_i32 = arith.constant 0 : i32
    %c0_i32_0 = arith.constant 0 : i32
    %c0_i32_1 = arith.constant 0 : i32
    return %c0_i32, %c0_i32_0 : i32, i32
  }
  func.func @transform_4(%arg0: i32) -> (i32, i32) {
    %c0_i32 = arith.constant 0 : i32
    %c0_i32_0 = arith.constant 0 : i32
    %c0_i32_1 = arith.constant 0 : i32
    return %c0_i32, %c0_i32_0 : i32, i32
  }
  func.func @transform_5(%arg0: i32) -> (i32, i32) {
    %c0_i32 = arith.constant 0 : i32
    %c0_i32_0 = arith.constant 0 : i32
    %c0_i32_1 = arith.constant 0 : i32
    return %c0_i32, %c0_i32_0 : i32, i32
  }
  func.func @transform_6(%arg0: i32) -> (i32, i32) {
    %c0_i32 = arith.constant 0 : i32
    %c0_i32_0 = arith.constant 0 : i32
    %c0_i32_1 = arith.constant 0 : i32
    return %c0_i32, %c0_i32_0 : i32, i32
  }
  func.func @transform_7(%arg0: i32) -> (i32, i32) {
    %c0_i32 = arith.constant 0 : i32
    %c0_i32_0 = arith.constant 0 : i32
    %c0_i32_1 = arith.constant 0 : i32
    return %c0_i32, %c0_i32_0 : i32, i32
  }
  func.func @transform_8(%arg0: i32) -> (i32, i32) {
    %c0_i32 = arith.constant 0 : i32
    %c0_i32_0 = arith.constant 0 : i32
    %c0_i32_1 = arith.constant 0 : i32
    return %c0_i32, %c0_i32_0 : i32, i32
  }
  func.func @transform_9(%arg0: i32) -> (i32, i32) {
    %c0_i32 = arith.constant 0 : i32
    %c0_i32_0 = arith.constant 0 : i32
    return %c0_i32, %arg0 : i32, i32
  }
}

module attributes {stable_mosaic.version = 11 : i64} {
  func.func @_edge_kernel(%arg0: i32, %arg1: memref<6x128xf32, #tpu.memory_space<vmem>>, %arg2: memref<32x1xf32, #tpu.memory_space<vmem>>, %arg3: memref<32x1xf32, #tpu.memory_space<vmem>>, %arg4: memref<32x1xf32, #tpu.memory_space<vmem>>, %arg5: memref<32x1xf32, #tpu.memory_space<vmem>>, %arg6: memref<32x3xf32, #tpu.memory_space<vmem>>, %arg7: memref<32x1xf32, #tpu.memory_space<vmem>>, %arg8: memref<32x3xf32, #tpu.memory_space<vmem>>, %arg9: memref<32x32xf32, #tpu.memory_space<vmem>>, %arg10: memref<32x32xf32, #tpu.memory_space<vmem>>, %arg11: memref<32x32xf32, #tpu.memory_space<vmem>>, %arg12: memref<32x1xf32, #tpu.memory_space<vmem>>, %arg13: memref<32x128xf32, #tpu.memory_space<vmem>>) attributes {dimension_semantics = [#tpu.dimension_semantics<parallel>], iteration_bounds = array<i64: 4>, scalar_prefetch = 0 : i64, scratch_operands = 0 : i64, tpu.core_type = #tpu.core_type<tc>, window_params = [{transform_indices = @transform_0, window_bounds = array<i64: 6, 128>}, {pipeline_mode = #tpu.pipeline_mode<synchronous>, transform_indices = @transform_1, window_bounds = array<i64: 32, 1>}, {pipeline_mode = #tpu.pipeline_mode<synchronous>, transform_indices = @transform_2, window_bounds = array<i64: 32, 1>}, {pipeline_mode = #tpu.pipeline_mode<synchronous>, transform_indices = @transform_3, window_bounds = array<i64: 32, 1>}, {pipeline_mode = #tpu.pipeline_mode<synchronous>, transform_indices = @transform_4, window_bounds = array<i64: 32, 1>}, {pipeline_mode = #tpu.pipeline_mode<synchronous>, transform_indices = @transform_5, window_bounds = array<i64: 32, 3>}, {pipeline_mode = #tpu.pipeline_mode<synchronous>, transform_indices = @transform_6, window_bounds = array<i64: 32, 1>}, {pipeline_mode = #tpu.pipeline_mode<synchronous>, transform_indices = @transform_7, window_bounds = array<i64: 32, 3>}, {pipeline_mode = #tpu.pipeline_mode<synchronous>, transform_indices = @transform_8, window_bounds = array<i64: 32, 32>}, {pipeline_mode = #tpu.pipeline_mode<synchronous>, transform_indices = @transform_9, window_bounds = array<i64: 32, 32>}, {pipeline_mode = #tpu.pipeline_mode<synchronous>, transform_indices = @transform_10, window_bounds = array<i64: 32, 32>}, {pipeline_mode = #tpu.pipeline_mode<synchronous>, transform_indices = @transform_11, window_bounds = array<i64: 32, 1>}, {transform_indices = @transform_12, window_bounds = array<i64: 32, 128>}]} {
    %c0 = arith.constant 0 : index
    %c0_0 = arith.constant 0 : index
    %0 = vector.load %arg1[%c0, %c0_0] : memref<6x128xf32, #tpu.memory_space<vmem>>, vector<6x128xf32>
    %c0_1 = arith.constant 0 : index
    %c0_2 = arith.constant 0 : index
    %1 = vector.load %arg2[%c0_1, %c0_2] : memref<32x1xf32, #tpu.memory_space<vmem>>, vector<32x1xf32>
    %2 = vector.extract_strided_slice %0 {offsets = [0, 0], sizes = [1, 128], strides = [1, 1]} : vector<6x128xf32> to vector<1x128xf32>
    %3 = vector.broadcast %1 : vector<32x1xf32> to vector<32x128xf32>
    %4 = vector.broadcast %2 : vector<1x128xf32> to vector<32x128xf32>
    %5 = arith.mulf %3, %4 : vector<32x128xf32>
    %c0_3 = arith.constant 0 : index
    %c0_4 = arith.constant 0 : index
    %6 = vector.load %arg3[%c0_3, %c0_4] : memref<32x1xf32, #tpu.memory_space<vmem>>, vector<32x1xf32>
    %7 = vector.broadcast %6 : vector<32x1xf32> to vector<32x128xf32>
    %8 = arith.addf %5, %7 : vector<32x128xf32>
    %9 = math.sin %8 : vector<32x128xf32>
    %c0_5 = arith.constant 0 : index
    %c0_6 = arith.constant 0 : index
    %10 = vector.load %arg4[%c0_5, %c0_6] : memref<32x1xf32, #tpu.memory_space<vmem>>, vector<32x1xf32>
    %11 = vector.extract_strided_slice %0 {offsets = [1, 0], sizes = [1, 128], strides = [1, 1]} : vector<6x128xf32> to vector<1x128xf32>
    %12 = vector.broadcast %10 : vector<32x1xf32> to vector<32x128xf32>
    %13 = vector.broadcast %11 : vector<1x128xf32> to vector<32x128xf32>
    %14 = arith.mulf %12, %13 : vector<32x128xf32>
    %c0_7 = arith.constant 0 : index
    %c0_8 = arith.constant 0 : index
    %15 = vector.load %arg5[%c0_7, %c0_8] : memref<32x1xf32, #tpu.memory_space<vmem>>, vector<32x1xf32>
    %16 = vector.broadcast %15 : vector<32x1xf32> to vector<32x128xf32>
    %17 = arith.addf %14, %16 : vector<32x128xf32>
    %18 = math.sin %17 : vector<32x128xf32>
    %c0_9 = arith.constant 0 : index
    %c0_10 = arith.constant 0 : index
    %19 = vector.load %arg6[%c0_9, %c0_10] : memref<32x3xf32, #tpu.memory_space<vmem>>, vector<32x3xf32>
    %20 = vector.extract_strided_slice %19 {offsets = [0, 0], sizes = [32, 1], strides = [1, 1]} : vector<32x3xf32> to vector<32x1xf32>
    %21 = vector.extract_strided_slice %0 {offsets = [3, 0], sizes = [1, 128], strides = [1, 1]} : vector<6x128xf32> to vector<1x128xf32>
    %22 = vector.broadcast %20 : vector<32x1xf32> to vector<32x128xf32>
    %23 = vector.broadcast %21 : vector<1x128xf32> to vector<32x128xf32>
    %24 = arith.mulf %22, %23 : vector<32x128xf32>
    %25 = vector.extract_strided_slice %19 {offsets = [0, 1], sizes = [32, 1], strides = [1, 1]} : vector<32x3xf32> to vector<32x1xf32>
    %26 = vector.extract_strided_slice %0 {offsets = [4, 0], sizes = [1, 128], strides = [1, 1]} : vector<6x128xf32> to vector<1x128xf32>
    %27 = vector.broadcast %25 : vector<32x1xf32> to vector<32x128xf32>
    %28 = vector.broadcast %26 : vector<1x128xf32> to vector<32x128xf32>
    %29 = arith.mulf %27, %28 : vector<32x128xf32>
    %30 = arith.addf %24, %29 : vector<32x128xf32>
    %31 = vector.extract_strided_slice %19 {offsets = [0, 2], sizes = [32, 1], strides = [1, 1]} : vector<32x3xf32> to vector<32x1xf32>
    %32 = vector.extract_strided_slice %0 {offsets = [5, 0], sizes = [1, 128], strides = [1, 1]} : vector<6x128xf32> to vector<1x128xf32>
    %33 = vector.broadcast %31 : vector<32x1xf32> to vector<32x128xf32>
    %34 = vector.broadcast %32 : vector<1x128xf32> to vector<32x128xf32>
    %35 = arith.mulf %33, %34 : vector<32x128xf32>
    %36 = arith.addf %30, %35 : vector<32x128xf32>
    %c0_11 = arith.constant 0 : index
    %c0_12 = arith.constant 0 : index
    %37 = vector.load %arg7[%c0_11, %c0_12] : memref<32x1xf32, #tpu.memory_space<vmem>>, vector<32x1xf32>
    %38 = vector.broadcast %37 : vector<32x1xf32> to vector<32x128xf32>
    %39 = arith.addf %36, %38 : vector<32x128xf32>
    %40 = math.sin %39 : vector<32x128xf32>
    %c0_13 = arith.constant 0 : index
    %c0_14 = arith.constant 0 : index
    %41 = vector.load %arg9[%c0_13, %c0_14] : memref<32x32xf32, #tpu.memory_space<vmem>>, vector<32x32xf32>
    %cst = arith.constant dense<0.000000e+00> : vector<32x128xf32>
    %42 = tpu.matmul %41, %9, %cst {dimension_numbers = #tpu.dot_dimension_numbers<[1], [0], [0], [1], [0, 0, 1, 1], [], []>} : vector<32x32xf32>, vector<32x128xf32>, vector<32x128xf32> -> vector<32x128xf32>
    %c0_15 = arith.constant 0 : index
    %c0_16 = arith.constant 0 : index
    %43 = vector.load %arg10[%c0_15, %c0_16] : memref<32x32xf32, #tpu.memory_space<vmem>>, vector<32x32xf32>
    %cst_17 = arith.constant dense<0.000000e+00> : vector<32x128xf32>
    %44 = tpu.matmul %43, %18, %cst_17 {dimension_numbers = #tpu.dot_dimension_numbers<[1], [0], [0], [1], [0, 0, 1, 1], [], []>} : vector<32x32xf32>, vector<32x128xf32>, vector<32x128xf32> -> vector<32x128xf32>
    %45 = arith.addf %42, %44 : vector<32x128xf32>
    %c0_18 = arith.constant 0 : index
    %c0_19 = arith.constant 0 : index
    %46 = vector.load %arg11[%c0_18, %c0_19] : memref<32x32xf32, #tpu.memory_space<vmem>>, vector<32x32xf32>
    %cst_20 = arith.constant dense<0.000000e+00> : vector<32x128xf32>
    %47 = tpu.matmul %46, %40, %cst_20 {dimension_numbers = #tpu.dot_dimension_numbers<[1], [0], [0], [1], [0, 0, 1, 1], [], []>} : vector<32x32xf32>, vector<32x128xf32>, vector<32x128xf32> -> vector<32x128xf32>
    %48 = arith.addf %45, %47 : vector<32x128xf32>
    %c0_21 = arith.constant 0 : index
    %c0_22 = arith.constant 0 : index
    %49 = vector.load %arg12[%c0_21, %c0_22] : memref<32x1xf32, #tpu.memory_space<vmem>>, vector<32x1xf32>
    %50 = vector.broadcast %49 : vector<32x1xf32> to vector<32x128xf32>
    %51 = arith.addf %48, %50 : vector<32x128xf32>
    %52 = vector.extract_strided_slice %0 {offsets = [2, 0], sizes = [1, 128], strides = [1, 1]} : vector<6x128xf32> to vector<1x128xf32>
    %53 = arith.fptosi %52 : vector<1x128xf32> to vector<1x128xi32>
    %c0_23 = arith.constant 0 : index
    %c0_24 = arith.constant 0 : index
    %54 = vector.load %arg8[%c0_23, %c0_24] : memref<32x3xf32, #tpu.memory_space<vmem>>, vector<32x3xf32>
    %55 = vector.extract_strided_slice %54 {offsets = [0, 0], sizes = [32, 1], strides = [1, 1]} : vector<32x3xf32> to vector<32x1xf32>
    %c0_i32 = arith.constant 0 : i32
    %56 = vector.broadcast %c0_i32 : i32 to vector<1x128xi32>
    %57 = arith.cmpi eq, %53, %56 : vector<1x128xi32>
    %58 = arith.extui %57 : vector<1x128xi1> to vector<1x128xi32>
    %59 = arith.sitofp %58 : vector<1x128xi32> to vector<1x128xf32>
    %60 = vector.broadcast %55 : vector<32x1xf32> to vector<32x128xf32>
    %61 = vector.broadcast %59 : vector<1x128xf32> to vector<32x128xf32>
    %62 = arith.mulf %60, %61 : vector<32x128xf32>
    %63 = arith.addf %51, %62 : vector<32x128xf32>
    %64 = vector.extract_strided_slice %54 {offsets = [0, 1], sizes = [32, 1], strides = [1, 1]} : vector<32x3xf32> to vector<32x1xf32>
    %c1_i32 = arith.constant 1 : i32
    %65 = vector.broadcast %c1_i32 : i32 to vector<1x128xi32>
    %66 = arith.cmpi eq, %53, %65 : vector<1x128xi32>
    %67 = arith.extui %66 : vector<1x128xi1> to vector<1x128xi32>
    %68 = arith.sitofp %67 : vector<1x128xi32> to vector<1x128xf32>
    %69 = vector.broadcast %64 : vector<32x1xf32> to vector<32x128xf32>
    %70 = vector.broadcast %68 : vector<1x128xf32> to vector<32x128xf32>
    %71 = arith.mulf %69, %70 : vector<32x128xf32>
    %72 = arith.addf %63, %71 : vector<32x128xf32>
    %73 = vector.extract_strided_slice %54 {offsets = [0, 2], sizes = [32, 1], strides = [1, 1]} : vector<32x3xf32> to vector<32x1xf32>
    %c2_i32 = arith.constant 2 : i32
    %74 = vector.broadcast %c2_i32 : i32 to vector<1x128xi32>
    %75 = arith.cmpi eq, %53, %74 : vector<1x128xi32>
    %76 = arith.extui %75 : vector<1x128xi1> to vector<1x128xi32>
    %77 = arith.sitofp %76 : vector<1x128xi32> to vector<1x128xf32>
    %78 = vector.broadcast %73 : vector<32x1xf32> to vector<32x128xf32>
    %79 = vector.broadcast %77 : vector<1x128xf32> to vector<32x128xf32>
    %80 = arith.mulf %78, %79 : vector<32x128xf32>
    %81 = arith.addf %72, %80 : vector<32x128xf32>
    %cst_25 = arith.constant 0.000000e+00 : f32
    %82 = vector.broadcast %cst_25 : f32 to vector<32x128xf32>
    %83 = arith.maximumf %81, %82 : vector<32x128xf32>
    %c0_26 = arith.constant 0 : index
    %c0_27 = arith.constant 0 : index
    %84 = vector.load %arg13[%c0_26, %c0_27] : memref<32x128xf32, #tpu.memory_space<vmem>>, vector<32x128xf32>
    tpu.vector_store %arg13[%c0_26, %c0_27], %83 {strides = array<i32>} : memref<32x128xf32, #tpu.memory_space<vmem>>, vector<32x128xf32>,
    return
  }
  func.func @transform_0(%arg0: i32) -> (i32, i32) {
    %c0_i32 = arith.constant 0 : i32
    %c0_i32_0 = arith.constant 0 : i32
    return %c0_i32, %arg0 : i32, i32
  }
  func.func @transform_1(%arg0: i32) -> (i32, i32) {
    %c0_i32 = arith.constant 0 : i32
    %c0_i32_0 = arith.constant 0 : i32
    %c0_i32_1 = arith.constant 0 : i32
    return %c0_i32, %c0_i32_0 : i32, i32
  }
  func.func @transform_2(%arg0: i32) -> (i32, i32) {
    %c0_i32 = arith.constant 0 : i32
    %c0_i32_0 = arith.constant 0 : i32
    %c0_i32_1 = arith.constant 0 : i32
    return %c0_i32, %c0_i32_0 : i32, i32
  }
  func.func @transform_3(%arg0: i32) -> (i32, i32) {
    %c0_i32 = arith.constant 0 : i32
    %c0_i32_0 = arith.constant 0 : i32
    %c0_i32_1 = arith.constant 0 : i32
    return %c0_i32, %c0_i32_0 : i32, i32
  }
  func.func @transform_4(%arg0: i32) -> (i32, i32) {
    %c0_i32 = arith.constant 0 : i32
    %c0_i32_0 = arith.constant 0 : i32
    %c0_i32_1 = arith.constant 0 : i32
    return %c0_i32, %c0_i32_0 : i32, i32
  }
  func.func @transform_5(%arg0: i32) -> (i32, i32) {
    %c0_i32 = arith.constant 0 : i32
    %c0_i32_0 = arith.constant 0 : i32
    %c0_i32_1 = arith.constant 0 : i32
    return %c0_i32, %c0_i32_0 : i32, i32
  }
  func.func @transform_6(%arg0: i32) -> (i32, i32) {
    %c0_i32 = arith.constant 0 : i32
    %c0_i32_0 = arith.constant 0 : i32
    %c0_i32_1 = arith.constant 0 : i32
    return %c0_i32, %c0_i32_0 : i32, i32
  }
  func.func @transform_7(%arg0: i32) -> (i32, i32) {
    %c0_i32 = arith.constant 0 : i32
    %c0_i32_0 = arith.constant 0 : i32
    %c0_i32_1 = arith.constant 0 : i32
    return %c0_i32, %c0_i32_0 : i32, i32
  }
  func.func @transform_8(%arg0: i32) -> (i32, i32) {
    %c0_i32 = arith.constant 0 : i32
    %c0_i32_0 = arith.constant 0 : i32
    %c0_i32_1 = arith.constant 0 : i32
    return %c0_i32, %c0_i32_0 : i32, i32
  }
  func.func @transform_9(%arg0: i32) -> (i32, i32) {
    %c0_i32 = arith.constant 0 : i32
    %c0_i32_0 = arith.constant 0 : i32
    %c0_i32_1 = arith.constant 0 : i32
    return %c0_i32, %c0_i32_0 : i32, i32
  }
  func.func @transform_10(%arg0: i32) -> (i32, i32) {
    %c0_i32 = arith.constant 0 : i32
    %c0_i32_0 = arith.constant 0 : i32
    %c0_i32_1 = arith.constant 0 : i32
    return %c0_i32, %c0_i32_0 : i32, i32
  }
  func.func @transform_11(%arg0: i32) -> (i32, i32) {
    %c0_i32 = arith.constant 0 : i32
    %c0_i32_0 = arith.constant 0 : i32
    %c0_i32_1 = arith.constant 0 : i32
    return %c0_i32, %c0_i32_0 : i32, i32
  }
  func.func @transform_12(%arg0: i32) -> (i32, i32) {
    %c0_i32 = arith.constant 0 : i32
    %c0_i32_0 = arith.constant 0 : i32
    return %c0_i32, %arg0 : i32, i32
  }
}

</mosaic_0001>

<bundles_post_ra>
// kernel: _lambda_.2
= control target key start
LH: loop header
LB: loop body
LE: loop exit
PB: predicated region body
PF: predicated region fallthrough
CT: control target
= control target key end

     0   :  { %14 = vsyncpa [#allocation3], 0  ;;  %s3137_s0 = inlined_call_operand.vmem [shape: f32[3,384], index: 0, kind: input, shape index: {}]   ;;  %s3138_s1 = inlined_call_operand.vmem [shape: f32[32,1], index: 1, kind: input, shape index: {}]   ;;  %s3139_s2 = inlined_call_operand.vmem [shape: f32[32,1], index: 2, kind: input, shape index: {}]   ;;  %s3140_s3 = inlined_call_operand.vmem [shape: f32[32,1], index: 3, kind: input, shape index: {}]   ;;  %s3141_s4 = inlined_call_operand.vmem [shape: f32[32,1], index: 4, kind: input, shape index: {}]   ;;  %s3142_s5 = inlined_call_operand.vmem [shape: f32[32,4], index: 5, kind: input, shape index: {}]   ;;  %s3143_s6 = inlined_call_operand.vmem [shape: f32[32,32], index: 6, kind: input, shape index: {}]   ;;  %s3144_s7 = inlined_call_operand.vmem [shape: f32[32,32], index: 7, kind: input, shape index: {}]   ;;  %s3145_s8 = inlined_call_operand.vmem [shape: f32[32,1], index: 8, kind: input, shape index: {}]   ;;  %s3146_s9 = inlined_call_operand.hbm [shape: f32[32,384], index: 9, kind: output, shape index: {}]  }
   0x1   :  { %16 = vsyncpa [#allocation3 + $0x1], 0  ;;  %s2085_s30 = smov 0   ;;  %s2087_s10 = smov 0  }
   0x2   :  { %s2089_s11 = smov 0   ;;  %s2091_s12 = smov 0  }
   0x3 LB: > { %s2106_s13 = sadd.s32 4294967295, %s2018_s12   ;;  %s1728_s14 = sadd.s32 4294967294, %s2018_s12   ;;  %s2018_s12 = sphi %s2091_s12, %s3233_s12   ;;  %s2014_s11 = sphi %s2089_s11, %s3232_s11   ;;  %s2010_s10 = sphi %s2087_s10, %s3231_s10   ;;  %s2006_s30 = sphi %s2085_s30, %s3230_s30  }
   0x4   : > { %s2110_s15 = sadd.s32 1, %s2018_s12   ;;  %s223_s16 = sadd.s32 1, %s2014_s11 }
   0x5   : > { %s220_s17 = ssub.s32 %s2018_s12, %s2110_s15  ;;  %p233_p0 = scmp.ne.s32.totalorder %s2014_s11, %s2010_s10 }
   0x6   : > { %p221_p1 = scmp.eq.s32.totalorder %s220_s17, 0  ;;  %p234_p2 = scmp.eq.s32.totalorder %s2106_s13, 2 }
   0x7   : > { %p239_p3 = scmp.ne.s32.totalorder %s2010_s10, %s2006_s30  ;;  %p240_p4 = scmp.eq.s32.totalorder %s1728_s14, 2 }
   0x8   : > { %s2121_s18 = scalar_select %p221_p1, %s2014_s11, %s223_s16  }
   0x9   : > { %p2123_p5 = por %p234_p2, %p233_p0  ;;  %p2127_p6 = por %p240_p4, %p239_p3 }
   0xa   : > { %p1731_p7 = scmp.ge.s32.totalorder %s2018_s12, 1  ;;  %p289_p8 = scmp.lt.s32.totalorder %s2018_s12, 4 }
   0xc   : > { %p290_p9 = pnand %p1731_p7, %p289_p8 }
   0xe   : > { %293 = sbr.rel (%p290_p9) target bundleno = 604 (0x25c), region = 56 }
  0x13   : > { %v332_v0 = vld [vmem:[%s3138_s1 + $0x18] sm:$0xff]  ;;  %v331_v1 = vld [vmem:[%s3138_s1 + $0x10] sm:$0xff]  ;;  %v2020_v2 = vmov 0   ;;  %v330_v8 = vld [vmem:[%s3138_s1 + $0x8] sm:$0xff]  ;;  %p324_p10 = scmp.lt.s32.totalorder %s2106_s13, 2  ;;  %v353_v25 = vlaneseq  ;;  %s1779_s16 = sshll.u32 %s2106_s13, 7 }
  0x14   : > { %1914 = vset.pattern.permute.xlu1 %v2020_v2  ;;  %1913 = vset.pattern.permute.xlu0 %v2020_v2  ;;  %v808_v3 = vld [vmem:[%s3140_s3 + $0x18] sm:$0xff]  ;;  %v807_v5 = vld [vmem:[%s3140_s3 + $0x10] sm:$0xff]  ;;  %v806_v10 = vld [vmem:[%s3140_s3 + $0x8] sm:$0xff]  ;;  %s2031_s24 = smov [#allocation2]  }
  0x15   : > { %350 = vperm.xlu0 %1913, %v332_v0   ;;  %345 = vperm.xlu1 %1914, %v331_v1   ;;  %v364_v4 = vld [vmem:[%s3139_s2 + $0x18] sm:$0xff]  ;;  %v363_v7 = vld [vmem:[%s3139_s2 + $0x10] sm:$0xff]  ;;  %v362_v11 = vld [vmem:[%s3139_s2 + $0x8] sm:$0xff]  ;;  %s325_s21 = scalar_select %p324_p10, %s2106_s13, 2  ;;  %v2207_v26 = vshrl.u32 %v353_v25, 7 }
  0x16   : > { %v840_v6 = vld [vmem:[%s3141_s4 + $0x18] sm:$0xff]  ;;  %v839_v9 = vld [vmem:[%s3141_s4 + $0x10] sm:$0xff]  ;;  %v329_v12 = vld [vmem:[%s3138_s1] sm:$0xff]  ;;  %s1962_s26 = sshll.u32 %s2031_s24, 4  ;;  %s1963_s26 = int_to_ptr.vmem [resolvable:$false] %s1962_s26 }
  0x17   : > { %v838_v13 = vld [vmem:[%s3141_s4 + $0x8] sm:$0xff]  ;;  %v805_v14 = vld [vmem:[%s3140_s3] sm:$0xff]  ;;  %v1487_v19 = vld [vmem:[%s3145_s8 + $0x18] sm:$0xff]  ;;  %s1733_s22 = sshll.u32 %s325_s21, 2  ;;  %3181 = vst [vmem:[#allocation5_spill] sm:$0xff] %v2207_v26  ;;  %v355_v29 = vsub.s32 0, %v2207_v26 }
  0x18   : > { %v837_v15 = vld [vmem:[%s3141_s4] sm:$0xff]  ;;  %v1485_v17 = vld [vmem:[%s3145_s8 + $0x8] sm:$0xff]  ;;  %v1486_v20 = vld [vmem:[%s3145_s8 + $0x10] sm:$0xff]  ;;  %s2212_s25 = scalar_lea.vmem %s3137_s0, %s1733_s22  ;;  %v831_v36 = vsub.s32 1, %v2207_v26  ;;  %s3093_s22 = scalar_lea.hbm %s3146_s9, %s1779_s16 }
  0x19   : > { %826 = vperm.xlu0 %1913, %v808_v3   ;;  %382 = vperm.xlu1 %1914, %v364_v4   ;;  %v361_v16 = vld [vmem:[%s3139_s2] sm:$0xff]  ;;  %v1514_v21 = vld [vmem:[%s3142_s5 + $0x8] sm:$0xff]  ;;  %v1516_v23 = vld [vmem:[%s3142_s5 + $0x18] sm:$0xff]  ;;  %s1964_s27 = scalar_lea.vmem %s1963_s26, 1024 }
  0x1a   : > { %v1484_v18 = vld [vmem:[%s3145_s8] sm:$0xff]  ;;  %v1515_v24 = vld [vmem:[%s3142_s5 + $0x10] sm:$0xff] }
  0x1b   : > { %v1513_v22 = vld [vmem:[%s3142_s5] sm:$0xff] }
  0x1c   : > { %v328_v30 = vld [vmem:[%s2212_s25] sm:$0x7] }
  0x1d   : > { %821 = vperm.xlu0 %1913, %v807_v5   ;;  %858 = vperm.xlu1 %1914, %v840_v6   ;;  %v2216_v32 = vrot.slane %v328_v30, %v355_v29  ;;  %v2225_v42 = vrot.slane %v328_v30, %v831_v36 }
  0x21   : > { %377 = vperm.xlu1 %1914, %v363_v7   ;;  %340 = vperm.xlu0 %1913, %v330_v8  }
  0x25   : > { %853 = vperm.xlu1 %1914, %v839_v9   ;;  %816 = vperm.xlu0 %1913, %v806_v10  }
  0x29   : > { %372 = vperm.xlu1 %1914, %v362_v11   ;;  %335 = vperm.xlu0 %1913, %v329_v12   ;;  %v3159_v12 = vmov 683565275  }
  0x2d   : > { %848 = vperm.xlu1 %1914, %v838_v13   ;;  %811 = vperm.xlu0 %1913, %v805_v14   ;;  %v3155_v14 = vmov 2475754826  }
  0x31   : > { %843 = vperm.xlu1 %1914, %v837_v15   ;;  %367 = vperm.xlu0 %1913, %v361_v16   ;;  %v3153_v16 = vmov 2131351028  }
  0x35   : > { %1495 = vperm.xlu1 %1914, %v1485_v17   ;;  %1490 = vperm.xlu0 %1913, %v1484_v18   ;;  %v3157_v18 = vmov 2102212464  }
  0x39   : > { %1505 = vperm.xlu1 %1914, %v1487_v19   ;;  %1500 = vperm.xlu0 %1913, %v1486_v20  }
  0x3d   : > { %1527 = vperm.xlu1 %1914, %v1514_v21   ;;  %1522 = vperm.xlu0 %1913, %v1513_v22  }
  0x41   : > { %1537 = vperm.xlu1 %1914, %v1516_v23   ;;  %1532 = vperm.xlu0 %1913, %v1515_v24   ;;  %v2025_v23 = vmov 920167782  }
  0x90   : > { %v346_v27 = vpop.permute.xlu1 %345  ;;  %v351_v28 = vpop.permute.xlu0 %350 }
  0x91   : > { %v360_v35 = vmul.f32 %v2216_v32, %v351_v28  ;;  %v359_v37 = vmul.f32 %v2216_v32, %v346_v27  ;;  %v2026_v28 = vmov 1326507024  }
  0x94   : > { %v383_v31 = vpop.permute.xlu1 %382  ;;  %v827_v33 = vpop.permute.xlu0 %826 }
  0x95   : > { %v2221_v38 = vadd.f32 %v383_v31, %v360_v35  ;;  %v836_v48 = vmul.f32 %v2225_v42, %v827_v33 }
  0x97   : > { %v704_v43 = vand.u32 2139095040, %v2221_v38 }
  0x98   : > { %v859_v34 = vpop.permute.xlu1 %858  ;;  %v822_v40 = vpop.permute.xlu0 %821 }
  0x99   : > { %v835_v44 = vmul.f32 %v2225_v42, %v822_v40  ;;  %v705_v51 = vshrl.u32 %v704_v43, 23  ;;  %v2234_v52 = vadd.f32 %v859_v34, %v836_v48 }
  0x9b   : > { %3183 = vst [vmem:[#allocation7_spill] sm:$0xff] %v2234_v52  ;;  %v1746_v58 = vadd.s32 4294967169, %v705_v51  ;;  %v1180_v59 = vand.u32 2139095040, %v2234_v52 }
  0x9c   : > { %v378_v39 = vpop.permute.xlu1 %377  ;;  %v341_v61 = vpop.permute.xlu0 %340 }
  0x9d   : > { %v2223_v41 = vadd.f32 %v378_v39, %v359_v37  ;;  %v358_v3 = vmul.f32 %v2216_v32, %v341_v61  ;;  %v2244_v4 = vadd.s32 1, %v1746_v58  ;;  %v1181_v5 = vshrl.u32 %v1180_v59, 23 }
  0x9f   : > { %v3151_v45 = vand.u32 2147483647, %v2223_v41  ;;  %v600_v46 = vand.u32 2139095040, %v2223_v41  ;;  %vm712_vm7 = vcmp.gt.s32.totalorder %v2244_v4, 0 }
  0xa0   : > { %v854_v47 = vpop.permute.xlu1 %853 }
  0xa1   : > { %v601_v49 = vshrl.u32 %v600_v46, 23  ;;  %v2232_v50 = vadd.f32 %v854_v47, %v835_v44  ;;  %v604_v54 = vand.u32 8388607, %v3151_v45 }
  0xa3   : > { %3182 = vst [vmem:[#allocation6_spill] sm:$0xff] %v2232_v50  ;;  %v1742_v53 = vadd.s32 4294967169, %v601_v49  ;;  %v3148_v55 = vand.u32 2147483647, %v2232_v50  ;;  %v1076_v57 = vand.u32 2139095040, %v2232_v50  ;;  %v605_v60 = vor.u32 8388608, %v604_v54 }
  0xa4   : > { %v373_v1 = vpop.permute.xlu1 %372 }
  0xa5   : > { %v607_v56 = vadd.s32 1, %v1742_v53  ;;  %v1077_v62 = vshrl.u32 %v1076_v57, 23  ;;  %v1080_v63 = vand.u32 8388607, %v3148_v55  ;;  %v2246_v7 = vshll.u32 %v605_v60, 8 }
  0xa6   : > { %v2248_v11 = vadd.f32 %v373_v1, %v358_v3 }
  0xa7   : > { %vm608_vm0 = vcmp.gt.s32.totalorder %v607_v56, 0  ;;  %v1758_v9 = vadd.s32 4294967169, %v1077_v62  ;;  %v1081_v10 = vor.u32 8388608, %v1080_v63  ;;  %v1762_v63 = vadd.s32 4294967169, %v1181_v5 }
  0xa8   : > { %v609_v0 = vsel %vm608_vm0, %v607_v56, 0 }
  0xa9   : > { %v611_v2 = vand.u32 31, %v609_v0  ;;  %v610_v6 = vshrl.u32 %v609_v0, 5  ;;  %v1083_v36 = vadd.s32 1, %v1758_v9  ;;  %v2273_v1 = vshll.u32 %v1081_v10, 8 }
  0xab   : > { %v612_v8 = vsub.s32 32, %v611_v2  ;;  %v614_v13 = vshll.u32 %v3159_v12, %v611_v2  ;;  %v617_v15 = vshll.u32 %v3155_v14, %v611_v2  ;;  %v620_v17 = vshll.u32 %v3153_v16, %v611_v2 }
  0xac   : > { %v623_v19 = vshll.u32 %v3157_v18, %v611_v2  ;;  %v626_v24 = vshll.u32 %v2025_v23, %v611_v2  ;;  %vm629_vm1 = vcmp.lt.s32.totalorder %v610_v6, 1  ;;  %vm631_vm2 = vcmp.lt.s32.totalorder %v610_v6, 3 }
  0xad   : > { %v615_v20 = vshrl.u32 %v3155_v14, %v612_v8  ;;  %v618_v21 = vshrl.u32 %v3153_v16, %v612_v8  ;;  %v621_v22 = vshrl.u32 %v3157_v18, %v612_v8  ;;  %v613_v25 = vshrl.u32 %v3159_v12, %v612_v8 }
  0xae   : > { %v624_v27 = vshrl.u32 %v2025_v23, %v612_v8  ;;  %v627_v29 = vshrl.u32 %v2026_v28, %v612_v8  ;;  %vm632_vm3 = vcmp.lt.s32.totalorder %v610_v6, 4  ;;  %vm1084_vm4 = vcmp.gt.s32.totalorder %v1083_v36, 0 }
  0xaf   : > { %v616_v30 = vor.u32 %v615_v20, %v614_v13  ;;  %v619_v31 = vor.u32 %v618_v21, %v617_v15  ;;  %v622_v33 = vor.u32 %v621_v22, %v620_v17  ;;  %vm630_vm5 = vcmp.lt.s32.totalorder %v610_v6, 2 }
  0xb0   : > { %v625_v34 = vor.u32 %v624_v27, %v623_v19  ;;  %v628_v35 = vor.u32 %v627_v29, %v626_v24  ;;  %v1085_v51 = vsel %vm1084_vm4, %v1083_v36, 0  ;;  %v3152_v2 = vand.u32 2147483647, %v2221_v38 }
  0xb1   : > { %v633_v37 = vsel %vm629_vm1, %v613_v25, %v616_v30  ;;  %v634_v39 = vsel %vm632_vm3, %v622_v33, 2102212464  ;;  %v637_v40 = vsel %vm629_vm1, %v616_v30, %v619_v31  ;;  %v641_v43 = vsel %vm629_vm1, %v619_v31, %v622_v33 }
  0xb2   : > { %v635_v44 = vsel %vm631_vm2, %v619_v31, %v634_v39  ;;  %v638_v46 = vsel %vm632_vm3, %v625_v34, 920167782  ;;  %v642_v47 = vsel %vm632_vm3, %v628_v35, 1326507024  ;;  %v2261_v57 = vshrl.u32 %v1085_v51, 5 }
  0xb3   : > { %v639_v48 = vsel %vm631_vm2, %v622_v33, %v638_v46  ;;  %v643_v49 = vsel %vm631_vm2, %v625_v34, %v642_v47  ;;  %v636_v53 = vsel %vm630_vm5, %v633_v37, %v635_v44  ;;  %v1087_v62 = vand.u32 31, %v1085_v51 }
  0xb4   : > { %v640_v54 = vsel %vm630_vm5, %v637_v40, %v639_v48  ;;  %v644_v56 = vsel %vm630_vm5, %v641_v43, %v643_v49  ;;  %v652_v0 = vmul.u32 %v2246_v7, %v636_v53  ;;  %vm1105_vm6 = vcmp.lt.s32.totalorder %v2261_v57, 1  ;;  %v817_v53 = vpop.permute.xlu0 %816 }
  0xb5   : > { %v2264_v58 = vmul.u32.u64.low %v2246_v7, %v644_v56  ;;  %v2265_v59 = vmul.u32.u64.high %v2246_v7, %v644_v56, %v2264_v58  ;;  %v2268_v60 = vmul.u32.u64.low %v2246_v7, %v640_v54  ;;  %v2269_v61 = vmul.u32.u64.high %v2246_v7, %v640_v54, %v2268_v60 }
  0xb6   : > { %v1088_v3 = vsub.s32 32, %v1087_v62  ;;  %v1090_v6 = vshll.u32 %v3159_v12, %v1087_v62  ;;  %v496_v8 = vand.u32 2139095040, %v2248_v11  ;;  %v1093_v7 = vshll.u32 %v3155_v14, %v1087_v62 }
  0xb7   : > { %vm654_vm8 = vc.u32 %v2265_v59, %v2268_v60  ;;  %v655_v5 = vadd.s32 1, %v2269_v61  ;;  %v1096_v9 = vshll.u32 %v3153_v16, %v1087_v62  ;;  %v1099_v17 = vshll.u32 %v3157_v18, %v1087_v62 }
  0xb8   : > { %v1091_v10 = vshrl.u32 %v3155_v14, %v1088_v3  ;;  %v1094_v13 = vshrl.u32 %v3153_v16, %v1088_v3  ;;  %v1097_v15 = vshrl.u32 %v3157_v18, %v1088_v3  ;;  %v1100_v20 = vshrl.u32 %v2025_v23, %v1088_v3 }
  0xb9   : > { %v656_v19 = vsel %vm654_vm8, %v655_v5, %v2269_v61  ;;  %v1102_v21 = vshll.u32 %v2025_v23, %v1087_v62  ;;  %v1103_v22 = vshrl.u32 %v2026_v28, %v1088_v3  ;;  %vm1107_vm9 = vcmp.lt.s32.totalorder %v2261_v57, 3 }
  0xba   : > { %v657_v24 = vadd.s32 %v656_v19, %v652_v0  ;;  %v1092_v25 = vor.u32 %v1091_v10, %v1090_v6  ;;  %v1095_v27 = vor.u32 %v1094_v13, %v1093_v7  ;;  %v1098_v29 = vor.u32 %v1097_v15, %v1096_v9 }
  0xbb   : > { %v1101_v30 = vor.u32 %v1100_v20, %v1099_v17  ;;  %v1104_v31 = vor.u32 %v1103_v22, %v1102_v21  ;;  %v497_v33 = vshrl.u32 %v496_v8, 23  ;;  %v1089_v35 = vshrl.u32 %v3159_v12, %v1088_v3  ;;  %v849_v8 = vpop.permute.xlu1 %848 }
  0xbc   : > { %v658_v34 = vadd.s32 536870912, %v657_v24  ;;  %vm1108_vm10 = vcmp.lt.s32.totalorder %v2261_v57, 4  ;;  %v1113_v36 = vsel %vm1105_vm6, %v1092_v25, %v1095_v27  ;;  %v1117_v40 = vsel %vm1105_vm6, %v1095_v27, %v1098_v29 }
  0xbd   : > { %v1110_v37 = vsel %vm1108_vm10, %v1098_v29, 2102212464  ;;  %v1114_v39 = vsel %vm1108_vm10, %v1101_v30, 920167782  ;;  %v1118_v43 = vsel %vm1108_vm10, %v1104_v31, 1326507024  ;;  %v1109_v48 = vsel %vm1105_vm6, %v1089_v35, %v1092_v25 }
  0xbe   : > { %v2300_v44 = vshrl.u32 %v658_v34, 30  ;;  %vm1106_vm11 = vcmp.lt.s32.totalorder %v2261_v57, 2  ;;  %v1115_v46 = vsel %vm1107_vm9, %v1098_v29, %v1114_v39  ;;  %v1119_v47 = vsel %vm1107_vm9, %v1101_v30, %v1118_v43 }
  0xbf   : > { %v1116_v49 = vsel %vm1106_vm11, %v1113_v36, %v1115_v46  ;;  %v1120_v51 = vsel %vm1106_vm11, %v1117_v40, %v1119_v47  ;;  %v1738_v54 = vadd.s32 4294967169, %v497_v33  ;;  %v1111_v58 = vsel %vm1107_vm9, %v1095_v27, %v1110_v37 }
  0xc0   : > { %v660_v56 = vshll.u32 %v2300_v44, 30  ;;  %v2317_v61 = vmul.u32.u64.low %v2273_v1, %v1120_v51  ;;  %v2318_v62 = vmul.u32.u64.high %v2273_v1, %v1120_v51, %v2317_v61  ;;  %v708_v5 = vand.u32 8388607, %v3152_v2 }
  0xc1   : > { %v2321_v0 = vmul.u32.u64.low %v2273_v1, %v1116_v49  ;;  %v2322_v3 = vmul.u32.u64.high %v2273_v1, %v1116_v49, %v2321_v0  ;;  %v503_v6 = vadd.s32 1, %v1738_v54  ;;  %v713_v7 = vsel %vm712_vm7, %v2244_v4, 0 }
  0xc2   : > { %v2330_v9 = vsub.s32 %v657_v24, %v660_v56  ;;  %v834_v10 = vmul.f32 %v2225_v42, %v817_v53  ;;  %v3149_v13 = vand.u32 2147483647, %v2234_v52  ;;  %v1187_v15 = vadd.s32 1, %v1762_v63 }
  0xc3   : > { %v1112_v17 = vsel %vm1106_vm11, %v1109_v48, %v1111_v58  ;;  %v3150_v19 = vand.u32 2147483647, %v2248_v11  ;;  %vm504_vm12 = vcmp.gt.s32.totalorder %v503_v6, 0  ;;  %vm1130_vm13 = vc.u32 %v2318_v62, %v2321_v0 }
  0xc4   : > { %v663_v20 = vsub.s32 0, %v2330_v9  ;;  %v505_v21 = vsel %vm504_vm12, %v503_v6, 0  ;;  %v2340_v4 = vadd.f32 %v849_v8, %v834_v10  ;;  %v1131_v22 = vadd.s32 1, %v2322_v3 }
  0xc5   : > { %v507_v24 = vand.u32 31, %v505_v21  ;;  %v2343_v25 = vand.u32 31, %v713_v7  ;;  %v1128_v63 = vmul.u32 %v2273_v1, %v1112_v17  ;;  %v709_v57 = vor.u32 8388608, %v708_v5 }
  0xc6   : > { %3184 = vst [vmem:[#allocation8_spill] sm:$0xff] %v2340_v4  ;;  %v2348_v27 = vand.u32 8388607, %v3149_v13  ;;  %vm1188_vm14 = vcmp.gt.s32.totalorder %v1187_v15, 0  ;;  %v1743_v29 = vmin.u32 %v663_v20, %v2330_v9  ;;  %v1132_v30 = vsel %vm1130_vm13, %v1131_v22, %v2322_v3 }
  0xc7   : > { %v508_v31 = vsub.s32 32, %v507_v24  ;;  %v1133_v33 = vadd.s32 %v1132_v30, %v1128_v63  ;;  %v500_v34 = vand.u32 8388607, %v3150_v19  ;;  %v2354_v35 = vshrl.u32 %v505_v21, 5 }
  0xc8   : > { %v972_v36 = vand.u32 2139095040, %v2340_v4  ;;  %v510_v1 = vshll.u32 %v3159_v12, %v507_v24  ;;  %v513_v46 = vshll.u32 %v3155_v14, %v507_v24  ;;  %v516_v47 = vshll.u32 %v3153_v16, %v507_v24 }
  0xc9   : > { %v511_v37 = vshrl.u32 %v3155_v14, %v508_v31  ;;  %v514_v39 = vshrl.u32 %v3153_v16, %v508_v31  ;;  %v517_v40 = vshrl.u32 %v3157_v18, %v508_v31  ;;  %v1134_v43 = vadd.s32 536870912, %v1133_v33 }
  0xca   : > { %v520_v48 = vshrl.u32 %v2025_v23, %v508_v31  ;;  %v665_v49 = vclz %v1743_v29  ;;  %v519_v51 = vshll.u32 %v3157_v18, %v507_v24  ;;  %v522_v53 = vshll.u32 %v2025_v23, %v507_v24 }
  0xcb   : > { %v523_v54 = vshrl.u32 %v2026_v28, %v508_v31  ;;  %v2367_v56 = vshrl.u32 %v1134_v43, 30  ;;  %v501_v58 = vor.u32 8388608, %v500_v34  ;;  %v518_v61 = vor.u32 %v517_v40, %v516_v47 }
  0xcc   : > { %v973_v3 = vshrl.u32 %v972_v36, 23  ;;  %v512_v6 = vor.u32 %v511_v37, %v510_v1  ;;  %v515_v8 = vor.u32 %v514_v39, %v513_v46  ;;  %v521_v5 = vor.u32 %v520_v48, %v519_v51  ;;  %v2383_v37 = vpop.permute.xlu0 %335 }
  0xcd   : > { %3185 = vst [vmem:[#allocation9_spill] sm:$0xff] %v2367_v56  ;;  %v524_v10 = vor.u32 %v523_v54, %v522_v53  ;;  %v1136_v17 = vshll.u32 %v2367_v56, 30  ;;  %v2370_v20 = vshll.u32 %v709_v57, 8  ;;  %v2373_v22 = vshrl.u32 %v713_v7, 5 }
  0xce   : > { %v2376_v24 = vsub.s32 32, %v2343_v25  ;;  %v1744_v63 = vadd.s32 4294967294, %v665_v49  ;;  %vm528_vm15 = vcmp.lt.s32.totalorder %v2354_v35, 4  ;;  %v1189_v29 = vsel %vm1188_vm14, %v1187_v15, 0 }
  0xcf   : > { %vm525_vm0 = vcmp.lt.s32.totalorder %v2354_v35, 1  ;;  %v530_v30 = vsel %vm528_vm15, %v518_v61, 2102212464  ;;  %v541_v34 = vshll.u32 %v501_v58, 8  ;;  %v534_v36 = vsel %vm528_vm15, %v521_v5, 920167782 }
  0xd0   : > { %v533_v57 = vsel %vm525_vm0, %v512_v6, %v515_v8  ;;  %v538_v1 = vsel %vm528_vm15, %v524_v10, 1326507024  ;;  %v1754_v7 = vadd.s32 4294967169, %v973_v3  ;;  %v2385_v39 = vsub.s32 %v1133_v33, %v1136_v17  ;;  %v812_v17 = vpop.permute.xlu0 %811 }
  0xd1   : > { %v509_v40 = vshrl.u32 %v3159_v12, %v508_v31  ;;  %vm527_vm1 = vcmp.lt.s32.totalorder %v2354_v35, 3  ;;  %v537_v15 = vsel %vm525_vm0, %v515_v8, %v518_v61  ;;  %vm1745_vm2 = vcmp.lt.s32.totalorder %v1744_v63, 0 }
  0xd2   : > { %vm526_vm3 = vcmp.lt.s32.totalorder %v2354_v35, 2  ;;  %v535_v43 = vsel %vm527_vm1, %v518_v61, %v534_v36  ;;  %v539_v46 = vsel %vm527_vm1, %v521_v5, %v538_v1  ;;  %v531_v48 = vsel %vm527_vm1, %v515_v8, %v530_v30 }
  0xd3   : > { %v529_v47 = vsel %vm525_vm0, %v509_v40, %v512_v6  ;;  %v536_v33 = vsel %vm526_vm3, %v533_v57, %v535_v43  ;;  %v3147_v49 = vand.u32 2147483647, %v2340_v4  ;;  %v540_v31 = vsel %vm526_vm3, %v537_v15, %v539_v46  ;;  %v844_v43 = vpop.permute.xlu1 %843 }
  0xd4   : > { %v2399_v51 = vmul.u32.u64.low %v541_v34, %v536_v33  ;;  %v2400_v53 = vmul.u32.u64.high %v541_v34, %v536_v33, %v2399_v51  ;;  %v979_v54 = vadd.s32 1, %v1754_v7  ;;  %v2403_v58 = vsel %vm1745_vm2, 0, %v1744_v63 }
  0xd5   : > { %v1139_v61 = vsub.s32 0, %v2385_v39  ;;  %v2406_v3 = vmul.u32.u64.low %v541_v34, %v540_v31  ;;  %v2407_v6 = vmul.u32.u64.high %v541_v34, %v540_v31, %v2406_v3  ;;  %v727_v8 = vshll.u32 %v3157_v18, %v2343_v25 }
  0xd6   : > { %v728_v5 = vshrl.u32 %v2025_v23, %v2376_v24  ;;  %v2415_v10 = vshll.u32 %v2025_v23, %v2343_v25  ;;  %vm980_vm4 = vcmp.gt.s32.totalorder %v979_v54, 0  ;;  %v2419_v63 = vshrl.u32 %v2026_v28, %v2376_v24 }
  0xd7   : > { %v2421_v30 = vand.u32 31, %v1189_v29  ;;  %v532_v57 = vsel %vm526_vm3, %v529_v47, %v531_v48  ;;  %v981_v36 = vsel %vm980_vm4, %v979_v54, 0  ;;  %v673_v1 = vsub.s32 4294967266, %v2403_v58 }
  0xd8   : > { %v551_v7 = vadd.s32 1, %v2400_v53  ;;  %v976_v40 = vand.u32 8388607, %v3147_v49  ;;  %v983_v15 = vand.u32 31, %v981_v36  ;;  %v2429_v46 = vshrl.u32 %v1189_v29, 5 }
  0xd9   : > { %v1759_v33 = vmin.u32 %v1139_v61, %v2385_v39  ;;  %vm550_vm5 = vc.u32 %v2407_v6, %v2399_v51  ;;  %v833_v35 = vmul.f32 %v2225_v42, %v812_v17  ;;  %v2435_v47 = vor.u32 %v728_v5, %v727_v8 }
  0xda   : > { %v548_v48 = vmul.u32 %v541_v34, %v532_v57  ;;  %v552_v31 = vsel %vm550_vm5, %v551_v7, %v2400_v53  ;;  %v984_v54 = vsub.s32 32, %v983_v15  ;;  %v2441_v49 = vsub.s32 32, %v2421_v30 }
  0xdb   : > { %v2445_v29 = vshll.u32 %v3157_v18, %v2421_v30  ;;  %v2447_v61 = vadd.f32 %v844_v43, %v833_v35  ;;  %v2449_v55 = vadd.s32 127, %v673_v1  ;;  %v977_v8 = vor.u32 8388608, %v976_v40 }
  0xdc   : > { %v553_v42 = vadd.s32 %v552_v31, %v548_v48  ;;  %v987_v34 = vshrl.u32 %v3155_v14, %v984_v54  ;;  %v1141_v53 = vclz %v1759_v33  ;;  %v986_v5 = vshll.u32 %v3159_v12, %v983_v15 }
  0xdd   : > { %3186 = vst [vmem:[#allocation10_spill] sm:$0xff] %v2447_v61  ;;  %v989_v17 = vshll.u32 %v3155_v14, %v983_v15  ;;  %v990_v57 = vshrl.u32 %v3153_v16, %v984_v54  ;;  %v982_v13 = vshrl.u32 %v981_v36, 5  ;;  %v992_v19 = vshll.u32 %v3153_v16, %v983_v15 }
  0xde   : > { %v554_v7 = vadd.s32 536870912, %v553_v42  ;;  %v993_v43 = vshrl.u32 %v3157_v18, %v984_v54  ;;  %v988_v35 = vor.u32 %v987_v34, %v986_v5  ;;  %v995_v48 = vshll.u32 %v3157_v18, %v983_v15 }
  0xdf   : > { %v991_v1 = vor.u32 %v990_v57, %v989_v17  ;;  %v996_v40 = vshrl.u32 %v2025_v23, %v984_v54  ;;  %v357_v33 = vmul.f32 %v2216_v32, %v2383_v37  ;;  %v998_v45 = vshll.u32 %v2025_v23, %v983_v15 }
  0xe0   : > { %v994_v31 = vor.u32 %v993_v43, %v992_v19  ;;  %v999_v2 = vshrl.u32 %v2026_v28, %v984_v54  ;;  %v669_v36 = vsub.s32 32, %v2403_v58  ;;  %v675_v16 = vshll.u32 %v2449_v55, 23 }
  0xe1   : > { %v2465_v14 = vshrl.u32 %v554_v7, 30  ;;  %v997_v34 = vor.u32 %v996_v40, %v995_v48  ;;  %v1760_v5 = vadd.s32 4294967294, %v1141_v53  ;;  %vm1001_vm6 = vcmp.lt.s32.totalorder %v982_v13, 1 }
  0xe2   : > { %v1000_v17 = vor.u32 %v999_v2, %v998_v45  ;;  %v1017_v57 = vshll.u32 %v977_v8, 8  ;;  %v985_v18 = vshrl.u32 %v3159_v12, %v984_v54  ;;  %vm1004_vm7 = vcmp.lt.s32.totalorder %v982_v13, 4  ;;  %v368_v45 = vpop.permute.xlu0 %367 }
  0xe3   : > { %3187 = vst [vmem:[#allocation11_spill] sm:$0xff] %v2465_v14  ;;  %v1009_v32 = vsel %vm1001_vm6, %v988_v35, %v991_v1  ;;  %v868_v19 = vand.u32 2139095040, %v2447_v61  ;;  %vm1003_vm8 = vcmp.lt.s32.totalorder %v982_v13, 3  ;;  %v1006_v37 = vsel %vm1004_vm7, %v994_v31, 2102212464 }
  0xe4   : > { %v1010_v15 = vsel %vm1004_vm7, %v997_v34, 920167782  ;;  %v1013_v43 = vsel %vm1001_vm6, %v991_v1, %v994_v31  ;;  %v556_v55 = vshll.u32 %v2465_v14, 30  ;;  %vm1002_vm9 = vcmp.lt.s32.totalorder %v982_v13, 2 }
  0xe5   : > { %v1011_v7 = vsel %vm1003_vm8, %v994_v31, %v1010_v15  ;;  %v1014_v53 = vsel %vm1004_vm7, %v1000_v17, 1326507024  ;;  %vm736_vm10 = vcmp.lt.s32.totalorder %v2373_v22, 4  ;;  %v1005_v2 = vsel %vm1001_vm6, %v985_v18, %v988_v35 }
  0xe6   : > { %v1007_v54 = vsel %vm1003_vm8, %v991_v1, %v1006_v37  ;;  %v1012_v8 = vsel %vm1002_vm9, %v1009_v32, %v1011_v7  ;;  %v1015_v48 = vsel %vm1003_vm8, %v997_v34, %v1014_v53  ;;  %vm1761_vm11 = vcmp.lt.s32.totalorder %v1760_v5, 0 }
  0xe7   : > { %v1016_v40 = vsel %vm1002_vm9, %v1013_v43, %v1015_v48  ;;  %v2476_v12 = vmul.u32.u64.low %v1017_v57, %v1012_v8  ;;  %v2477_v21 = vmul.u32.u64.high %v1017_v57, %v1012_v8, %v2476_v12  ;;  %v653_v31 = vadd.s32 %v2268_v60, %v2265_v59 }
  0xe8   : > { %v2482_v17 = vmul.u32.u64.low %v1017_v57, %v1016_v40  ;;  %v2483_v15 = vmul.u32.u64.high %v1017_v57, %v1016_v40, %v2482_v17  ;;  %v2485_v3 = vadd.f32 %v368_v45, %v357_v33  ;;  %v1206_v18 = vshll.u32 %v2025_v23, %v2421_v30 }
  0xe9   : > { %v2489_v35 = vsub.s32 %v553_v42, %v556_v55  ;;  %v1008_v1 = vsel %vm1002_vm9, %v1005_v2, %v1007_v54  ;;  %v869_v34 = vshrl.u32 %v868_v19, 23  ;;  %v1204_v32 = vshrl.u32 %v2025_v23, %v2441_v49 }
  0xea   : > { %3188 = vst [vmem:[#allocation12_spill] sm:$0xff] %v2485_v3  ;;  %v1207_v37 = vshrl.u32 %v2026_v28, %v2441_v49  ;;  %v671_v59 = vshrl.u32 %v653_v31, %v669_v36  ;;  %v2496_v60 = vsel %vm1761_vm11, 0, %v1760_v5  ;;  %v670_v33 = vshll.u32 %v2330_v9, %v2403_v58 }
  0xeb   : > { %v676_v43 = vor.u32 4788187, %v675_v16  ;;  %v1027_v7 = vadd.s32 1, %v2477_v21  ;;  %v1750_v42 = vadd.s32 4294967169, %v869_v34  ;;  %v1024_v55 = vmul.u32 %v1017_v57, %v1008_v1 }
  0xec   : > { %vm1026_vm12 = vc.u32 %v2483_v15, %v2476_v12  ;;  %v3161_v13 = vand.u32 2147483647, %v2447_v61  ;;  %v392_v19 = vand.u32 2139095040, %v2485_v3  ;;  %v1149_v53 = vsub.s32 4294967266, %v2496_v60 }
  0xed   : > { %v559_v36 = vsub.s32 0, %v2489_v35  ;;  %v1028_v5 = vsel %vm1026_vm12, %v1027_v7, %v2477_v21  ;;  %v875_v45 = vadd.s32 1, %v1750_v42  ;;  %v2509_v16 = vor.u32 %v1204_v32, %v2445_v29 }
  0xee   : > { %vm1212_vm13 = vcmp.lt.s32.totalorder %v2429_v46, 4  ;;  %v672_v9 = vor.u32 %v671_v59, %v670_v33  ;;  %v1029_v58 = vadd.s32 %v1028_v5, %v1024_v55  ;;  %v2515_v57 = vsel %vm736_vm10, %v2435_v47, 920167782 }
  0xef   : > { %v3189_v2 = vor.u32 %v2419_v63, %v2415_v10  ;;  %v1208_v21 = vor.u32 %v1207_v37, %v1206_v18  ;;  %vm876_vm14 = vcmp.gt.s32.totalorder %v875_v45, 0  ;;  %v677_v29 = vand.u32 2147483647, %v676_v43 }
  0xf0   : > { %v1145_v8 = vsub.s32 32, %v2496_v60  ;;  %v1030_v48 = vadd.s32 536870912, %v1029_v58  ;;  %v393_v40 = vshrl.u32 %v392_v19, 23  ;;  %v2525_v31 = vadd.s32 127, %v1149_v53 }
  0xf1   : > { %v2522_v54 = vsel %vm736_vm10, %v3189_v2, 1326507024  ;;  %v1739_v17 = vmin.u32 %v559_v36, %v2489_v35  ;;  %v872_v1 = vand.u32 8388607, %v3161_v13  ;;  %v877_v34 = vsel %vm876_vm14, %v875_v45, 0 }
  0xf2   : > { %v2533_v10 = vsel %vm1212_vm13, %v2509_v16, 920167782  ;;  %v679_v63 = vcvt.s32.f32 %v672_v9  ;;  %v1129_v18 = vadd.s32 %v2321_v0, %v2318_v62  ;;  %v2537_v32 = vshrl.u32 %v1030_v48, 30 }
  0xf3   : > { %v2541_v37 = vsel %vm1212_vm13, %v1208_v21, 1326507024  ;;  %v879_v59 = vand.u32 31, %v877_v34  ;;  %v3191_v43 = vor.u32 8388608, %v2348_v27  ;;  %v1146_v55 = vshll.u32 %v2385_v39, %v2496_v60 }
  0xf4   : > { %3190 = vst [vmem:[#allocation13_spill] sm:$0xff] %v2537_v32  ;;  %v2548_v42 = vmul.f32 %v679_v63, %v677_v29  ;;  %v1147_v19 = vshrl.u32 %v1129_v18, %v1145_v8  ;;  %v1734_v62 = vadd.s32 4294967169, %v393_v40  ;;  %v1151_v0 = vshll.u32 %v2525_v31, 23 }
  0xf5   : > { %v2546_v7 = vshll.u32 %v3191_v43, 8  ;;  %v561_v53 = vclz %v1739_v17  ;;  %v873_v36 = vor.u32 8388608, %v872_v1  ;;  %v880_v5 = vsub.s32 32, %v879_v59 }
  0xf6   : > { %v1032_v45 = vshll.u32 %v2537_v32, 30  ;;  %v878_v9 = vshrl.u32 %v877_v34, 5  ;;  %v3192_v2 = vmov 683565275   ;;  %v3193_v27 = vmov 2475754826  }
  0xf7   : > { %v882_v21 = vshll.u32 %v3192_v2, %v879_v59  ;;  %v885_v48 = vshll.u32 %v3193_v27, %v879_v59  ;;  %v883_v29 = vshrl.u32 %v3193_v27, %v880_v5  ;;  %v3194_v63 = vmov 2131351028  }
  0xf8   : > { %v886_v43 = vshrl.u32 %v3194_v63, %v880_v5  ;;  %v888_v39 = vshll.u32 %v3194_v63, %v879_v59  ;;  %v3195_v60 = vmov 2102212464   ;;  %v892_v31 = vshrl.u32 %v2025_v23, %v880_v5 }
  0xf9   : > { %v889_v8 = vshrl.u32 %v3195_v60, %v880_v5  ;;  %v891_v40 = vshll.u32 %v3195_v60, %v879_v59  ;;  %v894_v17 = vshll.u32 %v2025_v23, %v879_v59  ;;  %v399_v1 = vadd.s32 1, %v1734_v62 }
  0xfa   : > { %v884_v34 = vor.u32 %v883_v29, %v882_v21  ;;  %v887_v18 = vor.u32 %v886_v43, %v885_v48  ;;  %v895_v33 = vshrl.u32 %v2026_v28, %v880_v5  ;;  %v2564_v26 = vsub.s32 %v1029_v58, %v1032_v45 }
  0xfb   : > { %v890_v13 = vor.u32 %v889_v8, %v888_v39  ;;  %v893_v32 = vor.u32 %v892_v31, %v891_v40  ;;  %v913_v56 = vshll.u32 %v873_v36, 8  ;;  %v3196_v14 = vand.u32 2147483647, %v2485_v3 }
  0xfc   : > { %v1740_v61 = vadd.s32 4294967294, %v561_v53  ;;  %v896_v4 = vor.u32 %v895_v33, %v894_v17  ;;  %vm897_vm15 = vcmp.lt.s32.totalorder %v878_v9, 1  ;;  %vm900_vm0 = vcmp.lt.s32.totalorder %v878_v9, 4 }
  0xfd   : > { %v396_v52 = vand.u32 8388607, %v3196_v14  ;;  %v881_v50 = vshrl.u32 %v3192_v2, %v880_v5  ;;  %v902_v59 = vsel %vm900_vm0, %v890_v13, 2102212464  ;;  %v905_v62 = vsel %vm897_vm15, %v884_v34, %v887_v18 }
  0xfe   : > { %vm400_vm1 = vcmp.gt.s32.totalorder %v399_v1, 0  ;;  %vm899_vm2 = vcmp.lt.s32.totalorder %v878_v9, 3  ;;  %v906_v21 = vsel %vm900_vm0, %v893_v32, 920167782  ;;  %v909_v48 = vsel %vm897_vm15, %v887_v18, %v890_v13 }
  0xff   : > { %v910_v29 = vsel %vm900_vm0, %v896_v4, 1326507024  ;;  %v1035_v58 = vsub.s32 0, %v2564_v26  ;;  %vm898_vm3 = vcmp.lt.s32.totalorder %v878_v9, 2  ;;  %v901_v36 = vsel %vm897_vm15, %v881_v50, %v884_v34 }
 0x100   : > { %v907_v45 = vsel %vm899_vm2, %v890_v13, %v906_v21  ;;  %v903_v43 = vsel %vm899_vm2, %v887_v18, %v902_v59  ;;  %v911_v53 = vsel %vm899_vm2, %v893_v32, %v910_v29  ;;  %v401_v33 = vsel %vm400_vm1, %v399_v1, 0 }
 0x101   : > { %v908_v14 = vsel %vm898_vm3, %v905_v62, %v907_v45  ;;  %v912_v39 = vsel %vm898_vm3, %v909_v48, %v911_v53  ;;  %v397_v5 = vor.u32 8388608, %v396_v52  ;;  %vm1741_vm4 = vcmp.lt.s32.totalorder %v1740_v61, 0 }
 0x102   : > { %v2570_v8 = vmul.u32.u64.low %v913_v56, %v908_v14  ;;  %v2571_v40 = vmul.u32.u64.high %v913_v56, %v908_v14, %v2570_v8  ;;  %v2574_v31 = vmul.u32.u64.low %v913_v56, %v912_v39  ;;  %v2575_v17 = vmul.u32.u64.high %v913_v56, %v912_v39, %v2574_v31 }
 0x103   : > { %v719_v4 = vshrl.u32 %v3193_v27, %v2376_v24  ;;  %v1755_v50 = vmin.u32 %v1035_v58, %v2564_v26  ;;  %v904_v13 = vsel %vm898_vm3, %v901_v36, %v903_v43  ;;  %v402_v9 = vshrl.u32 %v401_v33, 5 }
 0x104   : > { %v403_v34 = vand.u32 31, %v401_v33  ;;  %v2580_v32 = vor.u32 %v1147_v19, %v1146_v55  ;;  %v2582_v1 = vor.u32 4788187, %v1151_v0  ;;  %v2586_v18 = vadd.s32 %v2399_v51, %v2407_v6 }
 0x105   : > { %v718_v52 = vshll.u32 %v3192_v2, %v2343_v25  ;;  %v2590_v59 = vsel %vm1741_vm4, 0, %v1740_v61  ;;  %v923_v62 = vadd.s32 1, %v2571_v40  ;;  %v2593_v48 = vshll.u32 %v397_v5, 8 }
 0x106   : > { %v404_v21 = vsub.s32 32, %v403_v34  ;;  %v920_v29 = vmul.u32 %v913_v56, %v904_v13  ;;  %vm922_vm5 = vc.u32 %v2575_v17, %v2570_v8  ;;  %v2599_v55 = vshrl.u32 %v3192_v2, %v2376_v24 }
 0x107   : > { %v2601_v51 = vor.u32 %v719_v4, %v718_v52  ;;  %v1037_v6 = vclz %v1755_v50  ;;  %v924_v19 = vsel %vm922_vm5, %v923_v62, %v2571_v40  ;;  %v406_v61 = vshll.u32 %v3192_v2, %v403_v34 }
 0x108   : > { %vm421_vm6 = vcmp.lt.s32.totalorder %v402_v9, 1  ;;  %v925_v0 = vadd.s32 %v924_v19, %v920_v29  ;;  %v407_v58 = vshrl.u32 %v3193_v27, %v404_v21  ;;  %v409_v56 = vshll.u32 %v3193_v27, %v403_v34 }
 0x109   : > { %v410_v36 = vshrl.u32 %v3194_v63, %v404_v21  ;;  %v405_v45 = vshrl.u32 %v3192_v2, %v404_v21  ;;  %v412_v43 = vshll.u32 %v3194_v63, %v403_v34  ;;  %v413_v14 = vshrl.u32 %v3195_v60, %v404_v21 }
 0x10a   : > { %v415_v53 = vshll.u32 %v3195_v60, %v403_v34  ;;  %v926_v33 = vadd.s32 536870912, %v925_v0  ;;  %v408_v39 = vor.u32 %v407_v58, %v406_v61  ;;  %v416_v5 = vshrl.u32 %v2025_v23, %v404_v21 }
 0x10b   : > { %v411_v40 = vor.u32 %v410_v36, %v409_v56  ;;  %v414_v31 = vor.u32 %v413_v14, %v412_v43  ;;  %v418_v4 = vshll.u32 %v2025_v23, %v403_v34  ;;  %v419_v50 = vshrl.u32 %v2026_v28, %v404_v21 }
 0x10c   : > { %vm423_vm7 = vcmp.lt.s32.totalorder %v402_v9, 3  ;;  %v2615_v13 = vshrl.u32 %v926_v33, 30  ;;  %v417_v52 = vor.u32 %v416_v5, %v415_v53  ;;  %vm424_vm8 = vcmp.lt.s32.totalorder %v402_v9, 4 }
 0x10d   : > { %v425_v62 = vsel %vm421_vm6, %v405_v45, %v408_v39  ;;  %v420_v29 = vor.u32 %v419_v50, %v418_v4  ;;  %v426_v19 = vsel %vm424_vm8, %v414_v31, 2102212464  ;;  %v429_v3 = vsel %vm421_vm6, %v408_v39, %v411_v40 }
 0x10e   : > { %v433_v61 = vsel %vm421_vm6, %v411_v40, %v414_v31  ;;  %v928_v58 = vshll.u32 %v2615_v13, 30  ;;  %v427_v56 = vsel %vm423_vm7, %v411_v40, %v426_v19  ;;  %v430_v23 = vsel %vm424_vm8, %v417_v52, 920167782 }
 0x10f   : > { %v722_v28 = vshrl.u32 %v3194_v63, %v2376_v24  ;;  %vm422_vm9 = vcmp.lt.s32.totalorder %v402_v9, 2  ;;  %v431_v34 = vsel %vm423_vm7, %v414_v31, %v430_v23  ;;  %v434_v21 = vsel %vm424_vm8, %v420_v29, 1326507024 }
 0x110   : > { %v721_v36 = vshll.u32 %v3193_v27, %v2343_v25  ;;  %v1756_v45 = vadd.s32 4294967294, %v1037_v6  ;;  %v2627_v43 = vsub.s32 %v925_v0, %v928_v58  ;;  %v432_v14 = vsel %vm422_vm9, %v429_v3, %v431_v34 }
 0x111   : > { %v435_v53 = vsel %vm423_vm7, %v417_v52, %v434_v21  ;;  %v428_v33 = vsel %vm422_vm9, %v425_v62, %v427_v56  ;;  %v2631_v40 = vmul.u32.u64.low %v2593_v48, %v432_v14  ;;  %v2632_v5 = vmul.u32.u64.high %v2593_v48, %v432_v14, %v2631_v40 }
 0x112   : > { %v436_v39 = vsel %vm422_vm9, %v433_v61, %v435_v53  ;;  %v931_v4 = vsub.s32 0, %v2627_v43  ;;  %v723_v29 = vor.u32 %v722_v28, %v721_v36  ;;  %v565_v6 = vsub.s32 32, %v2590_v59 }
 0x113   : > { %v2637_v31 = vmul.u32.u64.low %v2593_v48, %v436_v39  ;;  %v2638_v50 = vmul.u32.u64.high %v2593_v48, %v436_v39, %v2637_v31  ;;  %v569_v3 = vsub.s32 4294967266, %v2590_v59  ;;  %v724_v9 = vshll.u32 %v3194_v63, %v2343_v25 }
 0x114   : > { %v725_v0 = vshrl.u32 %v3195_v60, %v2376_v24  ;;  %vm1757_vm11 = vcmp.lt.s32.totalorder %v1756_v45, 0  ;;  %v1751_v52 = vmin.u32 %v931_v4, %v2627_v43  ;;  %v444_v62 = vmul.u32 %v2593_v48, %v428_v33 }
 0x115   : > { %vm733_vm12 = vcmp.lt.s32.totalorder %v2373_v22, 1  ;;  %v447_v19 = vadd.s32 1, %v2632_v5  ;;  %vm735_vm14 = vcmp.lt.s32.totalorder %v2373_v22, 3  ;;  %vm446_vm15 = vc.u32 %v2638_v50, %v2631_v40 }
 0x116   : > { %v726_v61 = vor.u32 %v725_v0, %v724_v9  ;;  %v741_v58 = vsel %vm733_vm12, %v2601_v51, %v723_v29  ;;  %vm734_vm0 = vcmp.lt.s32.totalorder %v2373_v22, 2  ;;  %v737_v25 = vsel %vm733_vm12, %v2599_v55, %v2601_v51 }
 0x117   : > { %v747_v24 = vsel %vm735_vm14, %v2435_v47, %v2522_v54  ;;  %v448_v48 = vsel %vm446_vm15, %v447_v19, %v2632_v5  ;;  %v933_v34 = vclz %v1751_v52  ;;  %v2666_v53 = vsel %vm1757_vm11, 0, %v1756_v45 }
 0x118   : > { %v738_v56 = vsel %vm736_vm10, %v726_v61, 2102212464  ;;  %v743_v23 = vsel %vm735_vm14, %v726_v61, %v2515_v57  ;;  %v745_v28 = vsel %vm733_vm12, %v723_v29, %v726_v61  ;;  %v449_v21 = vadd.s32 %v448_v48, %v444_v62 }
 0x119   : > { %v739_v36 = vsel %vm735_vm14, %v723_v29, %v738_v56  ;;  %v744_v14 = vsel %vm734_vm0, %v741_v58, %v743_v23  ;;  %v748_v47 = vsel %vm734_vm0, %v745_v28, %v747_v24  ;;  %v570_v51 = vadd.s32 127, %v569_v3 }
 0x11a   : > { %v2671_v54 = vmul.u32.u64.low %v2370_v20, %v744_v14  ;;  %v2672_v55 = vmul.u32.u64.high %v2370_v20, %v744_v14, %v2671_v54  ;;  %v450_v57 = vadd.s32 536870912, %v449_v21  ;;  %v1153_v5 = vand.u32 2147483647, %v2582_v1 }
 0x11b   : > { %v2676_v33 = vmul.u32.u64.low %v2370_v20, %v748_v47  ;;  %v2677_v39 = vmul.u32.u64.high %v2370_v20, %v748_v47, %v2676_v33  ;;  %v566_v45 = vshll.u32 %v2489_v35, %v2590_v59  ;;  %v740_v4 = vsel %vm734_vm0, %v737_v25, %v739_v36 }
 0x11c   : > { %v1195_v31 = vshrl.u32 %v3193_v27, %v2441_v49  ;;  %v1045_v29 = vsub.s32 4294967266, %v2666_v53  ;;  %v1752_v9 = vadd.s32 4294967294, %v933_v34  ;;  %v2687_v3 = vshrl.u32 %v450_v57, 30 }
 0x11d   : > { %v1194_v0 = vshll.u32 %v3192_v2, %v2421_v30  ;;  %v567_v52 = vshrl.u32 %v2586_v18, %v565_v6  ;;  %v759_v62 = vadd.s32 1, %v2672_v55  ;;  %v1197_v35 = vshll.u32 %v3193_v27, %v2421_v30 }
 0x11e   : > { %v1198_v22 = vshrl.u32 %v3194_v63, %v2441_v49  ;;  %v571_v59 = vshll.u32 %v570_v51, 23  ;;  %v452_v19 = vshll.u32 %v2687_v3, 30  ;;  %v756_v61 = vmul.u32 %v2370_v20, %v740_v4 }
 0x11f   : > { %v1196_v58 = vor.u32 %v1195_v31, %v1194_v0  ;;  %vm758_vm10 = vc.u32 %v2677_v39, %v2671_v54  ;;  %v1200_v18 = vshll.u32 %v3194_v63, %v2421_v30  ;;  %v1201_v6 = vshrl.u32 %v3195_v60, %v2441_v49 }
 0x120   : > { %v1199_v25 = vor.u32 %v1198_v22, %v1197_v35  ;;  %v1046_v27 = vadd.s32 127, %v1045_v29  ;;  %vm1753_vm1 = vcmp.lt.s32.totalorder %v1752_v9, 0  ;;  %v2705_v24 = vsub.s32 %v449_v21, %v452_v19 }
 0x121   : > { %v760_v48 = vsel %vm758_vm10, %v759_v62, %v2672_v55  ;;  %v568_v56 = vor.u32 %v567_v52, %v566_v45  ;;  %v1025_v20 = vadd.s32 %v2476_v12, %v2483_v15  ;;  %v1202_v28 = vor.u32 %v1201_v6, %v1200_v18 }
 0x122   : > { %v761_v23 = vadd.s32 %v760_v48, %v756_v61  ;;  %v572_v34 = vor.u32 4788187, %v571_v59  ;;  %v455_v36 = vsub.s32 0, %v2705_v24  ;;  %vm1209_vm2 = vcmp.lt.s32.totalorder %v2429_v46, 1 }
 0x123   : > { %vm1211_vm3 = vcmp.lt.s32.totalorder %v2429_v46, 3  ;;  %v2713_v30 = vsel %vm1753_vm1, 0, %v1752_v9  ;;  %v1217_v60 = vsel %vm1209_vm2, %v1196_v58, %v1199_v25  ;;  %v1041_v12 = vsub.s32 32, %v2666_v53 }
 0x124   : > { %v762_v63 = vadd.s32 536870912, %v761_v23  ;;  %v1219_v21 = vsel %vm1211_vm3, %v1202_v28, %v2533_v10  ;;  %v1047_v15 = vshll.u32 %v1046_v27, 23  ;;  %v1735_v14 = vmin.u32 %v455_v36, %v2705_v24 }
 0x125   : > { %vm1210_vm4 = vcmp.lt.s32.totalorder %v2429_v46, 2  ;;  %v1221_v51 = vsel %vm1209_vm2, %v1199_v25, %v1202_v28  ;;  %v1223_v10 = vsel %vm1211_vm3, %v2509_v16, %v2541_v37  ;;  %v941_v57 = vsub.s32 4294967266, %v2713_v30 }
 0x126   : > { %v2723_v47 = vshrl.u32 %v762_v63, 30  ;;  %v1220_v55 = vsel %vm1210_vm4, %v1217_v60, %v1219_v21  ;;  %v457_v33 = vclz %v1735_v14  ;;  %v1214_v45 = vsel %vm1212_vm13, %v1202_v28, 2102212464 }
 0x127   : > { %v1224_v4 = vsel %vm1210_vm4, %v1221_v51, %v1223_v10  ;;  %v1193_v29 = vshrl.u32 %v3192_v2, %v2441_v49  ;;  %v1043_v52 = vshrl.u32 %v1025_v20, %v1041_v12  ;;  %v573_v35 = vand.u32 2147483647, %v572_v34 }
 0x128   : > { %v764_v31 = vshll.u32 %v2723_v47, 30  ;;  %v2742_v9 = vmul.u32.u64.low %v2546_v7, %v1224_v4  ;;  %v2743_v0 = vmul.u32.u64.high %v2546_v7, %v1224_v4, %v2742_v9  ;;  %v1736_v16 = vadd.s32 4294967294, %v457_v33 }
 0x129   : > { %v2746_v37 = vmul.u32.u64.low %v2546_v7, %v1220_v55  ;;  %v2747_v62 = vmul.u32.u64.high %v2546_v7, %v1220_v55, %v2746_v37  ;;  %v1213_v59 = vsel %vm1209_vm2, %v1193_v29, %v1196_v58  ;;  %v1215_v49 = vsel %vm1211_vm3, %v1199_v25, %v1214_v45  ;;  %v3200_v29 = vld [vmem:[#allocation6_spill] sm:$0xff] }
 0x12a   : > { %v2750_v22 = vsub.s32 %v761_v23, %v764_v31  ;;  %v1042_v2 = vshll.u32 %v2564_v26, %v2666_v53  ;;  %v1048_v19 = vor.u32 4788187, %v1047_v15  ;;  %v942_v61 = vadd.s32 127, %v941_v57 }
 0x12b   : > { %vm1737_vm13 = vcmp.lt.s32.totalorder %v1736_v16, 0  ;;  %v681_v18 = vxor.u32 2147483648, %v2548_v42  ;;  %v1155_v6 = vcvt.s32.f32 %v2580_v32  ;;  %v937_v27 = vsub.s32 32, %v2713_v30 }
 0x12c   : > { %v767_v48 = vsub.s32 0, %v2750_v22  ;;  %v575_v20 = vcvt.s32.f32 %v568_v56  ;;  %v1044_v23 = vor.u32 %v1043_v52, %v1042_v2  ;;  %v921_v58 = vadd.s32 %v2570_v8, %v2575_v17 }
 0x12d   : > { %v1216_v25 = vsel %vm1210_vm4, %v1213_v59, %v1215_v49  ;;  %v2766_v26 = vsel %vm1737_vm13, 0, %v1736_v16  ;;  %vm1234_vm5 = vc.u32 %v2743_v0, %v2746_v37  ;;  %v1235_v32 = vadd.s32 1, %v2747_v62 }
 0x12e   : > { %v1747_v53 = vmin.u32 %v767_v48, %v2750_v22  ;;  %v2774_v28 = vmul.f32 %v1155_v6, %v1153_v5  ;;  %v576_v56 = vmul.f32 %v575_v20, %v573_v35  ;;  %v1049_v34 = vand.u32 2147483647, %v1048_v19 }
 0x12f   : > { %v943_v36 = vshll.u32 %v942_v61, 23  ;;  %vm599_vm6 = vcmp.lt.s32.totalorder %v2223_v41, 0  ;;  %v939_v46 = vshrl.u32 %v921_v58, %v937_v27  ;;  %vm703_vm7 = vcmp.lt.s32.totalorder %v2221_v38, 0 }
 0x130   : > { %v769_v8 = vclz %v1747_v53  ;;  %v1232_v17 = vmul.u32 %v2546_v7, %v1216_v25  ;;  %vm495_vm8 = vcmp.lt.s32.totalorder %v2248_v11, 0  ;;  %v1051_v63 = vcvt.s32.f32 %v1044_v23 }
 0x131   : > { %v465_v60 = vsub.s32 4294967266, %v2766_v26  ;;  %v1236_v1 = vsel %vm1234_vm5, %v1235_v32, %v2747_v62  ;;  %v682_v5 = vsel %vm599_vm6, %v681_v18, %v2548_v42  ;;  %v938_v21 = vshll.u32 %v2627_v43, %v2713_v30 }
 0x132   : > { %v1748_v12 = vadd.s32 4294967294, %v769_v8  ;;  %v1237_v15 = vadd.s32 %v1236_v1, %v1232_v17  ;;  %v1157_v14 = vxor.u32 2147483648, %v2774_v28  ;;  %v577_v55 = vxor.u32 2147483648, %v576_v56 }
 0x133   : > { %v1052_v7 = vmul.f32 %v1051_v63, %v1049_v34  ;;  %v944_v51 = vor.u32 4788187, %v943_v36  ;;  %v3197_v10 = vand.u32 2147483647, %v2221_v38  ;;  %v940_v33 = vor.u32 %v939_v46, %v938_v21 }
 0x134   : > { %v757_v42 = vadd.s32 %v2671_v54, %v2677_v39  ;;  %vm1749_vm11 = vcmp.lt.s32.totalorder %v1748_v12, 0  ;;  %v1238_v45 = vadd.s32 536870912, %v1237_v15  ;;  %v466_v43 = vadd.s32 127, %v465_v60  ;;  %v3204_v54 = vld [vmem:[#allocation8_spill] sm:$0xff] }
 0x135   : > { %vm2790_vm9 = vcmp.le.f32.partialorder %v3197_v10, 0.7853982  ;;  %v772_v30 = vsel %vm1749_vm11, 0, %v1748_v12  ;;  %v787_v4 = vsub.s32 4, %v2723_v47  ;;  %v683_v31 = vsub.s32 4, %v2300_v44 }
 0x136   : > { %vm1075_vm12 = vcmp.lt.s32.totalorder %v3200_v29, 0  ;;  %v773_v9 = vsub.s32 32, %v772_v30  ;;  %v777_v52 = vsub.s32 4294967266, %v772_v30  ;;  %v2799_v16 = vshrl.u32 %v1238_v45, 30 }
 0x137   : > { %v3201_v62 = vand.u32 2147483647, %v2223_v41  ;;  %vm971_vm15 = vcmp.lt.s32.totalorder %v3204_v54, 0  ;;  %v945_v39 = vand.u32 2147483647, %v944_v51  ;;  %v445_v59 = vadd.s32 %v2631_v40, %v2638_v50  ;;  %v3209_v51 = vld [vmem:[#allocation7_spill] sm:$0xff] }
 0x138   : > { %v461_v49 = vsub.s32 32, %v2766_v26  ;;  %v774_v19 = vshll.u32 %v2750_v22, %v772_v30  ;;  %v775_v61 = vshrl.u32 %v757_v42, %v773_v9  ;;  %v778_v18 = vadd.s32 127, %v777_v52 }
 0x139   : > { %vm2803_vm14 = vcmp.le.f32.partialorder %v3201_v62, 0.7853982  ;;  %v1240_v6 = vshll.u32 %v2799_v16, 30  ;;  %v947_v27 = vcvt.s32.f32 %v940_v33  ;;  %v467_v48 = vshll.u32 %v466_v43, 23  ;;  %v3210_v33 = vld [vmem:[#allocation11_spill] sm:$0xff] }
 0x13a   : > { %v685_v2 = vsel %vm2803_vm14, %v2223_v41, %v682_v5  ;;  %v788_v20 = vsel %vm703_vm7, %v787_v4, %v2723_v47  ;;  %v684_v40 = vsel %vm599_vm6, %v683_v31, %v2300_v44  ;;  %v578_v50 = vsel %vm495_vm8, %v577_v55, %v576_v56  ;;  %v3211_v31 = vld [vmem:[#allocation9_spill] sm:$0xff] }
 0x13b   : > { %v776_v23 = vor.u32 %v775_v61, %v774_v19  ;;  %v779_v58 = vshll.u32 %v778_v18, 23  ;;  %v2824_v22 = vsub.s32 %v1237_v15, %v1240_v6  ;;  %v1053_v25 = vxor.u32 2147483648, %v1052_v7 }
 0x13c   : > { %v948_v53 = vmul.f32 %v947_v27, %v945_v39  ;;  %v463_v32 = vshrl.u32 %v445_v59, %v461_v49  ;;  %1921 = vcosq.f32 %v685_v2  ;;  %v790_v36 = vsel %vm2790_vm9, 0, %v788_v20 }
 0x13d   : > { %v780_v34 = vor.u32 4788187, %v779_v58  ;;  %v1243_v47 = vsub.s32 0, %v2824_v22  ;;  %v686_v44 = vsel %vm2803_vm14, 0, %v684_v40  ;;  %v462_v56 = vshll.u32 %v2705_v24, %v2766_v26  ;;  %v3208_v26 = vld [vmem:[#allocation10_spill] sm:$0xff] }
 0x13e   : > { %v468_v46 = vor.u32 4788187, %v467_v48  ;;  %1923 = vsinq.f32 %v685_v2  ;;  %v3205_v8 = vand.u32 2147483647, %v2248_v11  ;;  %v783_v60 = vcvt.s32.f32 %v776_v23 }
 0x13f   : > { %v781_v63 = vand.u32 2147483647, %v780_v34  ;;  %v1763_v1 = vmin.u32 %v1243_v47, %v2824_v22  ;;  %v1158_v24 = vsel %vm1075_vm12, %v1157_v14, %v2774_v28  ;;  %vm867_vm10 = vcmp.lt.s32.totalorder %v3208_v26, 0 }
 0x140   : > { %vm2835_vm0 = vcmp.le.f32.partialorder %v3205_v8, 0.7853982  ;;  %v464_v21 = vor.u32 %v463_v32, %v462_v56  ;;  %v690_v12 = vadd.s32 3, %v686_v44  ;;  %v1054_v15 = vsel %vm971_vm15, %v1053_v25, %v1052_v7 }
 0x141   : > { %v581_v5 = vsel %vm2835_vm0, %v2248_v11, %v578_v50  ;;  %v784_v55 = vmul.f32 %v783_v60, %v781_v63  ;;  %vm1179_vm1 = vcmp.lt.s32.totalorder %v3209_v51, 0  ;;  %v1245_v10 = vclz %v1763_v1  ;;  %v3222_v1 = vld [vmem:[#allocation13_spill] sm:$0xff] }
 0x142   : > { %v579_v42 = vsub.s32 4, %v3210_v33  ;;  %v949_v45 = vxor.u32 2147483648, %v948_v53  ;;  %v469_v43 = vand.u32 2147483647, %v468_v46  ;;  %v794_v30 = vadd.s32 3, %v790_v36 }
 0x143   : > { %1925 = vcosq.f32 %v581_v5  ;;  %v785_v4 = vxor.u32 2147483648, %v784_v55  ;;  %v1233_v28 = vadd.s32 %v2746_v37, %v2743_v0  ;;  %v1764_v14 = vadd.s32 4294967294, %v1245_v10  ;;  %v3218_v0 = vld [vmem:[#allocation12_spill] sm:$0xff] }
 0x144   : > { %v1159_v9 = vsub.s32 4, %v3211_v31  ;;  %v471_v52 = vcvt.s32.f32 %v464_v21  ;;  %v3212_v7 = vand.u32 2147483647, %v3209_v51  ;;  %v2860_v35 = vand.u32 3, %v690_v12 }
 0x145   : > { %v3215_v39 = vand.u32 2147483647, %v3200_v29  ;;  %1927 = vsinq.f32 %v581_v5  ;;  %vm391_vm4 = vcmp.lt.s32.totalorder %v3218_v0, 0  ;;  %v786_v37 = vsel %vm703_vm7, %v785_v4, %v784_v55 }
 0x146   : > { %vm2856_vm2 = vcmp.le.f32.partialorder %v3212_v7, 0.7853982  ;;  %vm1765_vm13 = vcmp.lt.s32.totalorder %v1764_v14, 0  ;;  %v580_v2 = vsel %vm495_vm8, %v579_v42, %v3210_v33  ;;  %v472_v19 = vmul.f32 %v471_v52, %v469_v43 }
 0x147   : > { %vm2864_vm3 = vcmp.le.f32.partialorder %v3215_v39, 0.7853982  ;;  %v789_v61 = vsel %vm2790_vm9, %v2221_v38, %v786_v37  ;;  %v1248_v18 = vsel %vm1765_vm13, 0, %v1764_v14  ;;  %v1263_v6 = vsub.s32 4, %v2799_v16 }
 0x148   : > { %v1161_v49 = vsel %vm2864_vm3, %v3200_v29, %v1158_v24  ;;  %1929 = vcosq.f32 %v789_v61  ;;  %v1249_v27 = vsub.s32 32, %v1248_v18  ;;  %v1253_v48 = vsub.s32 4294967266, %v1248_v18 }
 0x149   : > { %v1160_v20 = vsel %vm1075_vm12, %v1159_v9, %v3211_v31  ;;  %v950_v40 = vsel %vm867_vm10, %v949_v45, %v948_v53  ;;  %1931 = vsinq.f32 %v789_v61  ;;  %v2886_v50 = vand.u32 3, %v794_v30  ;;  %v1922_v23 = vpop.eup %1921  ;;  %v1281_v61 = vld [vmem:[%s3143_s6] sm:$0xff] }
 0x14a   : > { %v582_v57 = vsel %vm2835_vm0, 0, %v580_v2  ;;  %v1250_v58 = vshll.u32 %v2824_v22, %v1248_v18  ;;  %v1251_v25 = vshrl.u32 %v1233_v28, %v1249_v27  ;;  %v1254_v32 = vadd.s32 127, %v1253_v48 }
 0x14b   : > { %1933 = vcosq.f32 %v1161_v49  ;;  %v473_v34 = vxor.u32 2147483648, %v472_v19  ;;  %v1264_v36 = vsel %vm1179_vm1, %v1263_v6, %v2799_v16  ;;  %vm693_vm5 = vcmp.eq.s32.totalorder %v2860_v35, 0  ;;  %v1924_v47 = vpop.eup %1923 }
 0x14c   : > { %v1162_v53 = vsel %vm2864_vm3, 0, %v1160_v20  ;;  %v1252_v44 = vor.u32 %v1251_v25, %v1250_v58  ;;  %v1255_v56 = vshll.u32 %v1254_v32, 23  ;;  %v586_v46 = vadd.s32 3, %v582_v57 }
 0x14d   : > { %v3219_v8 = vand.u32 2147483647, %v3204_v54  ;;  %vm696_vm7 = vcmp.eq.s32.totalorder %v2860_v35, 2  ;;  %v697_v17 = vxor.u32 2147483648, %v1922_v23  ;;  %1935 = vsinq.f32 %v1161_v49 }
 0x14e   : > { %v1256_v63 = vor.u32 4788187, %v1255_v56  ;;  %v1266_v60 = vsel %vm2856_vm2, 0, %v1264_v36  ;;  %v1055_v5 = vsub.s32 4, %v3222_v1  ;;  %v3223_v24 = vand.u32 2147483647, %v3208_v26 }
 0x14f   : > { %vm2899_vm6 = vcmp.le.f32.partialorder %v3219_v8, 0.7853982  ;;  %v474_v12 = vsel %vm391_vm4, %v473_v34, %v472_v19  ;;  %vm800_vm9 = vcmp.eq.s32.totalorder %v2886_v50, 2  ;;  %vm692_vm11 = vcmp.lt.s32.totalorder %v2860_v35, 2  ;;  %v1285_v19 = vld [vmem:[%s3144_s7] sm:$0xff] }
 0x150   : > { %v1057_v16 = vsel %vm2899_vm6, %v3204_v54, %v1054_v15  ;;  %vm2912_vm8 = vcmp.le.f32.partialorder %v3223_v24, 0.7853982  ;;  %v694_v15 = vxor.u32 2147483648, %v1924_v47  ;;  %v2920_v55 = vadd.s32 3, %v1162_v53  ;;  %v1926_v33 = vpop.eup %1925 }
 0x151   : > { %v953_v10 = vsel %vm2912_vm8, %v3208_v26, %v950_v40  ;;  %vm797_vm12 = vcmp.eq.s32.totalorder %v2886_v50, 0  ;;  %v1257_v42 = vand.u32 2147483647, %v1256_v63  ;;  %v1259_v45 = vcvt.s32.f32 %v1252_v44 }
 0x152   : > { %v587_v43 = vand.u32 3, %v586_v46  ;;  %1937 = vcosq.f32 %v1057_v16  ;;  %vm796_vm14 = vcmp.lt.s32.totalorder %v2886_v50, 2  ;;  %v1270_v30 = vadd.s32 3, %v1266_v60  ;;  %v1928_v14 = vpop.eup %1927 }
 0x153   : > { %v698_v4 = vsel %vm696_vm7, %v697_v17, %v1924_v47  ;;  %1939 = vsinq.f32 %v1057_v16  ;;  %v475_v28 = vsub.s32 4, %v2687_v3  ;;  %vm793_vm0 = vweird.f32 %v2221_v38 }
 0x154   : > { %v1260_v31 = vmul.f32 %v1259_v45, %v1257_v42  ;;  %vm689_vm3 = vweird.f32 %v2223_v41  ;;  %v1056_v9 = vsel %vm971_vm15, %v1055_v5, %v3222_v1  ;;  %1941 = vcosq.f32 %v953_v10  ;;  %v3002_v1 = vld [vmem:[%s3142_s5] sm:$0xff]  ;;  %v3023_v45 = vld [vmem:[%s3142_s5 + $0x18] sm:$0xff] }
 0x155   : > { %v3226_v52 = vand.u32 2147483647, %v3218_v0  ;;  %v590_v39 = vxor.u32 2147483648, %v1928_v14  ;;  %v593_v59 = vxor.u32 2147483648, %v1926_v33  ;;  %1943 = vsinq.f32 %v953_v10  ;;  %v1930_v18 = vpop.eup %1929 }
 0x156   : > { %v1261_v49 = vxor.u32 2147483648, %v1260_v31  ;;  %v695_v2 = vsel %vm693_vm5, %v1922_v23, %v694_v15  ;;  %vm589_vm7 = vcmp.eq.s32.totalorder %v587_v43, 0  ;;  %vm592_vm15 = vcmp.eq.s32.totalorder %v587_v43, 2  ;;  %v1932_v48 = vpop.eup %1931 }
 0x157   : > { %vm2937_vm13 = vcmp.le.f32.partialorder %v3226_v52, 0.7853982  ;;  %v1058_v6 = vsel %vm2899_vm6, 0, %v1056_v9  ;;  %v476_v27 = vsel %vm391_vm4, %v475_v28, %v2687_v3  ;;  %v801_v20 = vxor.u32 2147483648, %v1930_v18 }
 0x158   : > { %v477_v37 = vsel %vm2937_vm13, %v3218_v0, %v474_v12  ;;  %v1262_v40 = vsel %vm1179_vm1, %v1261_v49, %v1260_v31  ;;  %v951_v57 = vsub.s32 4, %v2615_v13  ;;  %vm1289_vm5 = vcmask 261120   ;;  %v2960_v23 = vpop.eup %1933 }
 0x159   : > { %1945 = vcosq.f32 %v477_v37  ;;  %v798_v58 = vxor.u32 2147483648, %v1932_v48  ;;  %v1265_v25 = vsel %vm2856_vm2, %v3209_v51, %v1262_v40  ;;  %v591_v32 = vsel %vm589_vm7, %v1926_v33, %v590_v39  ;;  %1806 = vmatprep.mubr.msk.f32.mxu0 %vm1289_vm5, %v1285_v19  ;;  %1820 = vmatprep.mubr.msk.f32.mxu1 %vm1289_vm5, %v1281_v61  ;;  %v3013_v33 = vld [vmem:[%s3142_s5 + $0x10] sm:$0xff]  ;;  %v1282_v40 = vld [vmem:[%s3143_s6 + $0x8] sm:$0xff] }
 0x15a   : > { %1947 = vsinq.f32 %v477_v37  ;;  %v594_v34 = vsel %vm592_vm15, %v593_v59, %v1928_v14  ;;  %v802_v3 = vsel %vm800_vm9, %v801_v20, %v1932_v48  ;;  %v699_v36 = vsel %vm692_vm11, %v695_v2, %v698_v4  ;;  %v1936_v44 = vpop.eup %1935 }
 0x15b   : > { %1949 = vcosq.f32 %v1265_v25  ;;  %v478_v53 = vsel %vm2937_vm13, 0, %v476_v27  ;;  %v799_v62 = vsel %vm797_vm12, %v1930_v18, %v798_v58  ;;  %vm588_vm1 = vcmp.lt.s32.totalorder %v587_v43, 2 }
 0x15c   : > { %1951 = vsinq.f32 %v1265_v25  ;;  %v1062_v47 = vadd.s32 3, %v1058_v6  ;;  %v803_v56 = vsel %vm796_vm14, %v799_v62, %v802_v3  ;;  %v595_v46 = vsel %vm588_vm1, %v591_v32, %v594_v34 }
 0x15d   : > { %v952_v8 = vsel %vm867_vm10, %v951_v57, %v2615_v13  ;;  %v804_v35 = vsel %vm793_vm0, nan, %v803_v56  ;;  %v700_v22 = vsel %vm689_vm3, nan, %v699_v36  ;;  %v482_v17 = vadd.s32 3, %v478_v53  ;;  %v2992_v13 = vld [vmem:[%s3142_s5 + $0x8] sm:$0xff]  ;;  %v1287_v56 = vld [vmem:[%s3144_s7 + $0x10] sm:$0xff] }
 0x15e   : > { %v2027_v16 = vmov 1   ;;  %1812 = vmatprep.subr.mxu1 %v804_v35  ;;  %v2986_v63 = vand.u32 3, %v2920_v55  ;;  %vm585_vm2 = vweird.f32 %v2248_v11  ;;  %v2995_v41 = vand.u32 3, %v1270_v30 }
 0x15f   : > { %1916 = vset.pattern.permute.xlu1 %v2027_v16  ;;  %1915 = vset.pattern.permute.xlu0 %v2027_v16  ;;  %v1938_v38 = vpop.eup %1937  ;;  %v596_v50 = vsel %vm585_vm2, nan, %v595_v46  ;;  %v954_v60 = vsel %vm2912_vm8, 0, %v952_v8  ;;  %v1170_v5 = vxor.u32 2147483648, %v1936_v44  ;;  %v1173_v24 = vxor.u32 2147483648, %v2960_v23  ;;  %v1496_v46 = vpop.permute.xlu1 %1495 }
 0x160   : > { %1560 = vperm.xlu1 %1916, %v2992_v13   ;;  %1813 = vmatpush3.msra.mxu1 %v804_v35  ;;  %v1940_v11 = vpop.eup %1939  ;;  %v3006_v12 = vand.u32 3, %v1062_v47  ;;  %v483_v55 = vand.u32 3, %v482_v17  ;;  %vm1168_vm10 = vcmp.lt.s32.totalorder %v2986_v63, 2  ;;  %vm1169_vm4 = vcmp.eq.s32.totalorder %v2986_v63, 0  ;;  %v1284_v47 = vld [vmem:[%s3143_s6 + $0x18] sm:$0xff]  ;;  %v1491_v35 = vpop.permute.xlu0 %1490 }
 0x161   : > { %1556 = vperm.xlu0 %1915, %v3002_v1   ;;  %1814 = vmatprep.subr.mxu1 %v700_v22  ;;  %v1942_v15 = vpop.eup %1941  ;;  %v958_v21 = vadd.s32 3, %v954_v60  ;;  %vm1272_vm6 = vcmp.lt.s32.totalorder %v2995_v41, 2  ;;  %vm1273_vm8 = vcmp.eq.s32.totalorder %v2995_v41, 0  ;;  %vm1276_vm9 = vcmp.eq.s32.totalorder %v2995_v41, 2 }
 0x162   : > { %1815 = vmatpush3.msra.mxu1 %v700_v22  ;;  %v1944_v10 = vpop.eup %1943  ;;  %vm1172_vm11 = vcmp.eq.s32.totalorder %v2986_v63, 2  ;;  %v1171_v30 = vsel %vm1169_vm4, %v2960_v23, %v1170_v5  ;;  %vm1065_vm12 = vcmp.eq.s32.totalorder %v3006_v12, 0  ;;  %v1066_v14 = vxor.u32 2147483648, %v1940_v11  ;;  %v1283_v23 = vld [vmem:[%s3143_s6 + $0x10] sm:$0xff] }
 0x163   : > { %1816 = vmatprep.subr.mxu1 %v596_v50  ;;  %v1174_v4 = vsel %vm1172_vm11, %v1173_v24, %v1936_v44  ;;  %v1069_v31 = vxor.u32 2147483648, %v1938_v38  ;;  %vm488_vm14 = vcmp.eq.s32.totalorder %v483_v55, 2  ;;  %vm1068_vm0 = vcmp.eq.s32.totalorder %v3006_v12, 2  ;;  %v1506_v8 = vpop.permute.xlu1 %1505 }
 0x164   : > { %1564 = vperm.xlu1 %1916, %v3013_v33   ;;  %1817 = vmatpush3.msra.mxu1 %v596_v50  ;;  %v959_v52 = vand.u32 3, %v958_v21  ;;  %vm485_vm3 = vcmp.eq.s32.totalorder %v483_v55, 0  ;;  %v2028_v39 = vmov 2   ;;  %v962_v37 = vxor.u32 2147483648, %v1944_v10  ;;  %v3079_v17 = vpop.permute.xlu0 %1500  ;;  %v1957_v50 = vld [vmem:[%s2212_s25] sm:$0x7] }
 0x165   : > { %1568 = vperm.xlu0 %1915, %v3023_v45   ;;  %v965_v49 = vxor.u32 2147483648, %v1942_v15  ;;  %vm484_vm13 = vcmp.lt.s32.totalorder %v483_v55, 2  ;;  %vm481_vm7 = vweird.f32 %v3218_v0  ;;  %v1067_v27 = vsel %vm1065_vm12, %v1938_v38, %v1066_v14  ;;  %s321_s25 = sand.u32 1, %s2010_s10  }
 0x166   : > { %v1946_v42 = vpop.eup %1945  ;;  %v1070_v48 = vsel %vm1068_vm0, %v1069_v31, %v1940_v11  ;;  %v1175_v0 = vsel %vm1168_vm10, %v1171_v30, %v1174_v4  ;;  %vm961_vm15 = vcmp.eq.s32.totalorder %v959_v52, 0  ;;  %vm964_vm1 = vcmp.eq.s32.totalorder %v959_v52, 2  ;;  %s1732_s28 = sshll.u32 %s321_s25, 5  ;;  %s3097_s23 = scalar_lea.sflag [#allocation3], %s321_s25 }
 0x167   : > { %v1948_v43 = vpop.eup %1947  ;;  %v489_v28 = vxor.u32 2147483648, %v1946_v42  ;;  %vm1064_vm2 = vcmp.lt.s32.totalorder %v3006_v12, 2  ;;  %v963_v25 = vsel %vm961_vm15, %v1942_v15, %v962_v37  ;;  %v966_v32 = vsel %vm964_vm1, %v965_v49, %v1944_v10  ;;  %v1528_v22 = vpop.permute.xlu1 %1527  ;;  %v3229_v15 = vld [vmem:[#allocation5_spill] sm:$0xff]  ;;  %s323_s29 = scalar_lea.vmem [#allocation2], %s1732_s28 }
 0x168   : > { %v486_v9 = vxor.u32 2147483648, %v1948_v43  ;;  %1917 = vset.pattern.permute.xlu1 %v2028_v39  ;;  %v1950_v59 = vpop.eup %1949  ;;  %vm1269_vm4 = vweird.f32 %v3209_v51  ;;  %vm1165_vm10 = vweird.f32 %v3200_v29  ;;  %v1071_v3 = vsel %vm1064_vm2, %v1067_v27, %v1070_v48  ;;  %v1523_v63 = vpop.permute.xlu0 %1522  ;;  %s1666_s14 = sshll.u32 %s323_s29, 4  ;;  %s3088_s14 = int_to_ptr.vmem [resolvable:$true] %s1666_s14 }
 0x169   : > { %v490_v7 = vsel %vm488_vm14, %v489_v28, %v1948_v43  ;;  %1587 = vperm.xlu1 %1917, %v3002_v1   ;;  %1918 = vset.pattern.permute.xlu0 %v2028_v39  ;;  %v1952_v19 = vpop.eup %1951  ;;  %v1277_v61 = vxor.u32 2147483648, %v1950_v59  ;;  %v2029_v36 = vmov 3   ;;  %v1176_v62 = vsel %vm1165_vm10, nan, %v1175_v0  ;;  %s1958_s13 = scalar_lea.vmem %s3088_s14, 512  ;;  %p1965_p0 = scmp.lt.s32.totalorder %s3088_s14, %s1963_s26 }
 0x16a   : > { %v487_v2 = vsel %vm485_vm3, %v1946_v42, %v486_v9  ;;  %1591 = vperm.xlu0 %1918, %v2992_v13   ;;  %v1274_v6 = vxor.u32 2147483648, %v1952_v19  ;;  %v1858_v60 = vtrunc.f32 %v1957_v50  ;;  %v1542_v55 = vsub.s32 2, %v3229_v15  ;;  %p1959_p11 = scmp.ne.s32.totalorder %s3088_s14, %s1958_s13  ;;  %p1966_p1 = scmp.lt.s32.totalorder %s1964_s27, %s1958_s13 }
 0x16b   : > { %v491_v18 = vsel %vm484_vm13, %v487_v2, %v490_v7  ;;  %v1278_v57 = vsel %vm1276_vm9, %v1277_v61, %v1952_v19  ;;  %vm957_vm9 = vweird.f32 %v3208_v26  ;;  %v1288_v26 = vld [vmem:[%s3144_s7 + $0x18] sm:$0xff]  ;;  %v1538_v16 = vpop.permute.xlu1 %1537  ;;  %v2030_v21 = vmov 0.0  }
 0x16c   : > { %v492_v20 = vsel %vm481_vm7, nan, %v491_v18  ;;  %v1275_v58 = vsel %vm1273_vm8, %v1950_v59, %v1274_v6  ;;  %vm960_vm8 = vcmp.lt.s32.totalorder %v959_v52, 2  ;;  %v1533_v38 = vpop.permute.xlu0 %1532  ;;  %v1859_v11 = vcvt.f32.s32 %v1858_v60  ;;  %p1960_p12 = pnand %p1959_p11, %p2123_p5  ;;  %p1967_p2 = por %p1966_p1, %p1965_p0 }
 0x16d   : > { %1818 = vmatprep.subr.mxu1 %v492_v20  ;;  %1595 = vperm.xlu1 %1917, %v3013_v33   ;;  %v1279_v34 = vsel %vm1272_vm6, %v1275_v58, %v1278_v57  ;;  %vm1061_vm6 = vweird.f32 %v3204_v54  ;;  %v967_v29 = vsel %vm960_vm8, %v963_v25, %v966_v32  ;;  %v1286_v54 = vld [vmem:[%s3144_s7 + $0x8] sm:$0xff] }
 0x16e   : > { %1819 = vmatpush3.msra.mxu1 %v492_v20  ;;  %1919 = vset.pattern.permute.xlu0 %v2029_v36  ;;  %v1280_v53 = vsel %vm1269_vm4, nan, %v1279_v34  ;;  %v1072_v51 = vsel %vm1061_vm6, nan, %v1071_v3  ;;  %v968_v44 = vsel %vm957_vm9, nan, %v967_v29  ;;  %vm1517_vm11 = vcmp.eq.s32.totalorder %v1859_v11, 0  ;;  %p1961_p13 = pneg %p1960_p12 }
 0x16f   : > { %1821 = vmatmul.mubr.msk.f32.vlgmr.msra.gmra.mxu1 %vm1289_vm5, %v1282_v40  ;;  %1618 = vperm.xlu0 %1919, %v3002_v1   ;;  %vm1614_vm12 = vcmp.eq.s32.totalorder %v1859_v11, 3  ;;  %vm1583_vm14 = vcmp.eq.s32.totalorder %v1859_v11, 2 }
 0x170   : > { %1823 = vmatprep.mubr.msk.f32.mxu1 %vm1289_vm5, %v1283_v23  ;;  %1798 = vmatprep.subr.mxu0 %v1280_v53  ;;  %v1777_v4 = vsel %vm1614_vm12, 1.0, %v2030_v21  ;;  %v1776_v14 = vsel %vm1583_vm14, 1.0, %v2030_v21  ;;  %p1968_p3 = pnand %p1967_p2, %p1961_p13 }
 0x171   : > { %1799 = vmatpush3.msra.mxu0 %v1280_v53  ;;  %1599 = vperm.xlu1 %1917, %v3023_v45   ;;  %v1636_v59 = vrot.slane %v1777_v4, %v1542_v55  ;;  %v1605_v49 = vrot.slane %v1776_v14, %v1542_v55 }
 0x172   : > { %1800 = vmatprep.subr.mxu0 %v1176_v62 }
 0x173   : > { %1824 = vmatmul.mubr.msk.f32.gmra.mxu1 %vm1289_vm5, %v1284_v47  ;;  %1801 = vmatpush3.msra.mxu0 %v1176_v62 }
 0x174   : > { %1630 = vperm.xlu0 %1919, %v3023_v45   ;;  %1802 = vmatprep.subr.mxu0 %v1072_v51 }
 0x175   : > { %1803 = vmatpush3.msra.mxu0 %v1072_v51  ;;  %1920 = vset.pattern.permute.xlu1 %v2029_v36 }
 0x176   : > { %1804 = vmatprep.subr.mxu0 %v968_v44  ;;  %1622 = vperm.xlu1 %1920, %v2992_v13  }
 0x177   : > { %1805 = vmatpush3.msra.mxu0 %v968_v44 }
 0x178   : > { %1807 = vmatmul.mubr.msk.f32.vlgmr.msra.gmra.mxu0 %vm1289_vm5, %v1286_v54 }
 0x179   : > { %1809 = vmatprep.mubr.msk.f32.mxu0 %vm1289_vm5, %v1287_v56 }
 0x17a   : > { %1626 = vperm.xlu1 %1920, %v3013_v33   ;;  %v1774_v33 = vsel %vm1517_vm11, 1.0, %v2030_v21 }
 0x17b   : > { %v1543_v30 = vrot.slane %v1774_v33, %v1542_v55 }
 0x17c   : > { %1810 = vmatmul.mubr.msk.f32.gmra.mxu0 %vm1289_vm5, %v1288_v26  ;;  %vm1552_vm5 = vcmp.eq.s32.totalorder %v1859_v11, 1 }
 0x17d   : > { %v1775_v45 = vsel %vm1552_vm5, 1.0, %v2030_v21  ;;  %v1545_v37 = vmul.f32 %v1543_v30, %v1528_v22  ;;  %v1544_v18 = vmul.f32 %v1543_v30, %v1523_v63  ;;  %v1547_v58 = vmul.f32 %v1543_v30, %v1538_v16 }
 0x17e   : > { %v1574_v28 = vrot.slane %v1775_v45, %v1542_v55  ;;  %v1546_v47 = vmul.f32 %v1543_v30, %v1533_v38 }
 0x1db   : > { %v1561_v13 = vpop.permute.xlu1 %1560 }
 0x1dc   : > { %v1557_v1 = vpop.permute.xlu0 %1556  ;;  %v1576_v6 = vmul.f32 %v1574_v28, %v1561_v13 }
 0x1dd   : > { %v1575_v25 = vmul.f32 %v1574_v28, %v1557_v1 }
 0x1df   : > { %v1565_v41 = vpop.permute.xlu1 %1564 }
 0x1e0   : > { %v1569_v12 = vpop.permute.xlu0 %1568  ;;  %v1577_v22 = vmul.f32 %v1574_v28, %v1565_v41 }
 0x1e1   : > { %v1578_v51 = vmul.f32 %v1574_v28, %v1569_v12 }
 0x1e4   : > { %v1588_v5 = vpop.permute.xlu1 %1587 }
 0x1e5   : > { %v1592_v43 = vpop.permute.xlu0 %1591  ;;  %v1606_v29 = vmul.f32 %v1605_v49, %v1588_v5 }
 0x1e6   : > { %v1607_v40 = vmul.f32 %v1605_v49, %v1592_v43 }
 0x1e8   : > { %v1596_v10 = vpop.permute.xlu1 %1595 }
 0x1e9   : > { %v1608_v60 = vmul.f32 %v1605_v49, %v1596_v10 }
 0x1ea   : > { %v1619_v61 = vpop.permute.xlu0 %1618 }
 0x1eb   : > { %v1637_v44 = vmul.f32 %v1636_v59, %v1619_v61 }
 0x1ec   : > { %v1600_v52 = vpop.permute.xlu1 %1599 }
 0x1ed   : > { %v1609_v16 = vmul.f32 %v1605_v49, %v1600_v52 }
 0x1f1   : > { %v1623_v23 = vpop.permute.xlu1 %1622 }
 0x1f2   : > { %v1638_v32 = vmul.f32 %v1636_v59, %v1623_v23 }
 0x1f5   : > { %v1627_v38 = vpop.permute.xlu1 %1626 }
 0x1f6   : > { %v1639_v15 = vmul.f32 %v1636_v59, %v1627_v38 }
 0x22f   : > { %v1822_v24 = vpop.f32.mrf.mxu1 }
 0x231   : > { %v1465_v42 = vpop.f32.mrf.mxu1 }
 0x233   : > { %v1825_v9 = vpop.f32.mrf.mxu1 }
 0x235   : > { %v1475_v48 = vpop.f32.mrf.mxu1 }
 0x238   : > { %v1808_v31 = vpop.f32.mrf.mxu0 }
 0x239   : > { %v1471_v7 = vadd.f32 %v1822_v24, %v1808_v31 }
 0x23a   : > { %v1368_v39 = vpop.f32.mrf.mxu0 }
 0x23b   : > { %v1509_v2 = vadd.f32 %v1496_v46, %v1471_v7  ;;  %v1466_v19 = vadd.f32 %v1465_v42, %v1368_v39 }
 0x23c   : > { %v1811_v27 = vpop.f32.mrf.mxu0 }
 0x23d   : > { %v1549_v20 = vadd.f32 %v1545_v37, %v1509_v2  ;;  %v1508_v57 = vadd.f32 %v1491_v35, %v1466_v19  ;;  %v1481_v0 = vadd.f32 %v1825_v9, %v1811_v27  ;;  %v1631_v35 = vpop.permute.xlu0 %1630 }
 0x23e   : > { %v1378_v34 = vpop.f32.mrf.mxu0  ;;  %v1640_v1 = vmul.f32 %v1636_v59, %v1631_v35 }
 0x23f   : > { %v1580_v3 = vadd.f32 %v1576_v6, %v1549_v20  ;;  %v1548_v36 = vadd.f32 %v1544_v18, %v1508_v57  ;;  %v1511_v53 = vadd.f32 %v1506_v8, %v1481_v0  ;;  %v1476_v62 = vadd.f32 %v1475_v48, %v1378_v34 }
 0x241   : > { %v1611_v54 = vadd.f32 %v1607_v40, %v1580_v3  ;;  %v1551_v56 = vadd.f32 %v1547_v58, %v1511_v53  ;;  %v1579_v26 = vadd.f32 %v1575_v25, %v1548_v36  ;;  %v1510_v46 = vadd.f32 %v3079_v17, %v1476_v62 }
 0x243   : > { %v1642_v63 = vadd.f32 %v1638_v32, %v1611_v54  ;;  %v1610_v13 = vadd.f32 %v1606_v29, %v1579_v26  ;;  %v1550_v50 = vadd.f32 %v1546_v47, %v1510_v46  ;;  %v1582_v8 = vadd.f32 %v1578_v51, %v1551_v56 }
 0x245   : > { %v1646_v11 = vmax.f32 %v1642_v63, 0.0  ;;  %v1641_v5 = vadd.f32 %v1637_v44, %v1610_v13  ;;  %v1581_v24 = vadd.f32 %v1577_v22, %v1550_v50  ;;  %v1613_v12 = vadd.f32 %v1609_v16, %v1582_v8 }
 0x247   : > { %1650 = vst [vmem:[%s323_s29 + $0x8] sm:$0xff] %v1646_v11  ;;  %v1645_v17 = vmax.f32 %v1641_v5, 0.0  ;;  %v1612_v41 = vadd.f32 %v1608_v60, %v1581_v24  ;;  %v1644_v55 = vadd.f32 %v1640_v1, %v1613_v12 }
 0x249   : > { %1649 = vst [vmem:[%s323_s29] sm:$0xff] %v1645_v17  ;;  %v1643_v10 = vadd.f32 %v1639_v15, %v1612_v41  ;;  %v1648_v21 = vmax.f32 %v1644_v55, 0.0 }
 0x24b   : > { %v1647_v33 = vmax.f32 %v1643_v10, 0.0  ;;  %1652 = vst [vmem:[%s323_s29 + $0x18] sm:$0xff] %v1648_v21 }
 0x24d   : > { %1651 = vst [vmem:[%s323_s29 + $0x10] sm:$0xff] %v1647_v33 }
 0x24e   : > { %1971 = shalt.err (!%p1968_p3)
}
 0x24f   : > { %s1972_s25 = scalar_lea.hbm %s3093_s22, 512  ;;  %s1976_s16 = scalar_lea.hbm %s3146_s9, 1536 }
 0x250   : > { %p1973_p4 = scmp.ne.s32.totalorder %s3093_s22, %s1972_s25  ;;  %p1977_p9 = scmp.lt.s32.totalorder %s3093_s22, %s3146_s9 }
 0x251   : > { %p1978_p10 = scmp.lt.s32.totalorder %s1976_s16, %s1972_s25 }
 0x252   : > { %p1974_p7 = pnand %p1973_p4, %p2123_p5 }
 0x253   : > { %p1979_p11 = por %p1978_p10, %p1977_p9 }
 0x254   : > { %p1975_p8 = pneg %p1974_p7 }
 0x256   : > { %p1980_p12 = pnand %p1979_p11, %p1975_p8 }
 0x258   : > { %1983 = shalt.err (!%p1980_p12)
}
 0x259   : > { %s2032_s13 = smov 128   ;;  %s2033_s24 = smov 384  }
 0x25a   : > { %s2034_s26 = smov 8  }
 0x25b   : > { %1860 = dma.vmem_to_hbm [thread:$0]  (%p2123_p5), %s3088_s14, 512, %s3093_s22, %s3097_s23, %s2032_s13, %s2033_s24, %s2034_s26  }
 0x25c PF: > { %p1866_p13 = scmp.ge.s32.totalorder %s2018_s12, 2  ;;  %s1681_s27 = sand.u32 1, %s2006_s30  }
 0x25d   : > { %s1682_s25 = scalar_lea.sflag [#allocation3], %s1681_s27 }
 0x25e   : > { %p1863_p0 = pnand %p1866_p13, %p2127_p6 }
 0x260   : > { %p1864_p1 = pneg %p1863_p0 }
 0x262   : > { %2001 = dma.done.wait (%p1864_p1), %s1682_s25, 512  }
 0x263   : > { %2003 = vsyncadd (%p1864_p1), %s1682_s25, 4294966784  ;;  %p19_p2 = scmp.ge.s32.totalorder %s2110_s15, 5   ;;  %s3230_s30 = smov %s2010_s10 }
 0x264   : > { %s3231_s10 = smov %s2014_s11  ;;  %s3232_s11 = smov %s2121_s18 }
 0x265   : > { %s3233_s12 = smov %s2110_s15  ;;  %21 = sbr.rel (!%p19_p2) target bundleno = 3 (0x3), region = 91 }
 0x26a   :  { %1687 = vsyncpa [#allocation3], 1 }
 0x26b   :  { %1689 = vsyncpa [#allocation3 + $0x1], 1 }

// kernel: _lambda_.3
= control target key start
LH: loop header
LB: loop body
LE: loop exit
PB: predicated region body
PF: predicated region fallthrough
CT: control target
= control target key end

     0   :  { %s4536_s0 = inlined_call_operand.vmem [shape: f32[6,512], index: 0, kind: input, shape index: {}]   ;;  %s4537_s1 = inlined_call_operand.vmem [shape: f32[32,1], index: 1, kind: input, shape index: {}]   ;;  %s4538_s2 = inlined_call_operand.vmem [shape: f32[32,1], index: 2, kind: input, shape index: {}]   ;;  %s4539_s3 = inlined_call_operand.vmem [shape: f32[32,1], index: 3, kind: input, shape index: {}]   ;;  %s4540_s4 = inlined_call_operand.vmem [shape: f32[32,1], index: 4, kind: input, shape index: {}]   ;;  %s4541_s5 = inlined_call_operand.vmem [shape: f32[32,3], index: 5, kind: input, shape index: {}]   ;;  %s4542_s6 = inlined_call_operand.vmem [shape: f32[32,1], index: 6, kind: input, shape index: {}]   ;;  %s4543_s7 = inlined_call_operand.vmem [shape: f32[32,3], index: 7, kind: input, shape index: {}]   ;;  %s4544_s8 = inlined_call_operand.vmem [shape: f32[32,32], index: 8, kind: input, shape index: {}]   ;;  %s4545_s9 = inlined_call_operand.vmem [shape: f32[32,32], index: 9, kind: input, shape index: {}]   ;;  %s4546_s10 = inlined_call_operand.vmem [shape: f32[32,32], index: 10, kind: input, shape index: {}]   ;;  %s4547_s11 = inlined_call_operand.vmem [shape: f32[32,1], index: 11, kind: input, shape index: {}]   ;;  %s4548_s12 = inlined_call_operand.hbm [shape: f32[32,512], index: 12, kind: output, shape index: {}]  }
   0x1   :  { %4619 = sst [smem:[#allocation32_spill]] %s4536_s0 }
   0x2   :  { %17 = vsyncpa [#allocation3], 0 }
   0x3   :  { %19 = vsyncpa [#allocation3 + $0x1], 0  ;;  %s2871_s21 = smov 0   ;;  %s2873_s22 = smov 0  }
   0x4   :  { %s2875_s23 = smov 0   ;;  %s2877_s24 = smov 0  }
   0x5 LB: > { %s2892_s25 = sadd.s32 4294967295, %s2790_s24   ;;  %s2415_s26 = sadd.s32 4294967294, %s2790_s24   ;;  %s2790_s24 = sphi %s2877_s24, %s4729_s24   ;;  %s2786_s23 = sphi %s2875_s23, %s4728_s23   ;;  %s2782_s22 = sphi %s2873_s22, %s4727_s22   ;;  %s2778_s21 = sphi %s2871_s21, %s4726_s21  }
   0x6   : > { %s2896_s27 = sadd.s32 1, %s2790_s24   ;;  %s289_s28 = sadd.s32 1, %s2786_s23 }
   0x7   : > { %s286_s29 = ssub.s32 %s2790_s24, %s2896_s27  ;;  %p299_p0 = scmp.ne.s32.totalorder %s2786_s23, %s2782_s22 }
   0x8   : > { %p287_p1 = scmp.eq.s32.totalorder %s286_s29, 0  ;;  %p300_p2 = scmp.eq.s32.totalorder %s2892_s25, 3 }
   0x9   : > { %p305_p3 = scmp.ne.s32.totalorder %s2782_s22, %s2778_s21  ;;  %p306_p4 = scmp.eq.s32.totalorder %s2415_s26, 3 }
   0xa   : > { %s2907_s30 = scalar_select %p287_p1, %s2786_s23, %s289_s28  }
   0xb   : > { %p2909_p5 = por %p300_p2, %p299_p0  ;;  %p2913_p6 = por %p306_p4, %p305_p3 }
   0xc   : > { %4620 = sst [smem:[#allocation5_spill]] %s2907_s30  ;;  %p2418_p7 = scmp.ge.s32.totalorder %s2790_s24, 1 }
   0xd   : > { %p364_p8 = scmp.lt.s32.totalorder %s2790_s24, 5 }
   0xf   : > { %p365_p9 = pnand %p2418_p7, %p364_p8 }
  0x11   : > { %368 = sbr.rel (%p365_p9) target bundleno = 735 (0x2df), region = 68 }
  0x16   : > { %v1365_v0 = vld [vmem:[%s4541_s5 + $0x18] sm:$0xff]  ;;  %v412_v1 = vld [vmem:[%s4537_s1 + $0x10] sm:$0xff]  ;;  %v2792_v2 = vmov 2   ;;  %v2793_v3 = vmov 0   ;;  %v1363_v4 = vld [vmem:[%s4541_s5 + $0x8] sm:$0xff]  ;;  %v2794_v13 = vmov 1   ;;  %v434_v35 = vlaneseq }
  0x17   : > { %2668 = vset.pattern.permute.xlu0 %v2792_v2  ;;  %2664 = vset.pattern.permute.xlu1 %v2793_v3  ;;  %v445_v5 = vld [vmem:[%s4538_s2 + $0x18] sm:$0xff]  ;;  %v444_v8 = vld [vmem:[%s4538_s2 + $0x10] sm:$0xff]  ;;  %v411_v12 = vld [vmem:[%s4537_s1 + $0x8] sm:$0xff]  ;;  %p405_p10 = scmp.lt.s32.totalorder %s2892_s25, 3  ;;  %s4624_s0 = sld [smem:[#allocation32_spill]] }
  0x18   : > { %1435 = vperm.xlu0 %2668, %v1365_v0   ;;  %426 = vperm.xlu1 %2664, %v412_v1   ;;  %v921_v6 = vld [vmem:[%s4540_s4 + $0x18] sm:$0xff]  ;;  %v920_v10 = vld [vmem:[%s4540_s4 + $0x10] sm:$0xff]  ;;  %v887_v14 = vld [vmem:[%s4539_s3 + $0x8] sm:$0xff]  ;;  %v3034_v36 = vshrl.u32 %v434_v35, 7  ;;  %s2485_s15 = sshll.u32 %s2892_s25, 7 }
  0x19   : > { %v413_v7 = vld [vmem:[%s4537_s1 + $0x18] sm:$0xff]  ;;  %v888_v11 = vld [vmem:[%s4539_s3 + $0x10] sm:$0xff]  ;;  %v443_v15 = vld [vmem:[%s4538_s2 + $0x8] sm:$0xff]  ;;  %s406_s20 = scalar_select %p405_p10, %s2892_s25, 3 }
  0x1a   : > { %v889_v9 = vld [vmem:[%s4539_s3 + $0x18] sm:$0xff]  ;;  %v919_v16 = vld [vmem:[%s4540_s4 + $0x8] sm:$0xff]  ;;  %v410_v17 = vld [vmem:[%s4537_s1] sm:$0xff]  ;;  %4623 = vst [vmem:[#allocation6_spill] sm:$0xff] %v3034_v36  ;;  %v436_v39 = vsub.s32 0, %v3034_v36  ;;  %s4492_s18 = scalar_lea.hbm %s4548_s12, %s2485_s15 }
  0x1b   : > { %v1364_v18 = vld [vmem:[%s4541_s5 + $0x10] sm:$0xff]  ;;  %v886_v19 = vld [vmem:[%s4539_s3] sm:$0xff]  ;;  %v1453_v26 = vld [vmem:[%s4542_s6 + $0x18] sm:$0xff]  ;;  %s2420_s26 = sshll.u32 %s406_s20, 3  ;;  %s2802_s20 = smov [#allocation2]  }
  0x1c   : > { %1427 = vperm.xlu0 %2668, %v1363_v4   ;;  %463 = vperm.xlu1 %2664, %v445_v5   ;;  %v442_v20 = vld [vmem:[%s4538_s2] sm:$0xff]  ;;  %v1452_v23 = vld [vmem:[%s4542_s6 + $0x10] sm:$0xff]  ;;  %v1451_v29 = vld [vmem:[%s4542_s6 + $0x8] sm:$0xff] }
  0x1d   : > { %v918_v21 = vld [vmem:[%s4540_s4] sm:$0xff]  ;;  %v2204_v25 = vld [vmem:[%s4547_s11 + $0x10] sm:$0xff]  ;;  %v2234_v31 = vld [vmem:[%s4543_s7 + $0x18] sm:$0xff]  ;;  %s3041_s29 = scalar_lea.vmem %s4624_s0, %s2420_s26 }
  0x1e   : > { %v1362_v22 = vld [vmem:[%s4541_s5] sm:$0xff]  ;;  %v2233_v28 = vld [vmem:[%s4543_s7 + $0x10] sm:$0xff]  ;;  %v2203_v32 = vld [vmem:[%s4547_s11 + $0x8] sm:$0xff] }
  0x1f   : > { %v2202_v24 = vld [vmem:[%s4547_s11] sm:$0xff]  ;;  %v2232_v33 = vld [vmem:[%s4543_s7 + $0x8] sm:$0xff]  ;;  %v2205_v34 = vld [vmem:[%s4547_s11 + $0x18] sm:$0xff] }
  0x20   : > { %2673 = vset.pattern.permute.xlu0 %v2793_v3  ;;  %939 = vperm.xlu1 %2664, %v921_v6   ;;  %v2231_v27 = vld [vmem:[%s4543_s7] sm:$0xff]  ;;  %v4556_v6 = vmov 2131351028  }
  0x21   : > { %431 = vperm.xlu0 %2673, %v413_v7   ;;  %v1450_v30 = vld [vmem:[%s4542_s6] sm:$0xff] }
  0x22   : > { %v3045_v40 = vld [vmem:[%s3041_s29] sm:$0x3f] }
  0x23   : > { %v3052_v43 = vrot.slane %v3045_v40, %v436_v39 }
  0x24   : > { %458 = vperm.xlu1 %2664, %v444_v8  }
  0x25   : > { %907 = vperm.xlu0 %2673, %v889_v9   ;;  %v4554_v9 = vmov 2102212464  }
  0x28   : > { %934 = vperm.xlu1 %2664, %v920_v10  }
  0x29   : > { %902 = vperm.xlu0 %2673, %v888_v11  }
  0x2c   : > { %2665 = vset.pattern.permute.xlu1 %v2794_v13 }
  0x2d   : > { %1407 = vperm.xlu1 %2665, %v1365_v0   ;;  %421 = vperm.xlu0 %2673, %v411_v12   ;;  %v4562_v12 = vmov 920167782  }
  0x31   : > { %2666 = vset.pattern.permute.xlu1 %v2793_v3  ;;  %897 = vperm.xlu0 %2673, %v887_v14  }
  0x32   : > { %453 = vperm.xlu1 %2666, %v443_v15   ;;  %v4560_v15 = vmov 1326507024  }
  0x35   : > { %1383 = vperm.xlu0 %2673, %v1365_v0   ;;  %v4565_v0 = vmov 683565275  }
  0x36   : > { %929 = vperm.xlu1 %2666, %v919_v16  }
  0x39   : > { %416 = vperm.xlu0 %2673, %v410_v17  }
  0x3a   : > { %2667 = vset.pattern.permute.xlu1 %v2794_v13 }
  0x3b   : > { %1403 = vperm.xlu1 %2667, %v1364_v18  }
  0x3d   : > { %892 = vperm.xlu0 %2673, %v886_v19  }
  0x3f   : > { %2669 = vset.pattern.permute.xlu1 %v2793_v3 }
  0x40   : > { %448 = vperm.xlu1 %2669, %v442_v20  }
  0x41   : > { %1378 = vperm.xlu0 %2673, %v1364_v18  }
  0x44   : > { %924 = vperm.xlu1 %2669, %v918_v21  }
  0x45   : > { %1373 = vperm.xlu0 %2673, %v1363_v4  }
  0x48   : > { %2670 = vset.pattern.permute.xlu1 %v2794_v13 }
  0x49   : > { %1399 = vperm.xlu1 %2670, %v1363_v4   ;;  %1368 = vperm.xlu0 %2673, %v1362_v22   ;;  %v912_v4 = vsub.s32 1, %v3034_v36 }
  0x4b   : > { %v3108_v35 = vrot.slane %v3045_v40, %v912_v4 }
  0x4d   : > { %2671 = vset.pattern.permute.xlu1 %v2792_v2  ;;  %1466 = vperm.xlu0 %2673, %v1452_v23  }
  0x4e   : > { %1431 = vperm.xlu1 %2671, %v1364_v18  }
  0x51   : > { %2208 = vperm.xlu0 %2673, %v2202_v24  }
  0x52   : > { %2672 = vset.pattern.permute.xlu1 %v2794_v13 }
  0x53   : > { %1395 = vperm.xlu1 %2672, %v1362_v22  }
  0x55   : > { %2218 = vperm.xlu0 %2673, %v2204_v25  }
  0x57   : > { %2674 = vset.pattern.permute.xlu1 %v2793_v3 }
  0x58   : > { %1471 = vperm.xlu1 %2674, %v1453_v26  }
  0x59   : > { %2240 = vperm.xlu0 %2673, %v2231_v27  }
  0x5c   : > { %2675 = vset.pattern.permute.xlu1 %v2792_v2 }
  0x5d   : > { %1423 = vperm.xlu1 %2675, %v1362_v22   ;;  %2250 = vperm.xlu0 %2673, %v2233_v28  }
  0x61   : > { %2676 = vset.pattern.permute.xlu1 %v2793_v3  ;;  %2677 = vset.pattern.permute.xlu0 %v2794_v13 }
  0x62   : > { %1461 = vperm.xlu1 %2676, %v1451_v29   ;;  %2274 = vperm.xlu0 %2677, %v2231_v27  }
  0x66   : > { %1456 = vperm.xlu1 %2676, %v1450_v30   ;;  %2286 = vperm.xlu0 %2677, %v2234_v31  }
  0x6a   : > { %2213 = vperm.xlu1 %2676, %v2203_v32   ;;  %2680 = vset.pattern.permute.xlu0 %v2792_v2 }
  0x6b   : > { %2309 = vperm.xlu0 %2680, %v2232_v33  }
  0x6e   : > { %2223 = vperm.xlu1 %2676, %v2205_v34  }
  0x72   : > { %2245 = vperm.xlu1 %2676, %v2232_v33  }
  0x76   : > { %2255 = vperm.xlu1 %2676, %v2234_v31  }
  0x7a   : > { %2678 = vset.pattern.permute.xlu1 %v2794_v13 }
  0x7b   : > { %2278 = vperm.xlu1 %2678, %v2232_v33  }
  0x7f   : > { %2282 = vperm.xlu1 %2678, %v2233_v28  }
  0x83   : > { %2679 = vset.pattern.permute.xlu1 %v2792_v2  ;;  %v4558_v2 = vmov 2475754826  }
  0x84   : > { %2305 = vperm.xlu1 %2679, %v2231_v27  }
  0x88   : > { %2313 = vperm.xlu1 %2679, %v2233_v28  }
  0x8c   : > { %2317 = vperm.xlu1 %2679, %v2234_v31  }
  0x93   : > { %v427_v37 = vpop.permute.xlu1 %426  ;;  %v3036_v38 = vpop.permute.xlu0 %1435 }
  0x94   : > { %v440_v46 = vmul.f32 %v3052_v43, %v427_v37 }
  0x97   : > { %v3047_v41 = vpop.permute.xlu1 %463  ;;  %v3049_v42 = vpop.permute.xlu0 %1427 }
  0x9b   : > { %v3054_v44 = vpop.permute.xlu1 %939 }
  0x9c   : > { %v3056_v45 = vpop.permute.xlu0 %431 }
  0x9f   : > { %v459_v47 = vpop.permute.xlu1 %458 }
  0xa0   : > { %v3059_v48 = vadd.f32 %v459_v47, %v440_v46  ;;  %v3061_v49 = vpop.permute.xlu0 %907 }
  0xa2   : > { %v681_v50 = vand.u32 2139095040, %v3059_v48  ;;  %v4553_v56 = vand.u32 2147483647, %v3059_v48 }
  0xa3   : > { %v3066_v55 = vpop.permute.xlu1 %934 }
  0xa4   : > { %v682_v51 = vshrl.u32 %v681_v50, 23  ;;  %v3064_v52 = vpop.permute.xlu0 %902  ;;  %v685_v60 = vand.u32 8388607, %v4553_v56 }
  0xa6   : > { %v2429_v53 = vadd.s32 4294967169, %v682_v51  ;;  %v686_v18 = vor.u32 8388608, %v685_v60 }
  0xa8   : > { %v688_v54 = vadd.s32 1, %v2429_v53  ;;  %v422_v58 = vpop.permute.xlu0 %421  ;;  %v3071_v62 = vpop.permute.xlu1 %1407  ;;  %v726_v32 = vshll.u32 %v686_v18, 8 }
  0xa9   : > { %v439_v24 = vmul.f32 %v3052_v43, %v422_v58 }
  0xaa   : > { %vm689_vm0 = vcmp.gt.s32.totalorder %v688_v54, 0 }
  0xab   : > { %v690_v57 = vsel %vm689_vm0, %v688_v54, 0 }
  0xac   : > { %v692_v59 = vand.u32 31, %v690_v57  ;;  %v3073_v63 = vshrl.u32 %v690_v57, 5  ;;  %v898_v17 = vpop.permute.xlu0 %897 }
  0xad   : > { %v454_v27 = vpop.permute.xlu1 %453  ;;  %v915_v54 = vmul.f32 %v3108_v35, %v898_v17 }
  0xae   : > { %v693_v61 = vsub.s32 32, %v692_v59  ;;  %v695_v1 = vshll.u32 %v4565_v0, %v692_v59  ;;  %v698_v3 = vshll.u32 %v4558_v2, %v692_v59  ;;  %v701_v8 = vshll.u32 %v4556_v6, %v692_v59 }
  0xaf   : > { %v704_v11 = vshll.u32 %v4554_v9, %v692_v59  ;;  %v707_v14 = vshll.u32 %v4562_v12, %v692_v59  ;;  %vm710_vm1 = vcmp.lt.s32.totalorder %v3073_v63, 1  ;;  %vm713_vm2 = vcmp.lt.s32.totalorder %v3073_v63, 4 }
  0xb0   : > { %v696_v5 = vshrl.u32 %v4558_v2, %v693_v61  ;;  %v699_v7 = vshrl.u32 %v4556_v6, %v693_v61  ;;  %v702_v10 = vshrl.u32 %v4554_v9, %v693_v61  ;;  %v705_v13 = vshrl.u32 %v4562_v12, %v693_v61  ;;  %v3112_v39 = vpop.permute.xlu0 %1383 }
  0xb1   : > { %v708_v16 = vshrl.u32 %v4560_v15, %v693_v61  ;;  %vm712_vm3 = vcmp.lt.s32.totalorder %v3073_v63, 3  ;;  %vm711_vm4 = vcmp.lt.s32.totalorder %v3073_v63, 2  ;;  %v3110_v37 = vadd.f32 %v454_v27, %v439_v24  ;;  %v930_v60 = vpop.permute.xlu1 %929 }
  0xb2   : > { %v697_v19 = vor.u32 %v696_v5, %v695_v1  ;;  %v700_v20 = vor.u32 %v699_v7, %v698_v3  ;;  %v703_v21 = vor.u32 %v702_v10, %v701_v8  ;;  %v706_v22 = vor.u32 %v705_v13, %v704_v11 }
  0xb3   : > { %v709_v23 = vor.u32 %v708_v16, %v707_v14  ;;  %v577_v53 = vand.u32 2139095040, %v3110_v37  ;;  %v4550_v58 = vand.u32 2147483647, %v3110_v37  ;;  %v694_v1 = vshrl.u32 %v4565_v0, %v693_v61 }
  0xb4   : > { %v718_v25 = vsel %vm710_vm1, %v697_v19, %v700_v20  ;;  %v722_v26 = vsel %vm710_vm1, %v700_v20, %v703_v21  ;;  %v719_v28 = vsel %vm713_vm2, %v706_v22, 920167782  ;;  %v715_v57 = vsel %vm713_vm2, %v703_v21, 2102212464  ;;  %v3127_v4 = vpop.permute.xlu0 %416 }
  0xb5   : > { %v723_v29 = vsel %vm713_vm2, %v709_v23, 1326507024  ;;  %v720_v30 = vsel %vm712_vm3, %v703_v21, %v719_v28  ;;  %v578_v59 = vshrl.u32 %v577_v53, 23  ;;  %v714_v5 = vsel %vm710_vm1, %v694_v1, %v697_v19 }
  0xb6   : > { %v724_v31 = vsel %vm712_vm3, %v706_v22, %v723_v29  ;;  %v721_v33 = vsel %vm711_vm4, %v718_v25, %v720_v30  ;;  %v716_v7 = vsel %vm712_vm3, %v700_v20, %v715_v57  ;;  %v3133_v8 = vadd.f32 %v930_v60, %v915_v54 }
  0xb7   : > { %v725_v34 = vsel %vm711_vm4, %v722_v26, %v724_v31  ;;  %v3117_v50 = vmul.u32.u64.low %v726_v32, %v721_v33  ;;  %v3118_v51 = vmul.u32.u64.high %v726_v32, %v721_v33, %v3117_v50  ;;  %v2425_v3 = vadd.s32 4294967169, %v578_v59 }
  0xb8   : > { %v3114_v46 = vmul.u32.u64.low %v726_v32, %v725_v34  ;;  %v3115_v47 = vmul.u32.u64.high %v726_v32, %v725_v34, %v3114_v46  ;;  %v581_v11 = vand.u32 8388607, %v4550_v58  ;;  %v717_v13 = vsel %vm711_vm4, %v714_v5, %v716_v7  ;;  %v3146_v21 = vpop.permute.xlu0 %892 }
  0xb9   : > { %v736_v10 = vadd.s32 1, %v3118_v51  ;;  %v584_v61 = vadd.s32 1, %v2425_v3  ;;  %v1412_v14 = vsub.s32 4, %v3034_v36  ;;  %v1388_v16 = vsub.s32 3, %v3034_v36 }
  0xba   : > { %vm735_vm5 = vc.u32 %v3115_v47, %v3117_v50  ;;  %v1053_v17 = vand.u32 2139095040, %v3133_v8  ;;  %v582_v19 = vor.u32 8388608, %v581_v11  ;;  %v733_v22 = vmul.u32 %v726_v32, %v717_v13 }
  0xbb   : > { %vm585_vm6 = vcmp.gt.s32.totalorder %v584_v61, 0  ;;  %v737_v18 = vsel %vm735_vm5, %v736_v10, %v3118_v51  ;;  %v441_v24 = vmul.f32 %v3052_v43, %v3056_v45  ;;  %v3151_v63 = vrot.slane %v3045_v40, %v1412_v14  ;;  %v1404_v14 = vpop.permute.xlu1 %1403 }
  0xbc   : > { %v586_v20 = vsel %vm585_vm6, %v584_v61, 0  ;;  %v3154_v25 = vrot.slane %v3045_v40, %v1388_v16  ;;  %v3156_v26 = vadd.s32 %v737_v18, %v733_v22  ;;  %v917_v27 = vmul.f32 %v3108_v35, %v3061_v49  ;;  %v1379_v59 = vpop.permute.xlu0 %1378 }
  0xbd   : > { %v588_v23 = vand.u32 31, %v586_v20  ;;  %v1054_v29 = vshrl.u32 %v1053_v17, 23  ;;  %v587_v30 = vshrl.u32 %v586_v20, 5  ;;  %v3162_v33 = vshll.u32 %v582_v19, 8 }
  0xbe   : > { %v739_v7 = vadd.s32 536870912, %v3156_v26  ;;  %v1392_v16 = vmul.f32 %v3154_v25, %v1379_v59 }
  0xbf   : > { %v589_v28 = vsub.s32 32, %v588_v23  ;;  %v591_v31 = vshll.u32 %v4565_v0, %v588_v23  ;;  %v594_v32 = vshll.u32 %v4558_v2, %v588_v23  ;;  %v597_v46 = vshll.u32 %v4556_v6, %v588_v23 }
  0xc0   : > { %v600_v53 = vshll.u32 %v4554_v9, %v588_v23  ;;  %v603_v54 = vshll.u32 %v4562_v12, %v588_v23  ;;  %v2441_v5 = vadd.s32 4294967169, %v1054_v29  ;;  %vm606_vm7 = vcmp.lt.s32.totalorder %v587_v30, 1 }
  0xc1   : > { %v592_v45 = vshrl.u32 %v4558_v2, %v589_v28  ;;  %v595_v34 = vshrl.u32 %v4556_v6, %v589_v28  ;;  %v598_v51 = vshrl.u32 %v4554_v9, %v589_v28  ;;  %v601_v49 = vshrl.u32 %v4562_v12, %v589_v28 }
  0xc2   : > { %v604_v57 = vshrl.u32 %v4560_v15, %v589_v28  ;;  %vm609_vm8 = vcmp.lt.s32.totalorder %v587_v30, 4  ;;  %vm607_vm9 = vcmp.lt.s32.totalorder %v587_v30, 2  ;;  %vm608_vm10 = vcmp.lt.s32.totalorder %v587_v30, 3 }
  0xc3   : > { %v593_v60 = vor.u32 %v592_v45, %v591_v31  ;;  %v596_v1 = vor.u32 %v595_v34, %v594_v32  ;;  %v599_v3 = vor.u32 %v598_v51, %v597_v46  ;;  %v602_v10 = vor.u32 %v601_v49, %v600_v53 }
  0xc4   : > { %v605_v11 = vor.u32 %v604_v57, %v603_v54  ;;  %v1060_v23 = vadd.s32 1, %v2441_v5  ;;  %v590_v29 = vshrl.u32 %v4565_v0, %v589_v28  ;;  %v1416_v45 = vmul.f32 %v3151_v63, %v1404_v14 }
  0xc5   : > { %v614_v61 = vsel %vm606_vm7, %v593_v60, %v596_v1  ;;  %v618_v13 = vsel %vm606_vm7, %v596_v1, %v599_v3  ;;  %v615_v17 = vsel %vm609_vm8, %v602_v10, 920167782  ;;  %v611_v19 = vsel %vm609_vm8, %v599_v3, 2102212464 }
  0xc6   : > { %v619_v18 = vsel %vm609_vm8, %v605_v11, 1326507024  ;;  %v616_v20 = vsel %vm608_vm10, %v599_v3, %v615_v17  ;;  %v3189_v49 = vshrl.u32 %v739_v7, 30  ;;  %v610_v54 = vsel %vm606_vm7, %v590_v29, %v593_v60  ;;  %v449_v7 = vpop.permute.xlu1 %448 }
  0xc7   : > { %v620_v22 = vsel %vm608_vm10, %v602_v10, %v619_v18  ;;  %v617_v31 = vsel %vm607_vm9, %v614_v61, %v616_v20  ;;  %v612_v28 = vsel %vm608_vm10, %v596_v1, %v611_v19  ;;  %vm1061_vm11 = vcmp.gt.s32.totalorder %v1060_v23, 0 }
  0xc8   : > { %v621_v32 = vsel %vm607_vm9, %v618_v13, %v620_v22  ;;  %v3185_v51 = vmul.u32.u64.low %v3162_v33, %v617_v31  ;;  %v3186_v53 = vmul.u32.u64.high %v3162_v33, %v617_v31, %v3185_v51  ;;  %4625 = vst [vmem:[#allocation7_spill] sm:$0xff] %v3189_v49  ;;  %v3193_v57 = vadd.f32 %v3047_v41, %v441_v24 }
  0xc9   : > { %v3181_v34 = vmul.u32.u64.low %v3162_v33, %v621_v32  ;;  %v3182_v46 = vmul.u32.u64.high %v3162_v33, %v621_v32, %v3181_v34  ;;  %v1062_v59 = vsel %vm1061_vm11, %v1060_v23, 0  ;;  %v3195_v3 = vadd.f32 %v1416_v45, %v1392_v16 }
  0xca   : > { %4626 = vst [vmem:[#allocation8_spill] sm:$0xff] %v3193_v57  ;;  %v3198_v5 = vadd.f32 %v3054_v44, %v917_v27  ;;  %v916_v10 = vmul.f32 %v3108_v35, %v3064_v52  ;;  %v613_v11 = vsel %vm607_vm9, %v610_v54, %v612_v28  ;;  %v632_v60 = vadd.s32 1, %v3186_v53 }
  0xcb   : > { %vm631_vm12 = vc.u32 %v3182_v46, %v3185_v51  ;;  %v1064_v1 = vand.u32 31, %v1062_v59  ;;  %v741_v41 = vshll.u32 %v3189_v49, 30  ;;  %v438_v24 = vmul.f32 %v3052_v43, %v3127_v4 }
  0xcc   : > { %4627 = vst [vmem:[#allocation9_spill] sm:$0xff] %v3198_v5  ;;  %v1440_v44 = vsub.s32 5, %v3034_v36  ;;  %v785_v27 = vand.u32 2139095040, %v3193_v57  ;;  %v633_v52 = vsel %vm631_vm12, %v632_v60, %v3186_v53  ;;  %v1261_v61 = vand.u32 2139095040, %v3198_v5 }
  0xcd   : > { %v1065_v30 = vsub.s32 32, %v1064_v1  ;;  %v629_v13 = vmul.u32 %v3162_v33, %v613_v11  ;;  %v4549_v14 = vand.u32 2147483647, %v3133_v8  ;;  %v3215_v16 = vadd.f32 %v449_v7, %v438_v24 }
  0xce   : > { %v3218_v17 = vadd.f32 %v3066_v55, %v916_v10  ;;  %v3224_v19 = vsub.s32 %v3156_v26, %v741_v41  ;;  %v3228_v22 = vshrl.u32 %v1062_v59, 5  ;;  %v1067_v33 = vshll.u32 %v4565_v0, %v1064_v1  ;;  %v3240_v10 = vpop.permute.xlu1 %924 }
  0xcf   : > { %4628 = vst [vmem:[#allocation10_spill] sm:$0xff] %v3215_v16  ;;  %v1068_v43 = vshrl.u32 %v4558_v2, %v1065_v30  ;;  %v1071_v4 = vshrl.u32 %v4556_v6, %v1065_v30  ;;  %v1074_v18 = vshrl.u32 %v4554_v9, %v1065_v30  ;;  %v3226_v20 = vadd.s32 %v633_v52, %v629_v13 }
  0xd0   : > { %4629 = vst [vmem:[#allocation11_spill] sm:$0xff] %v3218_v17  ;;  %v1070_v23 = vshll.u32 %v4558_v2, %v1064_v1  ;;  %v1073_v55 = vshll.u32 %v4556_v6, %v1064_v1  ;;  %v1076_v29 = vshll.u32 %v4554_v9, %v1064_v1  ;;  %v1077_v31 = vshrl.u32 %v4562_v12, %v1065_v30 }
  0xd1   : > { %v1057_v32 = vand.u32 8388607, %v4549_v14  ;;  %v1079_v26 = vshll.u32 %v4562_v12, %v1064_v1  ;;  %v1080_v45 = vshrl.u32 %v4560_v15, %v1065_v30  ;;  %v473_v34 = vand.u32 2139095040, %v3215_v16 }
  0xd2   : > { %v1069_v53 = vor.u32 %v1068_v43, %v1067_v33  ;;  %v1072_v54 = vor.u32 %v1071_v4, %v1070_v23  ;;  %v1075_v28 = vor.u32 %v1074_v18, %v1073_v55  ;;  %v1078_v59 = vor.u32 %v1077_v31, %v1076_v29 }
  0xd3   : > { %v744_v11 = vsub.s32 0, %v3224_v19  ;;  %v635_v60 = vadd.s32 536870912, %v3226_v20  ;;  %v1081_v7 = vor.u32 %v1080_v45, %v1079_v26  ;;  %vm1085_vm13 = vcmp.lt.s32.totalorder %v3228_v22, 4  ;;  %v1400_v26 = vpop.permute.xlu1 %1399 }
  0xd4   : > { %v786_v41 = vshrl.u32 %v785_v27, 23  ;;  %v1262_v24 = vshrl.u32 %v1261_v61, 23  ;;  %v1091_v1 = vsel %vm1085_vm13, %v1078_v59, 920167782  ;;  %v4551_v52 = vand.u32 2147483647, %v3193_v57 }
  0xd5   : > { %v1157_v13 = vand.u32 2139095040, %v3218_v17  ;;  %v1058_v43 = vor.u32 8388608, %v1057_v32  ;;  %vm1082_vm14 = vcmp.lt.s32.totalorder %v3228_v22, 1  ;;  %vm1084_vm15 = vcmp.lt.s32.totalorder %v3228_v22, 3 }
  0xd6   : > { %v1090_v4 = vsel %vm1082_vm14, %v1069_v53, %v1072_v54  ;;  %v1092_v18 = vsel %vm1084_vm15, %v1075_v28, %v1091_v1  ;;  %v1095_v27 = vsel %vm1085_vm13, %v1081_v7, 1326507024  ;;  %v474_v61 = vshrl.u32 %v473_v34, 23 }
  0xd7   : > { %v2430_v33 = vmin.u32 %v744_v11, %v3224_v19  ;;  %v3258_v23 = vshrl.u32 %v635_v60, 30  ;;  %v1094_v55 = vsel %vm1082_vm14, %v1072_v54, %v1075_v28  ;;  %v1096_v29 = vsel %vm1084_vm15, %v1078_v59, %v1095_v27 }
  0xd8   : > { %v3265_v31 = vrot.slane %v3045_v40, %v1440_v44  ;;  %vm1083_vm0 = vcmp.lt.s32.totalorder %v3228_v22, 2  ;;  %v2421_v32 = vadd.s32 4294967169, %v474_v61  ;;  %v2433_v45 = vadd.s32 4294967169, %v786_v41  ;;  %v1374_v44 = vpop.permute.xlu0 %1373 }
  0xd9   : > { %4630 = vst [vmem:[#allocation12_spill] sm:$0xff] %v3258_v23  ;;  %v2449_v7 = vadd.s32 4294967169, %v1262_v24  ;;  %v1093_v34 = vsel %vm1083_vm0, %v1090_v4, %v1092_v18  ;;  %v3272_v11 = vand.u32 8388607, %v4551_v52  ;;  %v1158_v60 = vshrl.u32 %v1157_v13, 23 }
  0xda   : > { %v1097_v59 = vsel %vm1083_vm0, %v1094_v55, %v1096_v29  ;;  %v3276_v1 = vshll.u32 %v1058_v43, 8  ;;  %v480_v40 = vadd.s32 1, %v2421_v32  ;;  %v746_v27 = vclz %v2430_v33 }
  0xdb   : > { %v637_v61 = vshll.u32 %v3258_v23, 30  ;;  %v1066_v41 = vshrl.u32 %v4565_v0, %v1065_v30  ;;  %v1415_v24 = vmul.f32 %v3151_v63, %v1400_v26  ;;  %v1087_v4 = vsel %vm1085_vm13, %v1075_v28, 2102212464 }
  0xdc   : > { %v3284_v18 = vmul.u32.u64.low %v3276_v1, %v1093_v34  ;;  %v3285_v13 = vmul.u32.u64.high %v3276_v1, %v1093_v34, %v3284_v18  ;;  %vm481_vm1 = vcmp.gt.s32.totalorder %v480_v40, 0  ;;  %v1391_v29 = vmul.f32 %v3154_v25, %v1374_v44 }
  0xdd   : > { %v3289_v43 = vmul.u32.u64.low %v3276_v1, %v1097_v59  ;;  %v3290_v55 = vmul.u32.u64.high %v3276_v1, %v1097_v59, %v3289_v43  ;;  %v482_v33 = vsel %vm481_vm1, %v480_v40, 0  ;;  %v3295_v30 = vmul.f32 %v3265_v31, %v3036_v38 }
  0xde   : > { %v3299_v28 = vmul.f32 %v3265_v31, %v3049_v42  ;;  %v4552_v32 = vand.u32 2147483647, %v3215_v16  ;;  %v484_v26 = vand.u32 31, %v482_v33  ;;  %v1086_v34 = vsel %vm1082_vm14, %v1066_v41, %v1069_v53 }
  0xdf   : > { %v1088_v59 = vsel %vm1084_vm15, %v1072_v54, %v1087_v4  ;;  %v3306_v40 = vadd.f32 %v1415_v24, %v1391_v29  ;;  %v3309_v43 = vadd.s32 1, %v2433_v45  ;;  %v3311_v38 = vadd.s32 1, %v2449_v7 }
  0xe0   : > { %v3315_v42 = vmul.f32 %v3151_v63, %v3071_v62  ;;  %v485_v14 = vsub.s32 32, %v484_v26  ;;  %v3317_v58 = vadd.s32 4294967294, %v746_v27  ;;  %v2445_v52 = vadd.s32 4294967169, %v1158_v60 }
  0xe1   : > { %v3320_v53 = vsub.s32 %v3226_v20, %v637_v61  ;;  %v914_v54 = vmul.f32 %v3108_v35, %v3146_v21  ;;  %v1089_v45 = vsel %vm1083_vm0, %v1086_v34, %v1088_v59  ;;  %v477_v7 = vand.u32 8388607, %v4552_v32 }
  0xe2   : > { %v488_v41 = vshrl.u32 %v4558_v2, %v485_v14  ;;  %v491_v62 = vshrl.u32 %v4556_v6, %v485_v14  ;;  %v487_v27 = vshll.u32 %v4565_v0, %v484_v26  ;;  %v490_v60 = vshll.u32 %v4558_v2, %v484_v26 }
  0xe3   : > { %v494_v20 = vshrl.u32 %v4554_v9, %v485_v14  ;;  %v3334_v61 = vadd.f32 %v3240_v10, %v914_v54  ;;  %vm793_vm2 = vcmp.gt.s32.totalorder %v3309_v43, 0  ;;  %v483_v35 = vshrl.u32 %v482_v33, 5 }
  0xe4   : > { %v493_v21 = vshll.u32 %v4556_v6, %v484_v26  ;;  %v496_v22 = vshll.u32 %v4554_v9, %v484_v26  ;;  %v497_v24 = vshrl.u32 %v4562_v12, %v485_v14  ;;  %vm1107_vm3 = vc.u32 %v3290_v55, %v3284_v18  ;;  %v1432_v9 = vpop.permute.xlu1 %1431 }
  0xe5   : > { %4631 = vst [vmem:[#allocation13_spill] sm:$0xff] %v3334_v61  ;;  %v1108_v4 = vadd.s32 1, %v3285_v13  ;;  %v489_v29 = vor.u32 %v488_v41, %v487_v27  ;;  %v492_v34 = vor.u32 %v491_v62, %v490_v60  ;;  %v499_v10 = vshll.u32 %v4562_v12, %v484_v26 }
  0xe6   : > { %v495_v59 = vor.u32 %v494_v20, %v493_v21  ;;  %v498_v32 = vor.u32 %v497_v24, %v496_v22  ;;  %v500_v54 = vshrl.u32 %v4560_v15, %v485_v14  ;;  %vm2432_vm4 = vcmp.lt.s32.totalorder %v3317_v58, 0 }
  0xe7   : > { %v1164_v33 = vadd.s32 1, %v2445_v52  ;;  %v1105_v56 = vmul.u32 %v3276_v1, %v1089_v45  ;;  %v478_v44 = vor.u32 8388608, %v477_v7  ;;  %v640_v6 = vsub.s32 0, %v3320_v53 }
  0xe8   : > { %v501_v2 = vor.u32 %v500_v54, %v499_v10  ;;  %vm502_vm5 = vcmp.lt.s32.totalorder %v483_v35, 1  ;;  %v949_v41 = vand.u32 2139095040, %v3334_v61  ;;  %v1109_v26 = vsel %vm1107_vm3, %v1108_v4, %v3285_v13 }
  0xe9   : > { %vm504_vm6 = vcmp.lt.s32.totalorder %v483_v35, 3  ;;  %vm505_vm7 = vcmp.lt.s32.totalorder %v483_v35, 4  ;;  %v510_v62 = vsel %vm502_vm5, %v489_v29, %v492_v34  ;;  %v514_v1 = vsel %vm502_vm5, %v492_v34, %v495_v59 }
  0xea   : > { %v507_v52 = vsel %vm505_vm7, %v495_v59, 2102212464  ;;  %v511_v27 = vsel %vm505_vm7, %v498_v32, 920167782  ;;  %v515_v45 = vsel %vm505_vm7, %v501_v2, 1326507024  ;;  %v486_v7 = vshrl.u32 %v4565_v0, %v485_v14  ;;  %v1396_v14 = vpop.permute.xlu1 %1395 }
  0xeb   : > { %vm503_vm8 = vcmp.lt.s32.totalorder %v483_v35, 2  ;;  %v512_v60 = vsel %vm504_vm6, %v495_v59, %v511_v27  ;;  %v518_v20 = vshll.u32 %v478_v44, 8  ;;  %v516_v22 = vsel %vm504_vm6, %v498_v32, %v515_v45 }
  0xec   : > { %v513_v21 = vsel %vm503_vm8, %v510_v62, %v512_v60  ;;  %v950_v13 = vshrl.u32 %v949_v41, 23  ;;  %v1444_v24 = vmul.f32 %v3265_v31, %v1432_v9  ;;  %v3360_v4 = vadd.s32 %v1109_v26, %v1105_v56 }
  0xed   : > { %v506_v10 = vsel %vm502_vm5, %v486_v7, %v489_v29  ;;  %v508_v54 = vsel %vm504_vm6, %v492_v34, %v507_v52  ;;  %v517_v2 = vsel %vm503_vm8, %v514_v1, %v516_v22  ;;  %v794_v9 = vsel %vm793_vm2, %v3309_v43, 0  ;;  %v1369_v29 = vpop.permute.xlu0 %1368 }
  0xee   : > { %v3365_v15 = vmul.u32.u64.low %v518_v20, %v517_v2  ;;  %v3366_v12 = vmul.u32.u64.high %v518_v20, %v517_v2, %v3365_v15  ;;  %v3368_v44 = vmul.u32.u64.low %v518_v20, %v513_v21  ;;  %v3369_v59 = vmul.u32.u64.high %v518_v20, %v513_v21, %v3368_v44 }
  0xef   : > { %vm1165_vm9 = vcmp.gt.s32.totalorder %v1164_v33, 0  ;;  %v2426_v56 = vmin.u32 %v640_v6, %v3320_v53  ;;  %v2437_v32 = vadd.s32 4294967169, %v950_v13  ;;  %v3379_v34 = vsel %vm2432_vm4, 0, %v3317_v58 }
  0xf0   : > { %v509_v15 = vsel %vm503_vm8, %v506_v10, %v508_v54  ;;  %v3383_v41 = vadd.f32 %v1444_v24, %v3195_v3  ;;  %v1414_v26 = vmul.f32 %v3151_v63, %v1396_v14  ;;  %vm1269_vm10 = vcmp.gt.s32.totalorder %v3311_v38, 0 }
  0xf1   : > { %v1393_v43 = vmul.f32 %v3154_v25, %v3112_v39  ;;  %v1111_v6 = vadd.s32 536870912, %v3360_v4  ;;  %v956_v62 = vadd.s32 1, %v2437_v32  ;;  %v3390_v52 = vsel %vm1165_vm9, %v1164_v33, 0 }
  0xf2   : > { %vm527_vm11 = vc.u32 %v3366_v12, %v3368_v44  ;;  %v528_v58 = vadd.s32 1, %v3369_v59  ;;  %v1390_v3 = vmul.f32 %v3154_v25, %v1369_v29  ;;  %v754_v35 = vsub.s32 4294967266, %v3379_v34 }
  0xf3   : > { %v642_v63 = vclz %v2426_v56  ;;  %v525_v27 = vmul.u32 %v518_v20, %v509_v15  ;;  %vm957_vm12 = vcmp.gt.s32.totalorder %v956_v62, 0  ;;  %v4564_v39 = vand.u32 2147483647, %v3334_v61 }
  0xf4   : > { %v529_v1 = vsel %vm527_vm11, %v528_v58, %v3369_v59  ;;  %v958_v45 = vsel %vm957_vm12, %v956_v62, 0  ;;  %v3399_v7 = vadd.f32 %v1414_v26, %v1390_v3  ;;  %v3401_v33 = vshrl.u32 %v794_v9, 5 }
  0xf5   : > { %v3403_v60 = vand.u32 31, %v794_v9  ;;  %v3405_v21 = vshrl.u32 %v1111_v6, 30  ;;  %v530_v22 = vadd.s32 %v529_v1, %v525_v27  ;;  %v734_v25 = vadd.s32 %v3117_v50, %v3115_v47 }
  0xf6   : > { %v3412_v20 = vsel %vm1269_vm10, %v3311_v38, 0  ;;  %v960_v13 = vand.u32 31, %v958_v45  ;;  %v3416_v24 = vadd.f32 %v3299_v28, %v3306_v40  ;;  %v750_v10 = vsub.s32 32, %v3379_v34 }
  0xf7   : > { %4632 = vst [vmem:[#allocation14_spill] sm:$0xff] %v3405_v21  ;;  %v3420_v54 = vand.u32 31, %v3390_v52  ;;  %v1421_v2 = vadd.f32 %v3315_v42, %v1393_v43  ;;  %v531_v14 = vadd.s32 536870912, %v530_v22  ;;  %v3423_v59 = vadd.s32 127, %v754_v35 }
  0xf8   : > { %v2427_v47 = vadd.s32 4294967294, %v642_v63  ;;  %v953_v50 = vand.u32 8388607, %v4564_v39  ;;  %v961_v38 = vsub.s32 32, %v960_v13  ;;  %v1113_v9 = vshll.u32 %v3405_v21, 30 }
  0xf9   : > { %4633 = vst [vmem:[#allocation15_spill] sm:$0xff] %v3420_v54  ;;  %v959_v56 = vshrl.u32 %v958_v45, 5  ;;  %v963_v28 = vshll.u32 %v4565_v0, %v960_v13  ;;  %v4634_v40 = vmov 2475754826   ;;  %v4635_v15 = vmov 2131351028  }
  0xfa   : > { %v966_v32 = vshll.u32 %v4634_v40, %v960_v13  ;;  %v964_v29 = vshrl.u32 %v4634_v40, %v961_v38  ;;  %v967_v26 = vshrl.u32 %v4635_v15, %v961_v38  ;;  %v969_v42 = vshll.u32 %v4635_v15, %v960_v13 }
  0xfb   : > { %v4636_v43 = vmov 2102212464   ;;  %v3434_v62 = vshrl.u32 %v531_v14, 30  ;;  %v4638_v3 = vmov 920167782   ;;  %vm2428_vm13 = vcmp.lt.s32.totalorder %v2427_v47, 0  ;;  %v1472_v14 = vpop.permute.xlu1 %1471 }
  0xfc   : > { %v970_v6 = vshrl.u32 %v4636_v43, %v961_v38  ;;  %v972_v58 = vshll.u32 %v4636_v43, %v960_v13  ;;  %v973_v35 = vshrl.u32 %v4638_v3, %v961_v38  ;;  %v975_v63 = vshll.u32 %v4638_v3, %v960_v13 }
  0xfd   : > { %4637 = vst [vmem:[#allocation16_spill] sm:$0xff] %v3434_v62  ;;  %v965_v27 = vor.u32 %v964_v29, %v963_v28  ;;  %v968_v1 = vor.u32 %v967_v26, %v966_v32  ;;  %v4639_v39 = vmov 1326507024   ;;  %v3441_v36 = vsub.s32 %v3360_v4, %v1113_v9 }
  0xfe   : > { %v971_v45 = vor.u32 %v970_v6, %v969_v42  ;;  %v976_v0 = vshrl.u32 %v4639_v39, %v961_v38  ;;  %v954_v21 = vor.u32 8388608, %v953_v50  ;;  %v974_v23 = vor.u32 %v973_v35, %v972_v58 }
  0xff   : > { %vm978_vm14 = vcmp.lt.s32.totalorder %v959_v56, 1  ;;  %vm981_vm15 = vcmp.lt.s32.totalorder %v959_v56, 4  ;;  %v1449_v57 = vadd.f32 %v3295_v30, %v1421_v2  ;;  %v533_v49 = vshll.u32 %v3434_v62, 30 }
 0x100   : > { %v977_v17 = vor.u32 %v976_v0, %v975_v63  ;;  %v4640_v13 = vmov 683565275   ;;  %v983_v32 = vsel %vm981_vm15, %v971_v45, 2102212464  ;;  %v986_v29 = vsel %vm978_vm14, %v965_v27, %v968_v1 }
 0x101   : > { %v962_v28 = vshrl.u32 %v4640_v13, %v961_v38  ;;  %vm980_vm0 = vcmp.lt.s32.totalorder %v959_v56, 3  ;;  %v987_v26 = vsel %vm981_vm15, %v974_v23, 920167782  ;;  %v990_v4 = vsel %vm978_vm14, %v968_v1, %v971_v45 }
 0x102   : > { %v991_v9 = vsel %vm981_vm15, %v977_v17, 1326507024  ;;  %vm979_vm1 = vcmp.lt.s32.totalorder %v959_v56, 2  ;;  %v988_v50 = vsel %vm980_vm0, %v971_v45, %v987_v26  ;;  %v994_v0 = vshll.u32 %v954_v21, 8 }
 0x103   : > { %v3448_v42 = vadd.f32 %v1472_v14, %v1449_v57  ;;  %v982_v6 = vsel %vm978_vm14, %v962_v28, %v965_v27  ;;  %v984_v30 = vsel %vm980_vm0, %v968_v1, %v983_v32  ;;  %v989_v2 = vsel %vm979_vm1, %v986_v29, %v988_v50  ;;  %v1424_v29 = vpop.permute.xlu1 %1423 }
 0x104   : > { %v992_v58 = vsel %vm980_vm0, %v974_v23, %v991_v9  ;;  %v1116_v38 = vsub.s32 0, %v3441_v36  ;;  %v3454_v63 = vmul.u32.u64.low %v994_v0, %v989_v2  ;;  %v3455_v62 = vmul.u32.u64.high %v994_v0, %v989_v2, %v3454_v63 }
 0x105   : > { %4641 = vst [vmem:[#allocation17_spill] sm:$0xff] %v3448_v42  ;;  %v993_v35 = vsel %vm979_vm1, %v990_v4, %v992_v58  ;;  %v3459_v17 = vsel %vm2428_vm13, 0, %v2427_v47  ;;  %v3461_v21 = vsub.s32 %v530_v22, %v533_v49  ;;  %v752_v27 = vshrl.u32 %v734_v25, %v750_v10 }
 0x106   : > { %v3463_v57 = vmul.u32.u64.low %v994_v0, %v993_v35  ;;  %v3464_v45 = vmul.u32.u64.high %v994_v0, %v993_v35, %v3463_v57  ;;  %v3467_v1 = vsub.s32 32, %v3420_v54  ;;  %v985_v23 = vsel %vm979_vm1, %v982_v6, %v984_v30 }
 0x107   : > { %v1793_v14 = vand.u32 2139095040, %v3448_v42  ;;  %v3472_v28 = vsub.s32 32, %v3403_v60  ;;  %v751_v47 = vshll.u32 %v3224_v19, %v3379_v34  ;;  %v756_v49 = vshll.u32 %v3423_v59, 23 }
 0x108   : > { %4642 = vst [vmem:[#allocation18_spill] sm:$0xff] %v3467_v1  ;;  %v3479_v22 = vshll.u32 %v4640_v13, %v3403_v60  ;;  %v650_v25 = vsub.s32 4294967266, %v3459_v17  ;;  %v2442_v10 = vmin.u32 %v1116_v38, %v3441_v36  ;;  %v1004_v56 = vadd.s32 1, %v3455_v62 }
 0x109   : > { %v1794_v32 = vshrl.u32 %v1793_v14, 23  ;;  %v3485_v26 = vshrl.u32 %v3412_v20, 5  ;;  %v536_v4 = vsub.s32 0, %v3461_v21  ;;  %v1001_v19 = vmul.u32 %v994_v0, %v985_v23 }
 0x10a   : > { %vm1003_vm2 = vc.u32 %v3464_v45, %v3454_v63  ;;  %v753_v34 = vor.u32 %v752_v27, %v751_v47  ;;  %v3491_v59 = vand.u32 31, %v3412_v20  ;;  %v1181_v9 = vshrl.u32 %v4638_v3, %v3467_v1 }
 0x10b   : > { %4643 = vst [vmem:[#allocation19_spill] sm:$0xff] %v3485_v26  ;;  %v1005_v50 = vsel %vm1003_vm2, %v1004_v56, %v3455_v62  ;;  %v757_v6 = vor.u32 4788187, %v756_v49  ;;  %v646_v30 = vsub.s32 32, %v3459_v17  ;;  %v2465_v58 = vadd.s32 4294967169, %v1794_v32 }
 0x10c   : > { %4644 = vst [vmem:[#allocation20_spill] sm:$0xff] %v3491_v59  ;;  %v1006_v2 = vadd.s32 %v1005_v50, %v1001_v19  ;;  %v3498_v38 = vshrl.u32 %v3390_v52, 5  ;;  %v1180_v0 = vshll.u32 %v4636_v43, %v3420_v54  ;;  %v651_v35 = vadd.s32 127, %v650_v25  ;;  %v1462_v25 = vpop.permute.xlu1 %1461 }
 0x10d   : > { %v1118_v57 = vclz %v2442_v10  ;;  %v630_v20 = vadd.s32 %v3185_v51, %v3182_v46  ;;  %v2422_v27 = vmin.u32 %v536_v4, %v3461_v21  ;;  %v1800_v62 = vadd.s32 1, %v2465_v58  ;;  %v1467_v46 = vpop.permute.xlu0 %1466 }
 0x10e   : > { %v1007_v23 = vadd.s32 536870912, %v1006_v2  ;;  %v760_v14 = vcvt.s32.f32 %v753_v34  ;;  %v3505_v47 = vor.u32 %v1181_v9, %v1180_v0  ;;  %v3509_v49 = vshll.u32 %v4638_v3, %v3420_v54 }
 0x10f   : > { %v3513_v52 = vshrl.u32 %v4639_v39, %v3467_v1  ;;  %v758_v10 = vand.u32 2147483647, %v757_v6  ;;  %v648_v56 = vshrl.u32 %v630_v20, %v646_v30  ;;  %vm1801_vm3 = vcmp.gt.s32.totalorder %v1800_v62, 0 }
 0x110   : > { %4645 = vst [vmem:[#allocation21_spill] sm:$0xff] %v3505_v47  ;;  %v3515_v32 = vshrl.u32 %v1007_v23, 30  ;;  %v647_v51 = vshll.u32 %v3320_v53, %v3459_v17  ;;  %v652_v4 = vshll.u32 %v651_v35, 23  ;;  %v2443_v19 = vadd.s32 4294967294, %v1118_v57 }
 0x111   : > { %v3520_v34 = vadd.f32 %v1467_v46, %v3383_v41  ;;  %v538_v9 = vclz %v2422_v27  ;;  %v4580_v50 = vand.u32 2147483647, %v3448_v42  ;;  %v1802_v58 = vsel %vm1801_vm3, %v1800_v62, 0 }
 0x112   : > { %4646 = vst [vmem:[#allocation22_spill] sm:$0xff] %v3515_v32  ;;  %v3524_v0 = vadd.f32 %v1462_v25, %v3416_v24  ;;  %v3527_v6 = vsub.s32 32, %v3491_v59  ;;  %vm1189_vm4 = vcmp.lt.s32.totalorder %v3498_v38, 4  ;;  %v1009_v53 = vshll.u32 %v3515_v32, 30 }
 0x113   : > { %4647 = vst [vmem:[#allocation23_spill] sm:$0xff] %v3520_v34  ;;  %v3533_v17 = vmul.f32 %v760_v14, %v758_v10  ;;  %v3538_v41 = vsel %vm1189_vm4, %v3505_v47, 920167782  ;;  %v3540_v35 = vor.u32 %v648_v56, %v647_v51  ;;  %v1804_v24 = vand.u32 31, %v1802_v58 }
 0x114   : > { %4648 = vst [vmem:[#allocation24_spill] sm:$0xff] %v3524_v0  ;;  %4649 = vst [vmem:[#allocation25_spill] sm:$0xff] %v3527_v6  ;;  %v3542_v57 = vor.u32 4788187, %v652_v4  ;;  %vm2444_vm5 = vcmp.lt.s32.totalorder %v2443_v19, 0  ;;  %v1689_v20 = vand.u32 2139095040, %v3520_v34  ;;  %v1442_v27 = vmul.f32 %v3265_v31, %v1424_v29 }
 0x115   : > { %4650 = vst [vmem:[#allocation26_spill] sm:$0xff] %v3538_v41  ;;  %v2423_v23 = vadd.s32 4294967294, %v538_v9  ;;  %v1797_v62 = vand.u32 8388607, %v4580_v50  ;;  %v1805_v14 = vsub.s32 32, %v1804_v24  ;;  %v1585_v25 = vand.u32 2139095040, %v3524_v0 }
 0x116   : > { %v3549_v10 = vsub.s32 %v1006_v2, %v1009_v53  ;;  %v1803_v46 = vshrl.u32 %v1802_v58, 5  ;;  %v1807_v56 = vshll.u32 %v4640_v13, %v1804_v24  ;;  %v1810_v51 = vshll.u32 %v4634_v40, %v1804_v24 }
 0x117   : > { %v1808_v4 = vshrl.u32 %v4634_v40, %v1805_v14  ;;  %v1811_v30 = vshrl.u32 %v4635_v15, %v1805_v14  ;;  %v1813_v31 = vshll.u32 %v4635_v15, %v1804_v24  ;;  %v1816_v29 = vshll.u32 %v4636_v43, %v1804_v24 }
 0x118   : > { %v1814_v9 = vshrl.u32 %v4636_v43, %v1805_v14  ;;  %v1817_v50 = vshrl.u32 %v4638_v3, %v1805_v14  ;;  %v1819_v2 = vshll.u32 %v4638_v3, %v1804_v24  ;;  %v1820_v58 = vshrl.u32 %v4639_v39, %v1805_v14 }
 0x119   : > { %v1798_v53 = vor.u32 8388608, %v1797_v62  ;;  %v1809_v34 = vor.u32 %v1808_v4, %v1807_v56  ;;  %v1812_v32 = vor.u32 %v1811_v30, %v1810_v51  ;;  %v1586_v41 = vshrl.u32 %v1585_v25, 23 }
 0x11a   : > { %v1815_v47 = vor.u32 %v1814_v9, %v1813_v31  ;;  %v1818_v1 = vor.u32 %v1817_v50, %v1816_v29  ;;  %v1821_v54 = vor.u32 %v1820_v58, %v1819_v2  ;;  %vm1822_vm6 = vcmp.lt.s32.totalorder %v1803_v46, 1 }
 0x11b   : > { %v1012_v26 = vsub.s32 0, %v3549_v10  ;;  %vm1824_vm7 = vcmp.lt.s32.totalorder %v1803_v46, 3  ;;  %vm1825_vm8 = vcmp.lt.s32.totalorder %v1803_v46, 4  ;;  %v1830_v59 = vsel %vm1822_vm6, %v1809_v34, %v1812_v32 }
 0x11c   : > { %v1827_v6 = vsel %vm1825_vm8, %v1815_v47, 2102212464  ;;  %v1831_v5 = vsel %vm1825_vm8, %v1818_v1, 920167782  ;;  %v1834_v24 = vsel %vm1822_vm6, %v1812_v32, %v1815_v47  ;;  %v1835_v61 = vsel %vm1825_vm8, %v1821_v54, 1326507024 }
 0x11d   : > { %v1806_v62 = vshrl.u32 %v4640_v13, %v1805_v14  ;;  %vm1823_vm9 = vcmp.lt.s32.totalorder %v1803_v46, 2  ;;  %v1832_v30 = vsel %vm1824_vm7, %v1815_v47, %v1831_v5  ;;  %v1836_v50 = vsel %vm1824_vm7, %v1818_v1, %v1835_v61 }
 0x11e   : > { %v3568_v25 = vsel %vm2444_vm5, 0, %v2443_v19  ;;  %v1833_v56 = vsel %vm1823_vm9, %v1830_v59, %v1832_v30  ;;  %v1837_v51 = vsel %vm1823_vm9, %v1834_v24, %v1836_v50  ;;  %v1838_v4 = vshll.u32 %v1798_v53, 8 }
 0x11f   : > { %v2438_v31 = vmin.u32 %v1012_v26, %v3549_v10  ;;  %v1690_v29 = vshrl.u32 %v1689_v20, 23  ;;  %v1826_v54 = vsel %vm1822_vm6, %v1806_v62, %v1809_v34  ;;  %v1828_v14 = vsel %vm1824_vm7, %v1812_v32, %v1827_v6  ;;  %v1457_v6 = vpop.permute.xlu1 %1456 }
 0x120   : > { %v3575_v9 = vmul.u32.u64.low %v1838_v4, %v1837_v51  ;;  %v3576_v2 = vmul.u32.u64.high %v1838_v4, %v1837_v51, %v3575_v9  ;;  %v3578_v5 = vmul.u32.u64.low %v1838_v4, %v1833_v56  ;;  %v3579_v61 = vmul.u32.u64.high %v1838_v4, %v1833_v56, %v3578_v5 }
 0x121   : > { %v1106_v1 = vadd.s32 %v3284_v18, %v3290_v55  ;;  %vm2424_vm10 = vcmp.lt.s32.totalorder %v2423_v23, 0  ;;  %v4598_v59 = vand.u32 2147483647, %v3524_v0  ;;  %v2457_v47 = vadd.s32 4294967169, %v1586_v41 }
 0x122   : > { %v654_v26 = vand.u32 2147483647, %v3542_v57  ;;  %v656_v19 = vcvt.s32.f32 %v3540_v35  ;;  %v1122_v32 = vsub.s32 32, %v3568_v25  ;;  %v1829_v34 = vsel %vm1823_vm9, %v1826_v54, %v1828_v14 }
 0x123   : > { %v1126_v20 = vsub.s32 4294967266, %v3568_v25  ;;  %v2461_v58 = vadd.s32 4294967169, %v1690_v29  ;;  %v1592_v53 = vadd.s32 1, %v2457_v47  ;;  %v1446_v24 = vadd.f32 %v1442_v27, %v3399_v7 }
 0x124   : > { %v3591_v18 = vsel %vm2424_vm10, 0, %v2423_v23  ;;  %v1014_v55 = vclz %v2438_v31  ;;  %vm1847_vm11 = vc.u32 %v3576_v2, %v3578_v5  ;;  %v1848_v41 = vadd.s32 1, %v3579_v61 }
 0x125   : > { %v1845_v35 = vmul.u32 %v1838_v4, %v1829_v34  ;;  %v1589_v57 = vand.u32 8388607, %v4598_v59  ;;  %vm1593_vm12 = vcmp.gt.s32.totalorder %v1592_v53, 0  ;;  %v3598_v46 = vadd.f32 %v1457_v6, %v1446_v24 }
 0x126   : > { %v3600_v62 = vmul.f32 %v656_v19, %v654_v26  ;;  %v3604_v7 = vadd.s32 %v3368_v44, %v3366_v12  ;;  %v1849_v27 = vsel %vm1847_vm11, %v1848_v41, %v3579_v61  ;;  %v1594_v23 = vsel %vm1593_vm12, %v1592_v53, 0 }
 0x127   : > { %4651 = vst [vmem:[#allocation27_spill] sm:$0xff] %v3598_v46  ;;  %v3609_v50 = vshrl.u32 %v1106_v1, %v1122_v32  ;;  %v1850_v56 = vadd.s32 %v1849_v27, %v1845_v35  ;;  %v1596_v51 = vand.u32 31, %v1594_v23  ;;  %v3611_v4 = vadd.s32 127, %v1126_v20 }
 0x128   : > { %v546_v31 = vsub.s32 4294967266, %v3591_v18  ;;  %v2439_v29 = vadd.s32 4294967294, %v1014_v55  ;;  %v3614_v54 = vadd.s32 1, %v2461_v58  ;;  %v1590_v12 = vor.u32 8388608, %v1589_v57 }
 0x129   : > { %v1851_v14 = vadd.s32 536870912, %v1850_v56  ;;  %v1597_v44 = vsub.s32 32, %v1596_v51  ;;  %v1481_v9 = vand.u32 2139095040, %v3598_v46  ;;  %v1595_v61 = vshrl.u32 %v1594_v23, 5 }
 0x12a   : > { %v1599_v47 = vshll.u32 %v4640_v13, %v1596_v51  ;;  %v1602_v1 = vshll.u32 %v4634_v40, %v1596_v51  ;;  %v1605_v26 = vshll.u32 %v4635_v15, %v1596_v51  ;;  %v1608_v34 = vshll.u32 %v4636_v43, %v1596_v51 }
 0x12b   : > { %v3620_v19 = vshrl.u32 %v1851_v14, 30  ;;  %v1600_v32 = vshrl.u32 %v4634_v40, %v1597_v44  ;;  %v1611_v6 = vshll.u32 %v4638_v3, %v1596_v51  ;;  %v1603_v20 = vshrl.u32 %v4635_v15, %v1597_v44 }
 0x12c   : > { %v1606_v58 = vshrl.u32 %v4636_v43, %v1597_v44  ;;  %v1609_v53 = vshrl.u32 %v4638_v3, %v1597_v44  ;;  %v1612_v24 = vshrl.u32 %v4639_v39, %v1597_v44  ;;  %vm2440_vm13 = vcmp.lt.s32.totalorder %v2439_v29, 0 }
 0x12d   : > { %4652 = vst [vmem:[#allocation28_spill] sm:$0xff] %v3620_v19  ;;  %v1853_v55 = vshll.u32 %v3620_v19, 30  ;;  %v1601_v41 = vor.u32 %v1600_v32, %v1599_v47  ;;  %v1482_v35 = vshrl.u32 %v1481_v9, 23  ;;  %v1604_v57 = vor.u32 %v1603_v20, %v1602_v1 }
 0x12e   : > { %v1607_v27 = vor.u32 %v1606_v58, %v1605_v26  ;;  %v1610_v23 = vor.u32 %v1609_v53, %v1608_v34  ;;  %v1613_v14 = vor.u32 %v1612_v24, %v1611_v6  ;;  %vm1614_vm14 = vcmp.lt.s32.totalorder %v1595_v61, 1 }
 0x12f   : > { %v3630_v59 = vsub.s32 %v1850_v56, %v1853_v55  ;;  %vm1617_vm15 = vcmp.lt.s32.totalorder %v1595_v61, 4  ;;  %v1630_v51 = vshll.u32 %v1590_v12, 8  ;;  %v1598_v30 = vshrl.u32 %v4640_v13, %v1597_v44 }
 0x130   : > { %vm1616_vm0 = vcmp.lt.s32.totalorder %v1595_v61, 3  ;;  %v1622_v0 = vsel %vm1614_vm14, %v1601_v41, %v1604_v57  ;;  %v1623_v42 = vsel %vm1617_vm15, %v1610_v23, 920167782  ;;  %vm1615_vm1 = vcmp.lt.s32.totalorder %v1595_v61, 2 }
 0x131   : > { %v1856_v16 = vsub.s32 0, %v3630_v59  ;;  %v1624_v9 = vsel %vm1616_vm0, %v1607_v27, %v1623_v42  ;;  %v1626_v47 = vsel %vm1614_vm14, %v1604_v57, %v1607_v27  ;;  %v1619_v1 = vsel %vm1617_vm15, %v1607_v27, 2102212464 }
 0x132   : > { %v1625_v56 = vsel %vm1615_vm1, %v1622_v0, %v1624_v9  ;;  %v1627_v26 = vsel %vm1617_vm15, %v1613_v14, 1326507024  ;;  %v2453_v32 = vadd.s32 4294967169, %v1482_v35  ;;  %v547_v20 = vadd.s32 127, %v546_v31 }
 0x133   : > { %v2466_v12 = vmin.u32 %v1856_v16, %v3630_v59  ;;  %v1628_v44 = vsel %vm1616_vm0, %v1610_v23, %v1627_v26  ;;  %v3640_v34 = vmul.u32.u64.low %v1630_v51, %v1625_v56  ;;  %v3641_v6 = vmul.u32.u64.high %v1630_v51, %v1625_v56, %v3640_v34 }
 0x134   : > { %v1618_v58 = vsel %vm1614_vm14, %v1598_v30, %v1601_v41  ;;  %v1629_v42 = vsel %vm1615_vm1, %v1626_v47, %v1628_v44  ;;  %v1488_v53 = vadd.s32 1, %v2453_v32  ;;  %v1620_v55 = vsel %vm1616_vm0, %v1604_v57, %v1619_v1 }
 0x135   : > { %4653 = vst [vmem:[#allocation29_spill] sm:$0xff] %v3640_v34  ;;  %v1858_v24 = vclz %v2466_v12  ;;  %v3647_v0 = vmul.u32.u64.low %v1630_v51, %v1629_v42  ;;  %v3648_v27 = vmul.u32.u64.high %v1630_v51, %v1629_v42, %v3647_v0  ;;  %v1128_v16 = vshll.u32 %v3611_v4, 23 }
 0x136   : > { %v3652_v35 = vsel %vm2440_vm13, 0, %v2439_v29  ;;  %vm1697_vm2 = vcmp.gt.s32.totalorder %v3614_v54, 0  ;;  %vm1489_vm3 = vcmp.gt.s32.totalorder %v1488_v53, 0  ;;  %v542_v31 = vsub.s32 32, %v3591_v18 }
 0x137   : > { %4654 = vst [vmem:[#allocation30_spill] sm:$0xff] %v3648_v27  ;;  %v2467_v30 = vadd.s32 4294967294, %v1858_v24  ;;  %v1640_v41 = vadd.s32 1, %v3641_v6  ;;  %v1490_v23 = vsel %vm1489_vm3, %v1488_v53, 0  ;;  %v4655_v57 = vshll.u32 %v3441_v36, %v3568_v25 }
 0x138   : > { %v548_v9 = vshll.u32 %v547_v20, 23  ;;  %v1621_v4 = vsel %vm1615_vm1, %v1618_v58, %v1620_v55  ;;  %v1492_v29 = vand.u32 31, %v1490_v23  ;;  %v1022_v47 = vsub.s32 4294967266, %v3652_v35 }
 0x139   : > { %v3661_v14 = vor.u32 %v3609_v50, %v4655_v57  ;;  %v3666_v1 = vsel %vm1697_vm2, %v3614_v54, 0  ;;  %vm1639_vm5 = vc.u32 %v3648_v27, %v3640_v34  ;;  %v4605_v56 = vand.u32 2147483647, %v3598_v46 }
 0x13a   : > { %v3671_v26 = vor.u32 4788187, %v1128_v16  ;;  %v1002_v36 = vadd.s32 %v3454_v63, %v3464_v45  ;;  %v1641_v25 = vsel %vm1639_vm5, %v1640_v41, %v3641_v6  ;;  %v3676_v50 = vsub.s32 32, %v1492_v29 }
 0x13b   : > { %v3681_v54 = vshrl.u32 %v3604_v7, %v542_v31  ;;  %vm2468_vm6 = vcmp.lt.s32.totalorder %v2467_v30, 0  ;;  %v1637_v32 = vmul.u32 %v1630_v51, %v1621_v4  ;;  %v3683_v12 = vor.u32 4788187, %v548_v9 }
 0x13c   : > { %v3686_v44 = vand.u32 31, %v3666_v1  ;;  %v1496_v63 = vshrl.u32 %v4634_v40, %v3676_v50  ;;  %v1499_v45 = vshrl.u32 %v4635_v15, %v3676_v50  ;;  %v1018_v6 = vsub.s32 32, %v3652_v35 }
 0x13d   : > { %v1023_v20 = vadd.s32 127, %v1022_v47  ;;  %v1642_v58 = vadd.s32 %v1641_v25, %v1637_v32  ;;  %v1485_v7 = vand.u32 8388607, %v4605_v56  ;;  %v3695_v42 = vsel %vm2468_vm6, 0, %v2467_v30 }
 0x13e   : > { %v1495_v51 = vshll.u32 %v4640_v13, %v1492_v29  ;;  %v1498_v53 = vshll.u32 %v4634_v40, %v1492_v29  ;;  %v1502_v24 = vshrl.u32 %v4636_v43, %v3676_v50  ;;  %v3701_v55 = vshrl.u32 %v1490_v23, 5 }
 0x13f   : > { %v1501_v0 = vshll.u32 %v4635_v15, %v1492_v29  ;;  %v1504_v16 = vshll.u32 %v4636_v43, %v1492_v29  ;;  %v1505_v31 = vshrl.u32 %v4638_v3, %v3676_v50  ;;  %v1507_v30 = vshll.u32 %v4638_v3, %v1492_v29 }
 0x140   : > { %v1497_v41 = vor.u32 %v1496_v63, %v1495_v51  ;;  %v3707_v57 = vor.u32 %v1499_v45, %v1498_v53  ;;  %v1508_v9 = vshrl.u32 %v4639_v39, %v3676_v50  ;;  %v1866_v4 = vsub.s32 4294967266, %v3695_v42 }
 0x141   : > { %v1643_v47 = vadd.s32 536870912, %v1642_v58  ;;  %v1503_v23 = vor.u32 %v1502_v24, %v1501_v0  ;;  %v1506_v25 = vor.u32 %v1505_v31, %v1504_v16  ;;  %v3715_v56 = vshrl.u32 %v1002_v36, %v1018_v6 }
 0x142   : > { %v1024_v61 = vshll.u32 %v1023_v20, 23  ;;  %v1509_v46 = vor.u32 %v1508_v9, %v1507_v30  ;;  %v1846_v63 = vadd.s32 %v3578_v5, %v3576_v2  ;;  %v1486_v45 = vor.u32 8388608, %v1485_v7 }
 0x143   : > { %vm1510_vm7 = vcmp.lt.s32.totalorder %v3701_v55, 1  ;;  %vm1513_vm8 = vcmp.lt.s32.totalorder %v3701_v55, 4  ;;  %v1862_v29 = vsub.s32 32, %v3695_v42  ;;  %vm1512_vm9 = vcmp.lt.s32.totalorder %v3701_v55, 3 }
 0x144   : > { %v1518_v51 = vsel %vm1510_vm7, %v1497_v41, %v3707_v57  ;;  %v1519_v36 = vsel %vm1513_vm8, %v1506_v25, 920167782  ;;  %v1867_v6 = vadd.s32 127, %v1866_v4  ;;  %v3728_v20 = vshrl.u32 %v1643_v47, 30 }
 0x145   : > { %v1520_v2 = vsel %vm1512_vm9, %v1503_v23, %v1519_v36  ;;  %v1522_v5 = vsel %vm1510_vm7, %v3707_v57, %v1503_v23  ;;  %vm1511_vm10 = vcmp.lt.s32.totalorder %v3701_v55, 2  ;;  %v1523_v7 = vsel %vm1513_vm8, %v1509_v46, 1326507024 }
 0x146   : > { %4656 = vst [vmem:[#allocation31_spill] sm:$0xff] %v3728_v20  ;;  %v800_v53 = vshrl.u32 %v4634_v40, %v3472_v28  ;;  %v802_v24 = vshll.u32 %v4634_v40, %v3403_v60  ;;  %v1521_v0 = vsel %vm1511_vm10, %v1518_v51, %v1520_v2  ;;  %v1524_v16 = vsel %vm1512_vm9, %v1506_v25, %v1523_v7 }
 0x147   : > { %v3746_v31 = vshll.u32 %v1486_v45, 8  ;;  %v803_v30 = vshrl.u32 %v4635_v15, %v3472_v28  ;;  %v1525_v46 = vsel %vm1511_vm10, %v1522_v5, %v1524_v16  ;;  %v805_v9 = vshll.u32 %v4635_v15, %v3403_v60 }
 0x148   : > { %v806_v4 = vshrl.u32 %v4636_v43, %v3472_v28  ;;  %v809_v47 = vshrl.u32 %v4638_v3, %v3472_v28  ;;  %v1864_v51 = vshrl.u32 %v1846_v63, %v1862_v29  ;;  %v1868_v36 = vshll.u32 %v1867_v6, 23 }
 0x149   : > { %v1645_v25 = vshll.u32 %v3728_v20, 30  ;;  %v808_v45 = vshll.u32 %v4636_v43, %v3403_v60  ;;  %v3762_v2 = vmul.u32.u64.low %v3746_v31, %v1521_v0  ;;  %v3763_v7 = vmul.u32.u64.high %v3746_v31, %v1521_v0, %v3762_v2 }
 0x14a   : > { %v811_v5 = vshll.u32 %v4638_v3, %v3403_v60  ;;  %v812_v16 = vshrl.u32 %v4639_v39, %v3472_v28  ;;  %v3771_v32 = vmul.u32.u64.low %v3746_v31, %v1525_v46  ;;  %v3772_v63 = vmul.u32.u64.high %v3746_v31, %v1525_v46, %v3771_v32 }
 0x14b   : > { %v801_v29 = vor.u32 %v800_v53, %v3479_v22  ;;  %v804_v6 = vor.u32 %v803_v30, %v802_v24  ;;  %v1863_v20 = vshll.u32 %v3630_v59, %v3695_v42  ;;  %v807_v19 = vor.u32 %v806_v4, %v805_v9 }
 0x14c   : > { %v810_v0 = vor.u32 %v809_v47, %v808_v45  ;;  %v813_v34 = vor.u32 %v812_v16, %v811_v5  ;;  %v3777_v27 = vor.u32 4788187, %v1024_v61  ;;  %v3779_v15 = vsub.s32 %v1642_v58, %v1645_v25 }
 0x14d   : > { %v1494_v60 = vshrl.u32 %v4640_v13, %v3676_v50  ;;  %v798_v46 = vshrl.u32 %v4640_v13, %v3472_v28  ;;  %v1865_v32 = vor.u32 %v1864_v51, %v1863_v20  ;;  %v1869_v40 = vor.u32 4788187, %v1868_v36 }
 0x14e   : > { %v1515_v22 = vsel %vm1513_vm8, %v1503_v23, 2102212464  ;;  %vm814_vm11 = vcmp.lt.s32.totalorder %v3401_v33, 1  ;;  %vm816_vm12 = vcmp.lt.s32.totalorder %v3401_v33, 3  ;;  %vm817_vm13 = vcmp.lt.s32.totalorder %v3401_v33, 4 }
 0x14f   : > { %v1514_v59 = vsel %vm1510_vm7, %v1494_v60, %v1497_v41  ;;  %v822_v50 = vsel %vm814_vm11, %v801_v29, %v804_v6  ;;  %v819_v61 = vsel %vm817_vm13, %v807_v19, 2102212464  ;;  %v823_v58 = vsel %vm817_vm13, %v810_v0, 920167782 }
 0x150   : > { %v826_v28 = vsel %vm814_vm11, %v804_v6, %v807_v19  ;;  %v827_v42 = vsel %vm817_vm13, %v813_v34, 1326507024  ;;  %v1648_v23 = vsub.s32 0, %v3779_v15  ;;  %v1516_v20 = vsel %vm1512_vm9, %v3707_v57, %v1515_v22 }
 0x151   : > { %vm815_vm14 = vcmp.lt.s32.totalorder %v3401_v33, 2  ;;  %v824_v41 = vsel %vm816_vm12, %v807_v19, %v823_v58  ;;  %v1536_v53 = vadd.s32 1, %v3763_v7  ;;  %v828_v30 = vsel %vm816_vm12, %v810_v0, %v827_v42 }
 0x152   : > { %v825_v24 = vsel %vm815_vm14, %v822_v50, %v824_v41  ;;  %v4657_v34 = vor.u32 8388608, %v3272_v11  ;;  %vm1535_vm15 = vc.u32 %v3772_v63, %v3762_v2  ;;  %v818_v57 = vsel %vm814_vm11, %v798_v46, %v801_v29 }
 0x153   : > { %v820_v19 = vsel %vm816_vm12, %v804_v6, %v819_v61  ;;  %v829_v4 = vsel %vm815_vm14, %v826_v28, %v828_v30  ;;  %v1130_v11 = vand.u32 2147483647, %v3671_v26  ;;  %v1132_v45 = vcvt.s32.f32 %v3661_v14  ;;  %v4661_v30 = vld [vmem:[#allocation10_spill] sm:$0xff] }
 0x154   : > { %v830_v9 = vshll.u32 %v4657_v34, 8  ;;  %v1870_v5 = vand.u32 2147483647, %v1869_v40  ;;  %v1517_v16 = vsel %vm1511_vm10, %v1514_v59, %v1516_v20  ;;  %v4658_v29 = vshll.u32 %v3461_v21, %v3591_v18 }
 0x155   : > { %v4659_v0 = vshll.u32 %v3549_v10, %v3652_v35  ;;  %v3838_v46 = vsub.s32 32, %v3686_v44  ;;  %v821_v14 = vsel %vm815_vm14, %v818_v57, %v820_v19  ;;  %vm680_vm0 = vcmp.lt.s32.totalorder %v3059_v48, 0 }
 0x156   : > { %v3818_v47 = vmul.u32.u64.low %v830_v9, %v829_v4  ;;  %v3819_v51 = vmul.u32.u64.high %v830_v9, %v829_v4, %v3818_v47  ;;  %v3821_v36 = vmul.u32.u64.low %v830_v9, %v825_v24  ;;  %v3822_v25 = vmul.u32.u64.high %v830_v9, %v825_v24, %v3821_v36 }
 0x157   : > { %v545_v6 = vor.u32 %v3681_v54, %v4658_v29  ;;  %v1021_v60 = vor.u32 %v3715_v56, %v4659_v0  ;;  %v550_v40 = vand.u32 2147483647, %v3683_v12  ;;  %v1872_v26 = vcvt.s32.f32 %v1865_v32 }
 0x158   : > { %v2458_v21 = vmin.u32 %v1648_v23, %v3779_v15  ;;  %v1537_v10 = vsel %vm1535_vm15, %v1536_v53, %v3763_v7  ;;  %vm576_vm1 = vcmp.lt.s32.totalorder %v3110_v37, 0  ;;  %v1026_v18 = vand.u32 2147483647, %v3777_v27 }
 0x159   : > { %v1533_v35 = vmul.u32 %v3746_v31, %v1517_v16  ;;  %vm839_vm2 = vc.u32 %v3819_v51, %v3821_v36  ;;  %v840_v33 = vadd.s32 1, %v3822_v25  ;;  %v4660_v56 = vor.u32 %v3513_v52, %v3509_v49  ;;  %v4663_v16 = vld [vmem:[#allocation13_spill] sm:$0xff] }
 0x15a   : > { %vm1052_vm3 = vcmp.lt.s32.totalorder %v3133_v8, 0  ;;  %v1133_v12 = vmul.f32 %v1132_v45, %v1130_v11  ;;  %v1873_v55 = vmul.f32 %v1872_v26, %v1870_v5  ;;  %v837_v7 = vmul.u32 %v830_v9, %v821_v14  ;;  %v4662_v5 = vld [vmem:[#allocation17_spill] sm:$0xff] }
 0x15b   : > { %v3860_v54 = vsel %vm1189_vm4, %v4660_v56, 1326507024  ;;  %v552_v27 = vcvt.s32.f32 %v545_v6  ;;  %v1028_v32 = vcvt.s32.f32 %v1021_v60  ;;  %v1538_v31 = vadd.s32 %v1537_v10, %v1533_v35  ;;  %v4668_v35 = vld [vmem:[#allocation9_spill] sm:$0xff]  ;;  %v1895_v60 = vld [vmem:[%s4544_s8 + $0x8] sm:$0xff] }
 0x15c   : > { %v841_v22 = vsel %vm839_vm2, %v840_v33, %v3822_v25  ;;  %v1713_v59 = vshrl.u32 %v4638_v3, %v3838_v46  ;;  %v1716_v49 = vshrl.u32 %v4639_v39, %v3838_v46  ;;  %v1650_v52 = vclz %v2458_v21 }
 0x15d   : > { %v842_v50 = vadd.s32 %v841_v22, %v837_v7  ;;  %v762_v61 = vxor.u32 2147483648, %v3533_v17  ;;  %v658_v58 = vxor.u32 2147483648, %v3600_v62  ;;  %v553_v28 = vmul.f32 %v552_v27, %v550_v40 }
 0x15e   : > { %v1029_v42 = vmul.f32 %v1028_v32, %v1026_v18  ;;  %v1712_v23 = vshll.u32 %v4636_v43, %v3686_v44  ;;  %v1715_v20 = vshll.u32 %v4638_v3, %v3686_v44  ;;  %v1874_v41 = vxor.u32 2147483648, %v1873_v55 }
 0x15f   : > { %v843_v53 = vadd.s32 536870912, %v842_v50  ;;  %v1134_v24 = vxor.u32 2147483648, %v1133_v12  ;;  %vm472_vm5 = vcmp.lt.s32.totalorder %v4661_v30, 0  ;;  %v3876_v34 = vshrl.u32 %v3666_v1, 5 }
 0x160   : > { %v1539_v9 = vadd.s32 536870912, %v1538_v31  ;;  %v3878_v57 = vor.u32 %v1713_v59, %v1712_v23  ;;  %v1717_v19 = vor.u32 %v1716_v49, %v1715_v20  ;;  %v2459_v4 = vadd.s32 4294967294, %v1650_v52  ;;  %v4672_v52 = vld [vmem:[#allocation7_spill] sm:$0xff] }
 0x161   : > { %v3880_v47 = vshrl.u32 %v843_v53, 30  ;;  %v763_v25 = vsel %vm680_vm0, %v762_v61, %v3533_v17  ;;  %v554_v11 = vxor.u32 2147483648, %v553_v28  ;;  %v1030_v45 = vxor.u32 2147483648, %v1029_v42 }
 0x162   : > { %vm1792_vm6 = vcmp.lt.s32.totalorder %v4662_v5, 0  ;;  %v3889_v1 = vsel %vm576_vm1, %v658_v58, %v3600_v62  ;;  %vm948_vm7 = vcmp.lt.s32.totalorder %v4663_v16, 0  ;;  %v3897_v0 = vsel %vm1052_vm3, %v1134_v24, %v1133_v12  ;;  %v4669_v12 = vld [vmem:[#allocation25_spill] sm:$0xff] }
 0x163   : > { %v1875_v29 = vsel %vm1792_vm6, %v1874_v41, %v1873_v55  ;;  %v845_v6 = vshll.u32 %v3880_v47, 30  ;;  %vm1721_vm8 = vcmp.lt.s32.totalorder %v3876_v34, 4  ;;  %v4664_v17 = vand.u32 2147483647, %v4662_v5 }
 0x164   : > { %v3906_v62 = vshrl.u32 %v1539_v9, 30  ;;  %v3911_v14 = vsel %vm1721_vm8, %v3878_v57, 920167782  ;;  %v3915_v40 = vsel %vm1721_vm8, %v1717_v19, 1326507024  ;;  %vm2460_vm10 = vcmp.lt.s32.totalorder %v2459_v4, 0 }
 0x165   : > { %vm3902_vm9 = vcmp.le.f32.partialorder %v4664_v17, 0.7853982  ;;  %v3917_v26 = vsub.s32 %v842_v50, %v845_v6  ;;  %v3921_v21 = vsel %vm472_vm5, %v554_v11, %v553_v28  ;;  %v3925_v10 = vsel %vm948_vm7, %v1030_v45, %v1029_v42  ;;  %v4673_v28 = vld [vmem:[#allocation20_spill] sm:$0xff] }
 0x166   : > { %4667 = vst [vmem:[#allocation10_spill] sm:$0xff] %v3906_v62  ;;  %v3930_v18 = vsel %vm3902_vm9, %v4662_v5, %v1875_v29  ;;  %v4616_v33 = vand.u32 2147483647, %v4668_v35  ;;  %v4670_v55 = vmov 2475754826   ;;  %v1285_v22 = vshrl.u32 %v4638_v3, %v4669_v12 }
 0x167   : > { %v848_v56 = vsub.s32 0, %v3917_v26  ;;  %v1276_v7 = vshrl.u32 %v4670_v55, %v4669_v12  ;;  %v4671_v27 = vmov 2131351028   ;;  %v3940_v59 = vsel %vm2460_vm10, 0, %v2459_v4 }
 0x168   : > { %v1279_v32 = vshrl.u32 %v4671_v27, %v4669_v12  ;;  %v1541_v49 = vshll.u32 %v3906_v62, 30  ;;  %v764_v50 = vsub.s32 4, %v4672_v52  ;;  %v1282_v61 = vshrl.u32 %v4636_v43, %v4669_v12 }
 0x169   : > { %v2434_v58 = vmin.u32 %v848_v56, %v3917_v26  ;;  %v1275_v42 = vshll.u32 %v4640_v13, %v4673_v28  ;;  %v1278_v23 = vshll.u32 %v4670_v55, %v4673_v28  ;;  %v1284_v20 = vshll.u32 %v4636_v43, %v4673_v28 }
 0x16a   : > { %v4674_v41 = vand.u32 2147483647, %v3059_v48  ;;  %v1265_v24 = vand.u32 8388607, %v4616_v33  ;;  %v1281_v9 = vshll.u32 %v4671_v27, %v4673_v28  ;;  %v1288_v19 = vshrl.u32 %v4639_v39, %v4669_v12 }
 0x16b   : > { %v850_v4 = vclz %v2434_v58  ;;  %v1277_v11 = vor.u32 %v1276_v7, %v1275_v42  ;;  %v1280_v45 = vor.u32 %v1279_v32, %v1278_v23  ;;  %v1286_v29 = vor.u32 %v1285_v22, %v1284_v20  ;;  %v4677_v7 = vld [vmem:[#allocation8_spill] sm:$0xff] }
 0x16c   : > { %vm3955_vm11 = vcmp.le.f32.partialorder %v4674_v41, 0.7853982  ;;  %v3965_v6 = vsub.s32 %v1538_v31, %v1541_v49  ;;  %v1283_v56 = vor.u32 %v1282_v61, %v1281_v9  ;;  %v1287_v41 = vshll.u32 %v4638_v3, %v4673_v28 }
 0x16d   : > { %v766_v17 = vsel %vm3955_vm11, %v3059_v48, %v763_v25  ;;  %v838_v33 = vadd.s32 %v3821_v36, %v3819_v51  ;;  %v2435_v62 = vadd.s32 4294967294, %v850_v4  ;;  %v765_v39 = vsel %vm680_vm0, %v764_v50, %v4672_v52  ;;  %v4678_v25 = vld [vmem:[#allocation19_spill] sm:$0xff] }
 0x16e   : > { %v1274_v31 = vshrl.u32 %v4640_v13, %v4669_v12  ;;  %vm784_vm12 = vcmp.lt.s32.totalorder %v4677_v7, 0  ;;  %v1266_v32 = vor.u32 8388608, %v1265_v24  ;;  %v1289_v22 = vor.u32 %v1288_v19, %v1287_v41 }
 0x16f   : > { %vm1290_vm13 = vcmp.lt.s32.totalorder %v4678_v25, 1  ;;  %vm1293_vm14 = vcmp.lt.s32.totalorder %v4678_v25, 4  ;;  %vm2436_vm15 = vcmp.lt.s32.totalorder %v2435_v62, 0  ;;  %vm1292_vm2 = vcmp.lt.s32.totalorder %v4678_v25, 3 }
 0x170   : > { %v1298_v3 = vsel %vm1290_vm13, %v1277_v11, %v1280_v45  ;;  %v1299_v51 = vsel %vm1293_vm14, %v1286_v29, 920167782  ;;  %v853_v36 = vsel %vm2436_vm15, 0, %v2435_v62  ;;  %v868_v49 = vsub.s32 4, %v3880_v47 }
 0x171   : > { %vm1291_vm0 = vcmp.lt.s32.totalorder %v4678_v25, 2  ;;  %v1300_v12 = vsel %vm1292_vm2, %v1283_v56, %v1299_v51  ;;  %v4679_v52 = vand.u32 2147483647, %v4677_v7  ;;  %v854_v61 = vsub.s32 32, %v853_v36 }
 0x172   : > { %v858_v58 = vsub.s32 4294967266, %v853_v36  ;;  %v1295_v28 = vsel %vm1293_vm14, %v1283_v56, 2102212464  ;;  %v1302_v42 = vsel %vm1290_vm13, %v1280_v45, %v1283_v56  ;;  %v1294_v62 = vsel %vm1290_vm13, %v1274_v31, %v1277_v11 }
 0x173   : > { %vm3991_vm10 = vcmp.le.f32.partialorder %v4679_v52, 0.7853982  ;;  %v1301_v23 = vsel %vm1291_vm0, %v1298_v3, %v1300_v12  ;;  %v1303_v20 = vsel %vm1293_vm14, %v1289_v22, 1326507024  ;;  %v1306_v24 = vshll.u32 %v1266_v32, 8 }
 0x174   : > { %v855_v9 = vshll.u32 %v3917_v26, %v853_v36  ;;  %v856_v19 = vshrl.u32 %v838_v33, %v854_v61  ;;  %v859_v4 = vadd.s32 127, %v858_v58  ;;  %v1304_v41 = vsel %vm1292_vm2, %v1286_v29, %v1303_v20  ;;  %v4682_v36 = vld [vmem:[#allocation11_spill] sm:$0xff]  ;;  %v4684_v20 = vld [vmem:[#allocation18_spill] sm:$0xff] }
 0x175   : > { %v1296_v51 = vsel %vm1292_vm2, %v1280_v45, %v1295_v28  ;;  %v1305_v11 = vsel %vm1291_vm0, %v1302_v42, %v1304_v41  ;;  %v4008_v56 = vmul.u32.u64.low %v1306_v24, %v1301_v23  ;;  %v4009_v31 = vmul.u32.u64.high %v1306_v24, %v1301_v23, %v4008_v56 }
 0x176   : > { %v1544_v22 = vsub.s32 0, %v3965_v6  ;;  %v857_v32 = vor.u32 %v856_v19, %v855_v9  ;;  %v860_v3 = vshll.u32 %v859_v4, 23  ;;  %v767_v26 = vsel %vm3955_vm11, 0, %v765_v39  ;;  %v4683_v39 = vld [vmem:[#allocation15_spill] sm:$0xff] }
 0x177   : > { %2681 = vcosq.f32 %v766_v17  ;;  %v4015_v33 = vmul.u32.u64.low %v1306_v24, %v1305_v11  ;;  %v4016_v29 = vmul.u32.u64.high %v1306_v24, %v1305_v11, %v4015_v33  ;;  %v1154_v45 = vand.u32 2147483647, %v4682_v36 }
 0x178   : > { %v861_v12 = vor.u32 4788187, %v860_v3  ;;  %v869_v52 = vsel %vm784_vm12, %v868_v49, %v3880_v47  ;;  %2683 = vsinq.f32 %v766_v17  ;;  %v1297_v61 = vsel %vm1291_vm0, %v1294_v62, %v1296_v51 }
 0x179   : > { %v864_v58 = vcvt.s32.f32 %v857_v32  ;;  %v1316_v28 = vadd.s32 1, %v4009_v31  ;;  %v1161_v53 = vand.u32 8388607, %v1154_v45  ;;  %v1171_v42 = vshll.u32 %v4640_v13, %v4683_v39 }
 0x17a   : > { %v862_v23 = vand.u32 2147483647, %v861_v12  ;;  %v1172_v9 = vshrl.u32 %v4670_v55, %v4684_v20  ;;  %v1174_v47 = vshll.u32 %v4670_v55, %v4683_v39  ;;  %v1175_v17 = vshrl.u32 %v4671_v27, %v4684_v20 }
 0x17b   : > { %v871_v25 = vsel %vm3991_vm10, 0, %v869_v52  ;;  %v771_v49 = vadd.s32 3, %v767_v26  ;;  %v1313_v62 = vmul.u32 %v1306_v24, %v1297_v61  ;;  %vm1315_vm11 = vc.u32 %v4016_v29, %v4008_v56 }
 0x17c   : > { %v865_v19 = vmul.f32 %v864_v58, %v862_v23  ;;  %v1317_v4 = vsel %vm1315_vm11, %v1316_v28, %v4009_v31  ;;  %v1173_v41 = vor.u32 %v1172_v9, %v1171_v42  ;;  %v1176_v51 = vor.u32 %v1175_v17, %v1174_v47  ;;  %v4685_v28 = vld [vmem:[#allocation21_spill] sm:$0xff]  ;;  %v4686_v9 = vld [vmem:[#allocation26_spill] sm:$0xff] }
 0x17d   : > { %v4041_v11 = vmin.u32 %v1544_v22, %v3965_v6  ;;  %v1318_v32 = vadd.s32 %v1317_v4, %v1313_v62  ;;  %v1177_v3 = vshll.u32 %v4671_v27, %v4683_v39  ;;  %v1178_v33 = vshrl.u32 %v4636_v43, %v4684_v20  ;;  %v4687_v62 = vld [vmem:[#allocation12_spill] sm:$0xff] }
 0x17e   : > { %v866_v26 = vxor.u32 2147483648, %v865_v19  ;;  %v875_v24 = vadd.s32 3, %v871_v25  ;;  %v1162_v12 = vor.u32 8388608, %v1161_v53  ;;  %vm1186_vm13 = vcmp.lt.s32.totalorder %v3498_v38, 1 }
 0x17f   : > { %v1319_v52 = vadd.s32 536870912, %v1318_v32  ;;  %v1179_v61 = vor.u32 %v1178_v33, %v1177_v3  ;;  %vm1188_vm14 = vcmp.lt.s32.totalorder %v3498_v38, 3  ;;  %v1194_v31 = vsel %vm1186_vm13, %v1173_v41, %v1176_v51 }
 0x180   : > { %v867_v22 = vsel %vm784_vm12, %v866_v26, %v865_v19  ;;  %v1170_v58 = vshrl.u32 %v4640_v13, %v4684_v20  ;;  %vm1187_vm15 = vcmp.lt.s32.totalorder %v3498_v38, 2  ;;  %v1200_v53 = vsel %vm1188_vm14, %v4685_v28, %v3860_v54 }
 0x181   : > { %v870_v39 = vsel %vm3991_vm10, %v4677_v7, %v867_v22  ;;  %v4063_v42 = vshrl.u32 %v1319_v52, 30  ;;  %v1191_v23 = vsel %vm1189_vm4, %v1179_v61, 2102212464  ;;  %v1196_v20 = vsel %vm1188_vm14, %v1179_v61, %v4686_v9 }
 0x182   : > { %2685 = vcosq.f32 %v870_v39  ;;  %v1197_v47 = vsel %vm1187_vm15, %v1194_v31, %v1196_v20  ;;  %v1198_v54 = vsel %vm1186_vm13, %v1176_v51, %v1179_v61  ;;  %v1202_v17 = vshll.u32 %v1162_v12, 8 }
 0x183   : > { %2687 = vsinq.f32 %v870_v39  ;;  %v1321_v50 = vshll.u32 %v4063_v42, 30  ;;  %v1190_v25 = vsel %vm1186_vm13, %v1170_v58, %v1173_v41  ;;  %v660_v19 = vsub.s32 4, %v4687_v62  ;;  %v4700_v58 = vld [vmem:[#allocation14_spill] sm:$0xff] }
 0x184   : > { %v2682_v4 = vpop.eup %2681  ;;  %v1192_v3 = vsel %vm1188_vm14, %v1176_v51, %v1191_v23  ;;  %v1201_v33 = vsel %vm1187_vm15, %v1198_v54, %v1200_v53  ;;  %v4082_v26 = vmul.u32.u64.low %v1202_v17, %v1197_v47  ;;  %v4083_v52 = vmul.u32.u64.high %v1202_v17, %v1197_v47, %v4082_v26 }
 0x185   : > { %v2684_v12 = vpop.eup %2683  ;;  %v4086_v61 = vsub.s32 %v1318_v32, %v1321_v50  ;;  %v4088_v31 = vmul.u32.u64.low %v1202_v17, %v1201_v33  ;;  %v4089_v22 = vmul.u32.u64.high %v1202_v17, %v1201_v33, %v4088_v31  ;;  %v4688_v41 = vand.u32 2147483647, %v3110_v37 }
 0x186   : > { %2689 = vsinq.f32 %v3930_v18  ;;  %v1658_v51 = vsub.s32 4294967266, %v3940_v59  ;;  %v772_v28 = vand.u32 3, %v771_v49  ;;  %v1193_v39 = vsel %vm1187_vm15, %v1190_v25, %v1192_v3 }
 0x187   : > { %vm4093_vm4 = vcmp.le.f32.partialorder %v4688_v41, 0.7853982  ;;  %v1324_v53 = vsub.s32 0, %v4086_v61  ;;  %v661_v23 = vsel %vm576_vm1, %v660_v19, %v4687_v62  ;;  %v775_v9 = vxor.u32 2147483648, %v2684_v12 }
 0x188   : > { %v662_v32 = vsel %vm4093_vm4, %v3110_v37, %v3889_v1  ;;  %v778_v20 = vxor.u32 2147483648, %v2682_v4  ;;  %v1212_v47 = vadd.s32 1, %v4083_v52  ;;  %v1546_v49 = vclz %v4041_v11 }
 0x189   : > { %2691 = vcosq.f32 %v662_v32  ;;  %v876_v54 = vand.u32 3, %v875_v24  ;;  %v2450_v1 = vmin.u32 %v1324_v53, %v4086_v61  ;;  %vm1211_vm12 = vc.u32 %v4089_v22, %v4082_v26 }
 0x18a   : > { %2693 = vsinq.f32 %v662_v32  ;;  %vm1260_vm2 = vcmp.lt.s32.totalorder %v4668_v35, 0  ;;  %v1209_v38 = vmul.u32 %v1202_v17, %v1193_v39  ;;  %v1213_v50 = vsel %vm1211_vm12, %v1212_v47, %v4083_v52 }
 0x18b   : > { %v663_v25 = vsel %vm4093_vm4, 0, %v661_v23  ;;  %vm773_vm1 = vcmp.lt.s32.totalorder %v772_v28, 2  ;;  %vm774_vm0 = vcmp.eq.s32.totalorder %v772_v28, 0  ;;  %vm777_vm10 = vcmp.eq.s32.totalorder %v772_v28, 2 }
 0x18c   : > { %v1326_v62 = vclz %v2450_v1  ;;  %vm874_vm11 = vweird.f32 %v4677_v7  ;;  %vm770_vm13 = vweird.f32 %v3059_v48  ;;  %v776_v11 = vsel %vm774_vm0, %v2682_v4, %v775_v9 }
 0x18d   : > { %v779_v24 = vsel %vm777_vm10, %v778_v20, %v2684_v12  ;;  %v1344_v19 = vsub.s32 4, %v4063_v42  ;;  %v1214_v3 = vadd.s32 %v1213_v50, %v1209_v38  ;;  %v4121_v33 = vadd.s32 4294967294, %v1546_v49  ;;  %v4694_v50 = vld [vmem:[#allocation16_spill] sm:$0xff] }
 0x18e   : > { %vm877_vm14 = vcmp.lt.s32.totalorder %v876_v54, 2  ;;  %v2451_v17 = vadd.s32 4294967294, %v1326_v62  ;;  %v667_v52 = vadd.s32 3, %v663_v25  ;;  %vm878_vm15 = vcmp.eq.s32.totalorder %v876_v54, 0 }
 0x18f   : > { %vm881_vm4 = vcmp.eq.s32.totalorder %v876_v54, 2  ;;  %v1215_v31 = vadd.s32 536870912, %v1214_v3  ;;  %v4691_v41 = vand.u32 2147483647, %v4661_v30  ;;  %v2686_v32 = vpop.eup %2685  ;;  %v780_v4 = vsel %vm773_vm1, %v776_v11, %v779_v24 }
 0x190   : > { %v1314_v12 = vadd.s32 %v4008_v56, %v4016_v29  ;;  %vm2452_vm0 = vcmp.lt.s32.totalorder %v2451_v17, 0  ;;  %v2688_v39 = vpop.eup %2687  ;;  %v882_v23 = vxor.u32 2147483648, %v2686_v32  ;;  %v1345_v20 = vsel %vm1260_vm2, %v1344_v19, %v4063_v42 }
 0x191   : > { %vm4125_vm12 = vcmp.le.f32.partialorder %v4691_v41, 0.7853982  ;;  %v1329_v9 = vsel %vm2452_vm0, 0, %v2451_v17  ;;  %v4139_v47 = vshrl.u32 %v1215_v31, 30  ;;  %v879_v28 = vxor.u32 2147483648, %v2688_v39  ;;  %v1898_v31 = vld [vmem:[%s4545_s9] sm:$0xff] }
 0x192   : > { %v558_v53 = vsel %vm4125_vm12, %v4661_v30, %v3921_v21  ;;  %v1330_v49 = vsub.s32 32, %v1329_v9  ;;  %v1334_v1 = vsub.s32 4294967266, %v1329_v9  ;;  %v668_v38 = vand.u32 3, %v667_v52 }
 0x193   : > { %v883_v56 = vsel %vm881_vm4, %v882_v23, %v2688_v39  ;;  %v1217_v29 = vshll.u32 %v4139_v47, 30  ;;  %v556_v25 = vsub.s32 4, %v4694_v50  ;;  %2695 = vcosq.f32 %v558_v53  ;;  %v4144_v21 = vpop.eup %2689 }
 0x194   : > { %v880_v62 = vsel %vm878_vm15, %v2686_v32, %v879_v28  ;;  %v1331_v11 = vshll.u32 %v4086_v61, %v1329_v9  ;;  %v1332_v42 = vshrl.u32 %v1314_v12, %v1330_v49  ;;  %v1335_v24 = vadd.s32 127, %v1334_v1 }
 0x195   : > { %vm2456_vm1 = vcmp.lt.s32.totalorder %v4121_v33, 0  ;;  %v884_v17 = vsel %vm877_vm14, %v880_v62, %v883_v56  ;;  %v4695_v52 = vand.u32 2147483647, %v4668_v35  ;;  %v4156_v41 = vsub.s32 %v1214_v3, %v1217_v29 }
 0x196   : > { %v2692_v19 = vpop.eup %2691  ;;  %v885_v32 = vsel %vm874_vm11, nan, %v884_v17  ;;  %v781_v61 = vsel %vm770_vm13, nan, %v780_v4  ;;  %v1333_v12 = vor.u32 %v1332_v42, %v1331_v11  ;;  %v1336_v23 = vshll.u32 %v1335_v24, 23 }
 0x197   : > { %vm4152_vm10 = vcmp.le.f32.partialorder %v4695_v52, 0.7853982  ;;  %v2694_v39 = vpop.eup %2693  ;;  %2526 = vmatprep.subr.mxu1 %v885_v32  ;;  %v1220_v9 = vsub.s32 0, %v4156_v41  ;;  %v674_v49 = vxor.u32 2147483648, %v2692_v19  ;;  %vm670_vm14 = vcmp.eq.s32.totalorder %v668_v38, 0 }
 0x198   : > { %v1347_v54 = vsel %vm4152_vm10, 0, %v1345_v20  ;;  %v671_v28 = vxor.u32 2147483648, %v2694_v39  ;;  %2527 = vmatpush3.msra.mxu1 %v885_v32  ;;  %v1337_v3 = vor.u32 4788187, %v1336_v23  ;;  %vm673_vm15 = vcmp.eq.s32.totalorder %v668_v38, 2 }
 0x199   : > { %v557_v7 = vsel %vm472_vm5, %v556_v25, %v4694_v50  ;;  %2528 = vmatprep.subr.mxu1 %v781_v61  ;;  %v2446_v48 = vmin.u32 %v1220_v9, %v4156_v41  ;;  %vm669_vm11 = vcmp.lt.s32.totalorder %v668_v38, 2  ;;  %v675_v1 = vsel %vm673_vm15, %v674_v49, %v2694_v39  ;;  %v4698_v50 = vld [vmem:[#allocation30_spill] sm:$0xff]  ;;  %v4699_v25 = vld [vmem:[#allocation29_spill] sm:$0xff] }
 0x19a   : > { %v672_v4 = vsel %vm670_vm14, %v2692_v19, %v671_v28  ;;  %2529 = vmatpush3.msra.mxu1 %v781_v61  ;;  %v1338_v20 = vand.u32 2147483647, %v1337_v3  ;;  %v1340_v56 = vcvt.s32.f32 %v1333_v12  ;;  %2697 = vsinq.f32 %v558_v53 }
 0x19b   : > { %v676_v29 = vsel %vm669_vm11, %v672_v4, %v675_v1  ;;  %v1351_v62 = vadd.s32 3, %v1347_v54  ;;  %v1222_v11 = vclz %v2446_v48  ;;  %vm666_vm13 = vweird.f32 %v3110_v37  ;;  %v4706_v4 = vld [vmem:[#allocation22_spill] sm:$0xff] }
 0x19c   : > { %v559_v42 = vsel %vm4125_vm12, 0, %v557_v7  ;;  %2699 = vcosq.f32 %v3930_v18  ;;  %v4175_v24 = vadd.s32 %v4699_v25, %v4698_v50  ;;  %v1341_v38 = vmul.f32 %v1340_v56, %v1338_v20  ;;  %v1894_v1 = vld [vmem:[%s4544_s8] sm:$0xff] }
 0x19d   : > { %v677_v19 = vsel %vm666_vm13, nan, %v676_v29  ;;  %v4179_v17 = vadd.s32 127, %v1658_v51  ;;  %v4184_v53 = vsel %vm2456_vm1, 0, %v4121_v33  ;;  %v2447_v37 = vadd.s32 4294967294, %v1222_v11 }
 0x19e   : > { %2530 = vmatprep.subr.mxu1 %v677_v19  ;;  %v1136_v52 = vsub.s32 4, %v4700_v58  ;;  %v1342_v18 = vxor.u32 2147483648, %v1341_v38  ;;  %vm1156_vm5 = vcmp.lt.s32.totalorder %v4682_v36, 0  ;;  %v1240_v39 = vsub.s32 4, %v4139_v47 }
 0x19f   : > { %2531 = vmatpush3.msra.mxu1 %v677_v19  ;;  %v563_v32 = vadd.s32 3, %v559_v42  ;;  %v4189_v61 = vand.u32 3, %v1351_v62  ;;  %vm4193_vm4 = vcmp.le.f32.partialorder %v1154_v45, 0.7853982  ;;  %vm2448_vm12 = vcmp.lt.s32.totalorder %v2447_v37, 0  ;;  %v4710_v19 = vld [vmem:[#allocation28_spill] sm:$0xff] }
 0x1a0   : > { %v4703_v33 = vand.u32 2147483647, %v3133_v8  ;;  %v2696_v23 = vpop.eup %2695  ;;  %v1343_v54 = vsel %vm1260_vm2, %v1342_v18, %v1341_v38  ;;  %v1210_v9 = vadd.s32 %v4082_v26, %v4089_v22  ;;  %v1225_v28 = vsel %vm2448_vm12, 0, %v2447_v37 }
 0x1a1   : > { %v1346_v49 = vsel %vm4152_vm10, %v4668_v35, %v1343_v54  ;;  %v1226_v3 = vsub.s32 32, %v1225_v28  ;;  %v1230_v7 = vsub.s32 4294967266, %v1225_v28  ;;  %v4217_v48 = vsel %vm1052_vm3, %v1136_v52, %v4700_v58 }
 0x1a2   : > { %vm4199_vm0 = vcmp.le.f32.partialorder %v4703_v33, 0.7853982  ;;  %2701 = vcosq.f32 %v1346_v49  ;;  %v4222_v26 = vsel %vm1156_vm5, %v1240_v39, %v4139_v47  ;;  %v564_v22 = vand.u32 3, %v563_v32 }
 0x1a3   : > { %v1138_v45 = vsel %vm4199_vm0, %v3133_v8, %v3897_v0  ;;  %v1032_v0 = vsub.s32 4, %v4706_v4  ;;  %2703 = vsinq.f32 %v1346_v49  ;;  %v1227_v20 = vshll.u32 %v4156_v41, %v1225_v28  ;;  %v4711_v28 = vld [vmem:[#allocation23_spill] sm:$0xff] }
 0x1a4   : > { %v1228_v56 = vshrl.u32 %v1210_v9, %v1226_v3  ;;  %v1231_v29 = vadd.s32 127, %v1230_v7  ;;  %v1139_v47 = vsel %vm4199_vm0, 0, %v4217_v48  ;;  %2705 = vcosq.f32 %v1138_v45 }
 0x1a5   : > { %v570_v62 = vxor.u32 2147483648, %v2696_v23  ;;  %vm1902_vm3 = vcmask 261120   ;;  %2707 = vsinq.f32 %v1138_v45  ;;  %v4707_v50 = vand.u32 2147483647, %v4663_v16 }
 0x1a6   : > { %v1229_v11 = vor.u32 %v1228_v56, %v1227_v20  ;;  %v1232_v42 = vshll.u32 %v1231_v29, 23  ;;  %2520 = vmatprep.mubr.msk.f32.mxu0 %vm1902_vm3, %v1898_v31  ;;  %2534 = vmatprep.mubr.msk.f32.mxu1 %vm1902_vm3, %v1894_v1  ;;  %v1243_v41 = vsel %vm4193_vm4, 0, %v4222_v26  ;;  %vm562_vm1 = vweird.f32 %v4661_v30 }
 0x1a7   : > { %vm4237_vm2 = vcmp.le.f32.partialorder %v4707_v50, 0.7853982  ;;  %v1876_v37 = vsub.s32 4, %v4710_v19  ;;  %v2698_v58 = vpop.eup %2697  ;;  %vm565_vm10 = vcmp.lt.s32.totalorder %v564_v22, 2  ;;  %vm569_vm14 = vcmp.eq.s32.totalorder %v564_v22, 2 }
 0x1a8   : > { %v1034_v38 = vsel %vm4237_vm2, %v4663_v16, %v3925_v10  ;;  %v1233_v52 = vor.u32 4788187, %v1232_v42  ;;  %v4255_v18 = vsel %vm948_vm7, %v1032_v0, %v4706_v4  ;;  %vm566_vm15 = vcmp.eq.s32.totalorder %v564_v22, 0 }
 0x1a9   : > { %v567_v39 = vxor.u32 2147483648, %v2698_v58  ;;  %v571_v32 = vsel %vm569_vm14, %v570_v62, %v2698_v58  ;;  %v1877_v33 = vsel %vm1792_vm6, %v1876_v37, %v4710_v19  ;;  %v2700_v54 = vpop.eup %2699  ;;  %vm1357_vm11 = vcmp.eq.s32.totalorder %v4189_v61, 2 }
 0x1aa   : > { %v1234_v10 = vand.u32 2147483647, %v1233_v52  ;;  %v1236_v9 = vcvt.s32.f32 %v1229_v11  ;;  %2709 = vcosq.f32 %v1034_v38  ;;  %v1686_v45 = vand.u32 2147483647, %v4711_v28  ;;  %v1896_v11 = vld [vmem:[%s4544_s8 + $0x10] sm:$0xff] }
 0x1ab   : > { %v568_v49 = vsel %vm566_vm15, %v2696_v23, %v567_v39  ;;  %2711 = vsinq.f32 %v1034_v38  ;;  %v1879_v3 = vsel %vm3902_vm9, 0, %v1877_v33  ;;  %vm1882_vm7 = vweird.f32 %v4662_v5 }
 0x1ac   : > { %vm1353_vm13 = vcmp.lt.s32.totalorder %v4189_v61, 2  ;;  %v1237_v7 = vmul.f32 %v1236_v9, %v1234_v10  ;;  %v572_v4 = vsel %vm565_vm10, %v568_v49, %v571_v32  ;;  %v1883_v0 = vadd.s32 3, %v1879_v3  ;;  %v2099_v49 = vld [vmem:[%s4546_s10 + $0x10] sm:$0xff] }
 0x1ad   : > { %v1887_v31 = vxor.u32 2147483648, %v4144_v21  ;;  %vm1350_vm6 = vweird.f32 %v4668_v35  ;;  %v573_v1 = vsel %vm562_vm1, nan, %v572_v4  ;;  %v1890_v23 = vxor.u32 2147483648, %v2700_v54 }
 0x1ae   : > { %v1703_v20 = vshll.u32 %v4640_v13, %v3686_v44  ;;  %v1704_v22 = vshrl.u32 %v4670_v55, %v3838_v46  ;;  %v1238_v56 = vxor.u32 2147483648, %v1237_v7  ;;  %2532 = vmatprep.subr.mxu1 %v573_v1  ;;  %v1884_v29 = vand.u32 3, %v1883_v0 }
 0x1af   : > { %v4280_v62 = vand.u32 8388607, %v1686_v45  ;;  %v1707_v30 = vshrl.u32 %v4671_v27, %v3838_v46  ;;  %2533 = vmatpush3.msra.mxu1 %v573_v1  ;;  %v1706_v50 = vshll.u32 %v4670_v55, %v3686_v44  ;;  %v1709_v38 = vshll.u32 %v4671_v27, %v3686_v44  ;;  %v2702_v37 = vpop.eup %2701 }
 0x1b0   : > { %v4287_v42 = vor.u32 %v1704_v22, %v1703_v20  ;;  %v1710_v19 = vshrl.u32 %v4636_v43, %v3838_v46  ;;  %v1239_v58 = vsel %vm1156_vm5, %v1238_v56, %v1237_v7  ;;  %vm1885_vm9 = vcmp.lt.s32.totalorder %v1884_v29, 2  ;;  %2535 = vmatmul.mubr.msk.f32.vlgmr.msra.gmra.mxu1 %vm1902_vm3, %v1895_v60  ;;  %v2704_v52 = vpop.eup %2703  ;;  %v1897_v43 = vld [vmem:[%s4544_s8 + $0x18] sm:$0xff] }
 0x1b1   : > { %vm1886_vm12 = vcmp.eq.s32.totalorder %v1884_v29, 0  ;;  %vm1889_vm1 = vcmp.eq.s32.totalorder %v1884_v29, 2  ;;  %v1358_v39 = vxor.u32 2147483648, %v2702_v37  ;;  %v1242_v55 = vsel %vm4193_vm4, %v4682_v36, %v1239_v58  ;;  %2537 = vmatprep.mubr.msk.f32.mxu1 %vm1902_vm3, %v1896_v11  ;;  %v4306_v27 = vpop.eup %2705 }
 0x1b2   : > { %v1888_v32 = vsel %vm1886_vm12, %v2700_v54, %v1887_v31  ;;  %v1891_v44 = vsel %vm1889_vm1, %v1890_v23, %v4144_v21  ;;  %v1355_v33 = vxor.u32 2147483648, %v2704_v52  ;;  %2713 = vcosq.f32 %v1242_v55  ;;  %v2708_v3 = vpop.eup %2707 }
 0x1b3   : > { %v1892_v10 = vsel %vm1885_vm9, %v1888_v32, %v1891_v44  ;;  %v1708_v9 = vor.u32 %v1707_v30, %v1706_v50  ;;  %vm1354_vm5 = vcmp.eq.s32.totalorder %v4189_v61, 0  ;;  %v1359_v21 = vsel %vm1357_vm11, %v1358_v39, %v2704_v52 }
 0x1b4   : > { %2715 = vsinq.f32 %v1242_v55  ;;  %v4316_v54 = vsel %vm1882_vm7, nan, %v1892_v10  ;;  %v1356_v7 = vsel %vm1354_vm5, %v2702_v37, %v1355_v33  ;;  %v1247_v4 = vadd.s32 3, %v1243_v41  ;;  %2538 = vmatmul.mubr.msk.f32.gmra.mxu1 %vm1902_vm3, %v1897_v43 }
 0x1b5   : > { %v1143_v0 = vadd.s32 3, %v1139_v47  ;;  %2554 = vmatprep.subr.mxu1 %v4316_v54  ;;  %v1711_v31 = vor.u32 %v1710_v19, %v1709_v38  ;;  %v1360_v5 = vsel %vm1353_vm13, %v1356_v7, %v1359_v21  ;;  %v1035_v51 = vsel %vm4237_vm2, 0, %v4255_v18  ;;  %2551 = vmatprep.mubr.msk.f32.mxu1 %vm1902_vm3, %v2099_v49 }
 0x1b6   : > { %2558 = vmatpush3.msra.mxu1 %v4316_v54  ;;  %v1694_v26 = vor.u32 8388608, %v4280_v62  ;;  %vm1718_vm4 = vcmp.lt.s32.totalorder %v3876_v34, 1  ;;  %v1554_v12 = vsub.s32 4294967266, %v4184_v53  ;;  %v1361_v48 = vsel %vm1350_vm6, nan, %v1360_v5 }
 0x1b7   : > { %vm1720_vm0 = vcmp.lt.s32.totalorder %v3876_v34, 3  ;;  %v1726_v61 = vsel %vm1718_vm4, %v4287_v42, %v1708_v9  ;;  %v2710_v47 = vpop.eup %2709  ;;  %2512 = vmatprep.subr.mxu0 %v1361_v48  ;;  %vm1719_vm2 = vcmp.lt.s32.totalorder %v3876_v34, 2  ;;  %v1723_v25 = vsel %vm1721_vm8, %v1711_v31, 2102212464 }
 0x1b8   : > { %v1728_v41 = vsel %vm1720_vm0, %v1711_v31, %v3911_v14  ;;  %v1730_v35 = vsel %vm1718_vm4, %v1708_v9, %v1711_v31  ;;  %v2712_v18 = vpop.eup %2711  ;;  %2513 = vmatpush3.msra.mxu0 %v1361_v48  ;;  %v1039_v1 = vadd.s32 3, %v1035_v51  ;;  %v1702_v23 = vshrl.u32 %v4640_v13, %v3838_v46 }
 0x1b9   : > { %v1729_v60 = vsel %vm1719_vm2, %v1726_v61, %v1728_v41  ;;  %v1732_v20 = vsel %vm1720_vm0, %v3878_v57, %v3915_v40  ;;  %v1248_v22 = vand.u32 3, %v1247_v4  ;;  %v1144_v56 = vand.u32 3, %v1143_v0 }
 0x1ba   : > { %v1733_v14 = vsel %vm1719_vm2, %v1730_v35, %v1732_v20  ;;  %v1734_v29 = vshll.u32 %v1694_v26, 8  ;;  %v1147_v62 = vxor.u32 2147483648, %v2708_v3  ;;  %v1150_v30 = vxor.u32 2147483648, %v4306_v27 }
 0x1bb   : > { %v1722_v13 = vsel %vm1718_vm4, %v1702_v23, %v4287_v42  ;;  %v1724_v46 = vsel %vm1720_vm0, %v1708_v9, %v1723_v25  ;;  %v1654_v38 = vsub.s32 32, %v3940_v59  ;;  %v1660_v19 = vshll.u32 %v4179_v17, 23 }
 0x1bc   : > { %v4368_v11 = vmul.u32.u64.low %v1734_v29, %v1733_v14  ;;  %v4369_v50 = vmul.u32.u64.high %v1734_v29, %v1733_v14, %v4368_v11  ;;  %v4371_v57 = vmul.u32.u64.low %v1734_v29, %v1729_v60  ;;  %v4372_v40 = vmul.u32.u64.high %v1734_v29, %v1729_v60, %v4371_v57 }
 0x1bd   : > { %v1550_v37 = vsub.s32 32, %v4184_v53  ;;  %v1040_v58 = vand.u32 3, %v1039_v1  ;;  %v1555_v52 = vadd.s32 127, %v1554_v12  ;;  %v1043_v39 = vxor.u32 2147483648, %v2712_v18 }
 0x1be   : > { %v1046_v42 = vxor.u32 2147483648, %v2710_v47  ;;  %v1725_v55 = vsel %vm1719_vm2, %v1722_v13, %v1724_v46  ;;  %vm1253_vm8 = vcmp.eq.s32.totalorder %v1248_v22, 2  ;;  %vm1145_vm10 = vcmp.lt.s32.totalorder %v1144_v56, 2 }
 0x1bf   : > { %vm1146_vm14 = vcmp.eq.s32.totalorder %v1144_v56, 0  ;;  %vm1149_vm15 = vcmp.eq.s32.totalorder %v1144_v56, 2  ;;  %v2714_v32 = vpop.eup %2713  ;;  %vm1743_vm11 = vc.u32 %v4369_v50, %v4371_v57  ;;  %v1744_v17 = vadd.s32 1, %v4372_v40  ;;  %v2097_v56 = vld [vmem:[%s4546_s10] sm:$0xff] }
 0x1c0   : > { %v1148_v44 = vsel %vm1146_vm14, %v4306_v27, %v1147_v62  ;;  %v1151_v43 = vsel %vm1149_vm15, %v1150_v30, %v2708_v3  ;;  %v1254_v10 = vxor.u32 2147483648, %v2714_v32  ;;  %vm1042_vm7 = vcmp.eq.s32.totalorder %v1040_v58, 0 }
 0x1c1   : > { %v2716_v33 = vpop.eup %2715  ;;  %vm1045_vm13 = vcmp.eq.s32.totalorder %v1040_v58, 2  ;;  %v1741_v9 = vmul.u32 %v1734_v29, %v1725_v55  ;;  %v1044_v49 = vsel %vm1042_vm7, %v2710_v47, %v1043_v39  ;;  %v1745_v7 = vsel %vm1743_vm11, %v1744_v17, %v4372_v40  ;;  %v4713_v55 = vld [vmem:[#allocation27_spill] sm:$0xff] }
 0x1c2   : > { %v1251_v34 = vxor.u32 2147483648, %v2716_v33  ;;  %v1047_v21 = vsel %vm1045_vm13, %v1046_v42, %v2712_v18  ;;  %vm1250_vm6 = vcmp.eq.s32.totalorder %v1248_v22, 0  ;;  %v1255_v4 = vsel %vm1253_vm8, %v1254_v10, %v2716_v33 }
 0x1c3   : > { %v1152_v27 = vsel %vm1145_vm10, %v1148_v44, %v1151_v43  ;;  %v1746_v3 = vadd.s32 %v1745_v7, %v1741_v9  ;;  %vm1246_vm9 = vweird.f32 %v4682_v36  ;;  %vm1249_vm12 = vcmp.lt.s32.totalorder %v1248_v22, 2 }
 0x1c4   : > { %v1252_v0 = vsel %vm1250_vm6, %v2714_v32, %v1251_v34  ;;  %vm1041_vm1 = vcmp.lt.s32.totalorder %v1040_v58, 2  ;;  %vm1142_vm5 = vweird.f32 %v3133_v8  ;;  %v1534_v26 = vadd.s32 %v3762_v2, %v3772_v63  ;;  %v1899_v63 = vld [vmem:[%s4545_s9 + $0x8] sm:$0xff] }
 0x1c5   : > { %v1256_v31 = vsel %vm1249_vm12, %v1252_v0, %v1255_v4  ;;  %v1048_v5 = vsel %vm1041_vm1, %v1044_v49, %v1047_v21  ;;  %v1747_v51 = vadd.s32 536870912, %v1746_v3  ;;  %v1153_v48 = vsel %vm1142_vm5, nan, %v1152_v27  ;;  %v4720_v4 = vld [vmem:[#allocation31_spill] sm:$0xff]  ;;  %v4721_v0 = vld [vmem:[#allocation10_spill] sm:$0xff] }
 0x1c6   : > { %v1257_v12 = vsel %vm1246_vm9, nan, %v1256_v31  ;;  %v1656_v61 = vshrl.u32 %v4175_v24, %v1654_v38  ;;  %v1556_v47 = vshll.u32 %v1555_v52, 23  ;;  %vm1038_vm4 = vweird.f32 %v4663_v16 }
 0x1c7   : > { %2514 = vmatprep.subr.mxu0 %v1257_v12  ;;  %v4393_v36 = vshrl.u32 %v1747_v51, 30  ;;  %v1049_v25 = vsel %vm1038_vm4, nan, %v1048_v5  ;;  %v1655_v8 = vshll.u32 %v3779_v15, %v3940_v59  ;;  %v1661_v41 = vor.u32 4788187, %v1660_v19  ;;  %v1900_v15 = vld [vmem:[%s4545_s9 + $0x10] sm:$0xff] }
 0x1c8   : > { %2515 = vmatpush3.msra.mxu0 %v1257_v12  ;;  %v1552_v35 = vshrl.u32 %v1534_v26, %v1550_v37  ;;  %v1551_v16 = vshll.u32 %v3965_v6, %v4184_v53  ;;  %v1557_v18 = vor.u32 4788187, %v1556_v47  ;;  %v1901_v6 = vld [vmem:[%s4545_s9 + $0x18] sm:$0xff]  ;;  %v1742_v40 = vadd.s32 %v4371_v57, %v4369_v50  ;;  %v4712_v37 = vld [vmem:[#allocation24_spill] sm:$0xff] }
 0x1c9   : > { %2516 = vmatprep.subr.mxu0 %v1153_v48  ;;  %v1749_v2 = vshll.u32 %v4393_v36, 30  ;;  %v1657_v24 = vor.u32 %v1656_v61, %v1655_v8  ;;  %v1662_v59 = vand.u32 2147483647, %v1661_v41  ;;  %vm1584_vm2 = vcmp.lt.s32.totalorder %v4712_v37, 0 }
 0x1ca   : > { %2517 = vmatpush3.msra.mxu0 %v1153_v48  ;;  %v1553_v23 = vor.u32 %v1552_v35, %v1551_v16  ;;  %v1558_v20 = vand.u32 2147483647, %v1557_v18  ;;  %vm1480_vm8 = vcmp.lt.s32.totalorder %v4713_v55, 0  ;;  %v4714_v32 = vand.u32 2147483647, %v4712_v37 }
 0x1cb   : > { %2518 = vmatprep.subr.mxu0 %v1049_v25  ;;  %v1750_v1 = vsub.s32 %v1746_v3, %v1749_v2  ;;  %v1664_v53 = vcvt.s32.f32 %v1657_v24  ;;  %v4717_v33 = vand.u32 2147483647, %v4713_v55  ;;  %v1668_v27 = vsub.s32 4, %v4720_v4 }
 0x1cc   : > { %2519 = vmatpush3.msra.mxu0 %v1049_v25  ;;  %v1560_v29 = vcvt.s32.f32 %v1553_v23  ;;  %vm4426_vm10 = vcmp.le.f32.partialorder %v4714_v32, 0.7853982  ;;  %v1564_v31 = vsub.s32 4, %v4721_v0  ;;  %vm1688_vm15 = vcmp.lt.s32.totalorder %v4711_v28, 0 }
 0x1cd   : > { %2540 = vmatprep.subr.mxu0 %v4316_v54  ;;  %2521 = vmatmul.mubr.msk.f32.vlgmr.msra.gmra.mxu0 %vm1902_vm3, %v1899_v63  ;;  %v1752_v60 = vsub.s32 0, %v1750_v1  ;;  %v1665_v14 = vmul.f32 %v1664_v53, %v1662_v59  ;;  %vm4437_vm14 = vcmp.le.f32.partialorder %v4717_v33, 0.7853982  ;;  %v1772_v5 = vsub.s32 4, %v4393_v36 }
 0x1ce   : > { %2541 = vmatpush3.msra.mxu0 %v4316_v54  ;;  %2523 = vmatprep.mubr.msk.f32.mxu0 %vm1902_vm3, %v1900_v15  ;;  %v1561_v54 = vmul.f32 %v1560_v29, %v1558_v20  ;;  %vm4450_vm11 = vcmp.le.f32.partialorder %v1686_v45, 0.7853982  ;;  %v1669_v12 = vsel %vm1584_vm2, %v1668_v27, %v4720_v4  ;;  %v1565_v61 = vsel %vm1480_vm8, %v1564_v31, %v4721_v0 }
 0x1cf   : > { %v2462_v22 = vmin.u32 %v1752_v60, %v1750_v1  ;;  %v1666_v13 = vxor.u32 2147483648, %v1665_v14  ;;  %v1773_v47 = vsel %vm1688_vm15, %v1772_v5, %v4393_v36  ;;  %v1671_v45 = vsel %vm4426_vm10, 0, %v1669_v12 }
 0x1d0   : > { %v1562_v11 = vxor.u32 2147483648, %v1561_v54  ;;  %v1567_v25 = vsel %vm4437_vm14, 0, %v1565_v61  ;;  %v1775_v8 = vsel %vm4450_vm11, 0, %v1773_v47  ;;  %v1675_v41 = vadd.s32 3, %v1671_v45 }
 0x1d1   : > { %v1754_v62 = vclz %v2462_v22  ;;  %2524 = vmatmul.mubr.msk.f32.gmra.mxu0 %vm1902_vm3, %v1901_v6  ;;  %v1667_v58 = vsel %vm1584_vm2, %v1666_v13, %v1665_v14  ;;  %v1571_v63 = vadd.s32 3, %v1567_v25  ;;  %v1779_v16 = vadd.s32 3, %v1775_v8 }
 0x1d2   : > { %2548 = vmatprep.mubr.msk.f32.mxu0 %vm1902_vm3, %v2097_v56  ;;  %v1563_v50 = vsel %vm1480_vm8, %v1562_v11, %v1561_v54  ;;  %v1670_v17 = vsel %vm4426_vm10, %v4712_v37, %v1667_v58  ;;  %vm1778_vm2 = vweird.f32 %v4711_v28  ;;  %vm1674_vm8 = vweird.f32 %v4712_v37  ;;  %v2100_v37 = vld [vmem:[%s4546_s10 + $0x18] sm:$0xff] }
 0x1d3   : > { %v2463_v30 = vadd.s32 4294967294, %v1754_v62  ;;  %v1566_v34 = vsel %vm4437_vm14, %v4713_v55, %v1563_v50  ;;  %2717 = vcosq.f32 %v1670_v17  ;;  %v1572_v59 = vand.u32 3, %v1571_v63 }
 0x1d4   : > { %2719 = vsinq.f32 %v1670_v17  ;;  %v1780_v23 = vand.u32 3, %v1779_v16  ;;  %vm1570_vm10 = vweird.f32 %v4713_v55  ;;  %v2801_v51 = vmov 0.0  }
 0x1d5   : > { %vm2464_vm0 = vcmp.lt.s32.totalorder %v2463_v30, 0  ;;  %2721 = vcosq.f32 %v1566_v34  ;;  %vm1574_vm9 = vcmp.eq.s32.totalorder %v1572_v59, 0  ;;  %vm1577_vm12 = vcmp.eq.s32.totalorder %v1572_v59, 2 }
 0x1d6   : > { %v1757_v46 = vsel %vm2464_vm0, 0, %v2463_v30  ;;  %2723 = vsinq.f32 %v1566_v34  ;;  %vm1785_vm1 = vcmp.eq.s32.totalorder %v1780_v23, 2  ;;  %vm1782_vm5 = vcmp.eq.s32.totalorder %v1780_v23, 0 }
 0x1d7   : > { %v1758_v38 = vsub.s32 32, %v1757_v46  ;;  %v1762_v19 = vsub.s32 4294967266, %v1757_v46  ;;  %v1759_v52 = vshll.u32 %v1750_v1, %v1757_v46  ;;  %v1676_v1 = vand.u32 3, %v1675_v41 }
 0x1d8   : > { %vm1781_vm4 = vcmp.lt.s32.totalorder %v1780_v23, 2  ;;  %vm1573_vm0 = vcmp.lt.s32.totalorder %v1572_v59, 2 }
 0x1d9   : > { %v1760_v39 = vshrl.u32 %v1742_v40, %v1758_v38  ;;  %v1763_v42 = vadd.s32 127, %v1762_v19  ;;  %vm1678_vm7 = vcmp.eq.s32.totalorder %v1676_v1, 0  ;;  %vm1681_vm13 = vcmp.eq.s32.totalorder %v1676_v1, 2 }
 0x1da   : > { %vm1677_vm6 = vcmp.lt.s32.totalorder %v1676_v1, 2 }
 0x1db   : > { %v1761_v57 = vor.u32 %v1760_v39, %v1759_v52  ;;  %v1764_v43 = vshll.u32 %v1763_v42, 23  ;;  %v2214_v52 = vpop.permute.xlu1 %2213  ;;  %v2209_v42 = vpop.permute.xlu0 %2208 }
 0x1dd   : > { %v1765_v9 = vor.u32 4788187, %v1764_v43  ;;  %v1768_v21 = vcvt.s32.f32 %v1761_v57  ;;  %v2729_v43 = vld [vmem:[%s3041_s29] sm:$0x3f]  ;;  %s402_s29 = sand.u32 1, %s2782_s22  }
 0x1de   : > { %v2610_v17 = vtrunc.f32 %v2729_v43  ;;  %s2419_s26 = sshll.u32 %s402_s29, 5  ;;  %s4496_s25 = scalar_lea.sflag [#allocation3], %s402_s29 }
 0x1df   : > { %v1766_v49 = vand.u32 2147483647, %v1765_v9  ;;  %v2224_v39 = vpop.permute.xlu1 %2223  ;;  %v2219_v32 = vpop.permute.xlu0 %2218  ;;  %s404_s28 = scalar_lea.vmem [#allocation2], %s2419_s26  ;;  %s2734_s26 = sshll.u32 %s2802_s20, 4  ;;  %s2735_s26 = int_to_ptr.vmem [resolvable:$false] %s2734_s26 }
 0x1e0   : > { %v2718_v35 = vpop.eup %2717  ;;  %s2353_s30 = sshll.u32 %s404_s28, 4  ;;  %s2736_s15 = scalar_lea.vmem %s2735_s26, 1024  ;;  %s4487_s30 = int_to_ptr.vmem [resolvable:$true] %s2353_s30 }
 0x1e1   : > { %v1769_v7 = vmul.f32 %v1768_v21, %v1766_v49  ;;  %v2720_v2 = vpop.eup %2719  ;;  %v1682_v36 = vxor.u32 2147483648, %v2718_v35  ;;  %v2611_v49 = vcvt.f32.s32 %v2610_v17  ;;  %s2730_s19 = scalar_lea.vmem %s4487_s30, 512  ;;  %p2737_p0 = scmp.lt.s32.totalorder %s4487_s30, %s2735_s26 }
 0x1e2   : > { %v2722_v24 = vpop.eup %2721  ;;  %v1679_v15 = vxor.u32 2147483648, %v2720_v2  ;;  %p2731_p11 = scmp.ne.s32.totalorder %s4487_s30, %s2730_s19  ;;  %p2738_p1 = scmp.lt.s32.totalorder %s2736_s15, %s2730_s19 }
 0x1e3   : > { %v1770_v3 = vxor.u32 2147483648, %v1769_v7  ;;  %v2724_v18 = vpop.eup %2723  ;;  %v1578_v6 = vxor.u32 2147483648, %v2722_v24  ;;  %v1683_v22 = vsel %vm1681_vm13, %v1682_v36, %v2720_v2  ;;  %v2246_v55 = vpop.permute.xlu1 %2245  ;;  %vm2270_vm14 = vcmp.eq.s32.totalorder %v2611_v49, 1 }
 0x1e4   : > { %v1575_v60 = vxor.u32 2147483648, %v2724_v18  ;;  %v1680_v20 = vsel %vm1678_vm7, %v2718_v35, %v1679_v15  ;;  %v2241_v57 = vpop.permute.xlu0 %2240  ;;  %v2482_v12 = vsel %vm2270_vm14, 1.0, %v2801_v51  ;;  %p2732_p12 = pnand %p2731_p11, %p2909_p5  ;;  %p2739_p2 = por %p2738_p1, %p2737_p0 }
 0x1e5   : > { %v1771_v26 = vsel %vm1688_vm15, %v1770_v3, %v1769_v7  ;;  %v1579_v54 = vsel %vm1577_vm12, %v1578_v6, %v2724_v18  ;;  %v1684_v13 = vsel %vm1677_vm6, %v1680_v20, %v1683_v22  ;;  %v4724_v3 = vld [vmem:[#allocation6_spill] sm:$0xff]  ;;  %vm2301_vm15 = vcmp.eq.s32.totalorder %v2611_v49, 2 }
 0x1e6   : > { %v1774_v48 = vsel %vm4450_vm11, %v4711_v28, %v1771_v26  ;;  %v1576_v62 = vsel %vm1574_vm9, %v2722_v24, %v1575_v60  ;;  %v1685_v19 = vsel %vm1674_vm8, nan, %v1684_v13  ;;  %v2098_v28 = vld [vmem:[%s4546_s10 + $0x8] sm:$0xff]  ;;  %v2260_v0 = vsub.s32 2, %v4724_v3  ;;  %p2733_p13 = pneg %p2732_p12 }
 0x1e7   : > { %2725 = vcosq.f32 %v1774_v48  ;;  %v1580_v40 = vsel %vm1573_vm0, %v1576_v62, %v1579_v54  ;;  %v2256_v44 = vpop.permute.xlu1 %2255  ;;  %v2483_v41 = vsel %vm2301_vm15, 1.0, %v2801_v51 }
 0x1e8   : > { %2727 = vsinq.f32 %v1774_v48  ;;  %v1581_v58 = vsel %vm1570_vm10, nan, %v1580_v40  ;;  %v2251_v34 = vpop.permute.xlu0 %2250  ;;  %v2292_v2 = vrot.slane %v2482_v12, %v2260_v0  ;;  %v2323_v6 = vrot.slane %v2483_v41, %v2260_v0  ;;  %p2740_p3 = pnand %p2739_p2, %p2733_p13 }
 0x1eb   : > { %v2279_v50 = vpop.permute.xlu1 %2278 }
 0x1ec   : > { %v2275_v27 = vpop.permute.xlu0 %2274 }
 0x1ef   : > { %v2283_v33 = vpop.permute.xlu1 %2282 }
 0x1f0   : > { %v2287_v61 = vpop.permute.xlu0 %2286 }
 0x1f1   : > { %v2296_v13 = vmul.f32 %v2292_v2, %v2287_v61 }
 0x1f3   : > { %v2306_v4 = vpop.permute.xlu1 %2305 }
 0x1f4   : > { %v2726_v53 = vpop.eup %2725  ;;  %v2310_v36 = vpop.permute.xlu0 %2309 }
 0x1f5   : > { %v2728_v56 = vpop.eup %2727  ;;  %v1786_v14 = vxor.u32 2147483648, %v2726_v53 }
 0x1f6   : > { %v1783_v29 = vxor.u32 2147483648, %v2728_v56 }
 0x1f7   : > { %v1787_v30 = vsel %vm1785_vm1, %v1786_v14, %v2728_v56  ;;  %v2314_v48 = vpop.permute.xlu1 %2313 }
 0x1f8   : > { %v1784_v46 = vsel %vm1782_vm5, %v2726_v53, %v1783_v29  ;;  %v2326_v43 = vmul.f32 %v2323_v6, %v2314_v48 }
 0x1f9   : > { %v1788_v11 = vsel %vm1781_vm4, %v1784_v46, %v1787_v30  ;;  %v2294_v30 = vmul.f32 %v2292_v2, %v2279_v50  ;;  %v2325_v46 = vmul.f32 %v2323_v6, %v2310_v36 }
 0x1fa   : > { %v1789_v38 = vsel %vm1778_vm2, nan, %v1788_v11 }
 0x1fb   : > { %2542 = vmatprep.subr.mxu0 %v1789_v38  ;;  %2555 = vmatprep.subr.mxu1 %v1789_v38  ;;  %v2318_v14 = vpop.permute.xlu1 %2317 }
 0x1fc   : > { %2543 = vmatpush3.msra.mxu0 %v1789_v38  ;;  %2559 = vmatpush3.msra.mxu1 %v1789_v38 }
 0x1fd   : > { %2544 = vmatprep.subr.mxu0 %v1685_v19  ;;  %2556 = vmatprep.subr.mxu1 %v1685_v19 }
 0x1fe   : > { %2545 = vmatpush3.msra.mxu0 %v1685_v19  ;;  %2560 = vmatpush3.msra.mxu1 %v1685_v19 }
 0x1ff   : > { %2546 = vmatprep.subr.mxu0 %v1581_v58  ;;  %2557 = vmatprep.subr.mxu1 %v1581_v58 }
 0x200   : > { %2547 = vmatpush3.msra.mxu0 %v1581_v58  ;;  %2561 = vmatpush3.msra.mxu1 %v1581_v58  ;;  %v2295_v58 = vmul.f32 %v2292_v2, %v2283_v33 }
 0x201   : > { %2549 = vmatmul.mubr.msk.f32.vlgmr.msra.gmra.mxu0 %vm1902_vm3, %v2098_v28  ;;  %2552 = vmatmul.mubr.msk.f32.vlgmr.msra.gmra.mxu1 %vm1902_vm3, %v2100_v37  ;;  %vm2235_vm3 = vcmp.eq.s32.totalorder %v2611_v49, 0  ;;  %v2293_v28 = vmul.f32 %v2292_v2, %v2275_v27  ;;  %v2327_v37 = vmul.f32 %v2323_v6, %v2318_v14 }
 0x202   : > { %v2481_v26 = vsel %vm2235_vm3, 1.0, %v2801_v51 }
 0x203   : > { %v2261_v47 = vrot.slane %v2481_v26, %v2260_v0 }
 0x205   : > { %v2262_v59 = vmul.f32 %v2261_v47, %v2241_v57  ;;  %v2263_v23 = vmul.f32 %v2261_v47, %v2246_v55  ;;  %v2265_v60 = vmul.f32 %v2261_v47, %v2256_v44  ;;  %v2264_v54 = vmul.f32 %v2261_v47, %v2251_v34 }
 0x270   : > { %v2536_v9 = vpop.f32.mrf.mxu1 }
 0x272   : > { %v2078_v7 = vpop.f32.mrf.mxu1 }
 0x274   : > { %v2539_v5 = vpop.f32.mrf.mxu1 }
 0x276   : > { %v2088_v25 = vpop.f32.mrf.mxu1 }
 0x28d   : > { %v2522_v10 = vpop.f32.mrf.mxu0 }
 0x28e   : > { %v2084_v8 = vadd.f32 %v2536_v9, %v2522_v10 }
 0x28f   : > { %v1981_v21 = vpop.f32.mrf.mxu0 }
 0x290   : > { %v2079_v16 = vadd.f32 %v2078_v7, %v1981_v21 }
 0x291   : > { %v2525_v31 = vpop.f32.mrf.mxu0 }
 0x292   : > { %v2094_v35 = vadd.f32 %v2539_v5, %v2525_v31 }
 0x293   : > { %v1991_v45 = vpop.f32.mrf.mxu0 }
 0x294   : > { %v2089_v18 = vadd.f32 %v2088_v25, %v1991_v45 }
 0x2c1   : > { %v2550_v63 = vpop.f32.mrf.mxu0  ;;  %v2553_v24 = vpop.f32.mrf.mxu1 }
 0x2c2   : > { %v2199_v1 = vadd.f32 %v2550_v63, %v2084_v8  ;;  %v2201_v15 = vadd.f32 %v2553_v24, %v2094_v35 }
 0x2c3   : > { %v2179_v53 = vpop.f32.mrf.mxu0  ;;  %v2189_v20 = vpop.f32.mrf.mxu1 }
 0x2c4   : > { %v2227_v22 = vadd.f32 %v2214_v52, %v2199_v1  ;;  %v2229_v56 = vadd.f32 %v2224_v39, %v2201_v15  ;;  %v2198_v29 = vadd.f32 %v2179_v53, %v2079_v16  ;;  %v2200_v62 = vadd.f32 %v2189_v20, %v2089_v18 }
 0x2c5   : > { %v2324_v39 = vmul.f32 %v2323_v6, %v2306_v4 }
 0x2c6   : > { %v2267_v11 = vadd.f32 %v2263_v23, %v2227_v22  ;;  %v2269_v40 = vadd.f32 %v2265_v60, %v2229_v56  ;;  %v2226_v38 = vadd.f32 %v2209_v42, %v2198_v29  ;;  %v2228_v19 = vadd.f32 %v2219_v32, %v2200_v62 }
 0x2c8   : > { %v2300_v55 = vadd.f32 %v2296_v13, %v2269_v40  ;;  %v2266_v44 = vadd.f32 %v2262_v59, %v2226_v38  ;;  %v2268_v57 = vadd.f32 %v2264_v54, %v2228_v19  ;;  %v2298_v52 = vadd.f32 %v2294_v30, %v2267_v11 }
 0x2ca   : > { %v2331_v17 = vadd.f32 %v2327_v37, %v2300_v55  ;;  %v2297_v50 = vadd.f32 %v2293_v28, %v2266_v44  ;;  %v2299_v10 = vadd.f32 %v2295_v58, %v2268_v57  ;;  %v2329_v9 = vadd.f32 %v2325_v46, %v2298_v52 }
 0x2cc   : > { %v2335_v42 = vmax.f32 %v2331_v17, 0.0  ;;  %v2328_v32 = vadd.f32 %v2324_v39, %v2297_v50  ;;  %v2330_v33 = vadd.f32 %v2326_v43, %v2299_v10  ;;  %v2333_v34 = vmax.f32 %v2329_v9, 0.0 }
 0x2ce   : > { %2339 = vst [vmem:[%s404_s28 + $0x18] sm:$0xff] %v2335_v42  ;;  %v2332_v49 = vmax.f32 %v2328_v32, 0.0  ;;  %v2334_v21 = vmax.f32 %v2330_v33, 0.0  ;;  %2337 = vst [vmem:[%s404_s28 + $0x8] sm:$0xff] %v2333_v34 }
 0x2d0   : > { %2336 = vst [vmem:[%s404_s28] sm:$0xff] %v2332_v49  ;;  %2338 = vst [vmem:[%s404_s28 + $0x10] sm:$0xff] %v2334_v21 }
 0x2d1   : > { %2743 = shalt.err (!%p2740_p3)
}
 0x2d2   : > { %s2744_s29 = scalar_lea.hbm %s4492_s18, 512  ;;  %s2748_s17 = scalar_lea.hbm %s4548_s12, 2048 }
 0x2d3   : > { %p2745_p4 = scmp.ne.s32.totalorder %s4492_s18, %s2744_s29  ;;  %p2749_p9 = scmp.lt.s32.totalorder %s4492_s18, %s4548_s12 }
 0x2d4   : > { %p2750_p10 = scmp.lt.s32.totalorder %s2748_s17, %s2744_s29 }
 0x2d5   : > { %p2746_p7 = pnand %p2745_p4, %p2909_p5 }
 0x2d6   : > { %p2751_p11 = por %p2750_p10, %p2749_p9 }
 0x2d7   : > { %p2747_p8 = pneg %p2746_p7 }
 0x2d9   : > { %p2752_p12 = pnand %p2751_p11, %p2747_p8 }
 0x2db   : > { %2755 = shalt.err (!%p2752_p12)
}
 0x2dc   : > { %s2803_s19 = smov 128   ;;  %s2804_s26 = smov 512  }
 0x2dd   : > { %s2805_s15 = smov 8  }
 0x2de   : > { %2612 = dma.vmem_to_hbm [thread:$0]  (%p2909_p5), %s4487_s30, 512, %s4492_s18, %s4496_s25, %s2803_s19, %s2804_s26, %s2805_s15  }
 0x2df PF: > { %p2618_p13 = scmp.ge.s32.totalorder %s2790_s24, 2  ;;  %s2368_s0 = sand.u32 1, %s2778_s21  }
 0x2e0   : > { %s2369_s29 = scalar_lea.sflag [#allocation3], %s2368_s0 }
 0x2e1   : > { %p2615_p0 = pnand %p2618_p13, %p2913_p6 }
 0x2e3   : > { %p2616_p1 = pneg %p2615_p0 }
 0x2e5   : > { %2773 = dma.done.wait (%p2616_p1), %s2369_s29, 512  }
 0x2e6   : > { %2775 = vsyncadd (%p2616_p1), %s2369_s29, 4294966784  ;;  %s4725_s28 = sld [smem:[#allocation5_spill]]  ;;  %p22_p2 = scmp.ge.s32.totalorder %s2896_s27, 6  }
 0x2e7   : > { %s4726_s21 = smov %s2782_s22  ;;  %s4727_s22 = smov %s2786_s23 }
 0x2e8   : > { %s4729_s24 = smov %s2896_s27  ;;  %24 = sbr.rel (!%p22_p2) target bundleno = 5 (0x5), region = 103 }
 0x2ec   : > { %s4728_s23 = smov %s4725_s28 }
 0x2ed   :  { %2374 = vsyncpa [#allocation3], 1 }
 0x2ee   :  { %2376 = vsyncpa [#allocation3 + $0x1], 1 }

</bundles_post_ra>
